<compile_context>
chip_gen: v5e
topology: v5e:2x2
jax: 0.10.0
libtpu: 0.0.40
codegen_flags: <defaults>
</compile_context>

<pallas_src>
import functools

import jax
import jax.numpy as jnp
from jax.experimental import pallas as pl
from jax.experimental.pallas import tpu as pltpu

VMEM_LIMIT = 32 * 1024 * 1024   # fits every generation's scoped VMEM (v7x = 64 MiB phys)


# ----------------------------------------------------------------------------
# helpers
# ----------------------------------------------------------------------------
def _pick_tile(n, target, *, multiple_of=1, min_blocks=2):
    """Largest divisor of n <= target that is a multiple of `multiple_of` when
    possible and leaves >= `min_blocks` grid blocks when possible (so both v7x
    TensorCores get work and the pipeline has something to overlap)."""
    cap = min(n, target, max(1, n // min_blocks))
    fallback = None
    for d in range(cap, 0, -1):
        if n % d:
            continue
        if d % multiple_of == 0:
            return d
        if fallback is None:
            fallback = d
    return fallback if fallback is not None else n


# ----------------------------------------------------------------------------
# Pallas kernels
# ----------------------------------------------------------------------------
def conv1_kernel(p_ref, w_ref, o_ref, st_ref):
    """Layer-1 conv as an im2col matmul; also emits per-tile BN partial stats.

    p_ref: (TM, 25) bf16   w_ref: (25, C1) bf16
    o_ref: (TM, C1) bf16   st_ref: (1, 2, C1) f32 = [sum, sum of squares]
    """
    acc = jnp.dot(p_ref[...], w_ref[...], preferred_element_type=jnp.float32)
    o_ref[...] = acc.astype(o_ref.dtype)
    st_ref[:, 0, :] = jnp.sum(acc, axis=0, keepdims=True)
    st_ref[:, 1, :] = jnp.sum(acc * acc, axis=0, keepdims=True)


def conv2_kernel(xp_ref, w_ref, o_ref, st_ref, *, H, W, K, Cin, RC):
    """Direct 5x5 'same' conv on a zero-padded NHWC block, K-grouped + row-chunked.

    xp_ref: (TB, H+K-1, W+K-1, Cin) bf16 padded activations (halo already zero)
    w_ref:  (K, K*Cin, Cout) bf16 -- w_ref[dy] is the (dx, cin)-packed weight slab
    o_ref:  (TB, H, W, Cout) bf16
    st_ref: (1, 2, Cout) f32 BN partial statistics [sum, sum of squares]
    """
    TB = xp_ref.shape[0]
    Cout = o_ref.shape[-1]
    rows = TB * RC * W                               # rows per chunk (register-sized acc)

    def chunk(c, carry):
        s, ss = carry
        y0 = pl.multiple_of(c * RC, RC)
        acc = jnp.zeros((rows, Cout), jnp.float32)
        for dy in range(K):                          # 5 matmuls, each with K = K*Cin = 160
            pieces = [xp_ref[:, pl.ds(y0 + dy, RC), dx:dx + W, :] for dx in range(K)]
            lhs = jnp.concatenate(pieces, axis=-1).reshape(rows, K * Cin)
            acc = acc + jnp.dot(lhs, w_ref[dy], preferred_element_type=jnp.float32)
        o_ref[:, pl.ds(y0, RC), :, :] = acc.reshape(TB, RC, W, Cout).astype(o_ref.dtype)
        return (s + jnp.sum(acc, axis=0, keepdims=True),
                ss + jnp.sum(acc * acc, axis=0, keepdims=True))

    zero = jnp.zeros((1, Cout), jnp.float32)
    s, ss = jax.lax.fori_loop(0, H // RC, chunk, (zero, zero))
    st_ref[:, 0, :] = s
    st_ref[:, 1, :] = ss


def bn_relu_pool_kernel(x_ref, scale_ref, shift_ref, o_ref, *, C, pad):
    """BatchNorm affine (precomputed batch scale/shift) + ReLU + 2x2/2 max-pool.

    x_ref holds adjacent-W pixel pairs packed along lanes:
      x_ref: (TB, H, W/2, 2C) bf16, lanes [0:C] = even column, [C:2C] = odd column
    scale/shift: (1, 2C) f32 (per-channel values tiled twice)
    o_ref: (TB, H/2 + 2*pad, W/2 + 2*pad, C) bf16; `pad` rows/cols of zeros are the
    fused 'same' padding for the following conv layer.
    """
    TB, H, W2, _ = x_ref.shape
    Ho = H // 2
    y = x_ref[...].astype(jnp.float32) * scale_ref[...] + shift_ref[...]
    h = jnp.maximum(y[..., :C], y[..., C:])              # horizontal 2-max (lane halves)
    h = h.reshape(TB, Ho, 2, W2, C)                      # splits a major dim only (free)
    p = jnp.maximum(h[:, :, 0, :, :], h[:, :, 1, :, :])  # vertical 2-max
    p = jnp.maximum(p, 0.0).astype(o_ref.dtype)          # ReLU commutes with max
    if pad == 0:
        o_ref[...] = p
    else:
        o_ref[...] = jnp.zeros_like(o_ref)               # zero halo for the next conv
        o_ref[:, pad:pad + Ho, pad:pad + W2, :] = p


def fc_kernel(x_ref, w_ref, b_ref, o_ref):
    """(TB, F) bf16 @ (F, N) bf16 + f32 bias -> f32 logits."""
    o_ref[...] = (jnp.dot(x_ref[...], w_ref[...], preferred_element_type=jnp.float32)
                  + b_ref[...])


# ----------------------------------------------------------------------------
# Pallas wrappers
# ----------------------------------------------------------------------------
def conv1_layer(patches, w_mat, *, target_rows=8192):
    M, KK = patches.shape
    Cout = w_mat.shape[1]
    TM = _pick_tile(M, target_rows, multiple_of=8)
    if TM % 8 != 0 and TM != M:                      # respect the (8, 128) block rule
        TM = M
    G = M // TM
    return pl.pallas_call(
        conv1_kernel,
        out_shape=(jax.ShapeDtypeStruct((M, Cout), jnp.bfloat16),
                   jax.ShapeDtypeStruct((G, 2, Cout), jnp.float32)),
        grid=(G,),
        in_specs=[
            pl.BlockSpec((TM, KK), lambda i: (i, 0)),
            pl.BlockSpec((KK, Cout), lambda i: (0, 0)),
        ],
        out_specs=(
            pl.BlockSpec((TM, Cout), lambda i: (i, 0)),
            pl.BlockSpec((1, 2, Cout), lambda i: (i, 0, 0)),
        ),
        compiler_params=pltpu.CompilerParams(
            dimension_semantics=("parallel",), vmem_limit_bytes=VMEM_LIMIT),
    )(patches, w_mat)


def conv2_layer(xp, w_pack, *, H, W, K=5, row_chunk=2, target_batch=4):
    B, Hp, Wp, Cin = xp.shape
    assert Hp == H + K - 1 and Wp == W + K - 1 and H % row_chunk == 0
    Cout = w_pack.shape[-1]
    TB = _pick_tile(B, target_batch)
    G = B // TB
    kern = functools.partial(conv2_kernel, H=H, W=W, K=K, Cin=Cin, RC=row_chunk)
    return pl.pallas_call(
        kern,
        out_shape=(jax.ShapeDtypeStruct((B, H, W, Cout), jnp.bfloat16),
                   jax.ShapeDtypeStruct((G, 2, Cout), jnp.float32)),
        grid=(G,),
        in_specs=[
            pl.BlockSpec((TB, Hp, Wp, Cin), lambda i: (i, 0, 0, 0)),
            pl.BlockSpec((K, K * Cin, Cout), lambda i: (0, 0, 0)),
        ],
        out_specs=(
            pl.BlockSpec((TB, H, W, Cout), lambda i: (i, 0, 0, 0)),
            pl.BlockSpec((1, 2, Cout), lambda i: (i, 0, 0)),
        ),
        compiler_params=pltpu.CompilerParams(
            dimension_semantics=("parallel",), vmem_limit_bytes=VMEM_LIMIT),
    )(xp, w_pack)


def bn_relu_pool(x_pairs, scale2, shift2, *, C, pad=0, target_batch=8):
    """x_pairs: (B, H, W/2, 2C) bf16 -> (B, H/2 + 2*pad, W/2 + 2*pad, C) bf16."""
    B, H, W2, C2 = x_pairs.shape
    out_h, out_w = H // 2 + 2 * pad, W2 + 2 * pad
    TB = _pick_tile(B, target_batch)
    G = B // TB
    kern = functools.partial(bn_relu_pool_kernel, C=C, pad=pad)
    return pl.pallas_call(
        kern,
        out_shape=jax.ShapeDtypeStruct((B, out_h, out_w, C), jnp.bfloat16),
        grid=(G,),
        in_specs=[
            pl.BlockSpec((TB, H, W2, C2), lambda i: (i, 0, 0, 0)),
            pl.BlockSpec((1, C2), lambda i: (0, 0)),
            pl.BlockSpec((1, C2), lambda i: (0, 0)),
        ],
        out_specs=pl.BlockSpec((TB, out_h, out_w, C), lambda i: (i, 0, 0, 0)),
        compiler_params=pltpu.CompilerParams(
            dimension_semantics=("parallel",), vmem_limit_bytes=VMEM_LIMIT),
    )(x_pairs, scale2, shift2)


def fc_layer(x, w, b, *, target_batch=512):
    B, F = x.shape
    N = w.shape[1]
    TB = _pick_tile(B, target_batch, multiple_of=8)
    if TB % 8 != 0:
        TB = B                                      # (8,128) rule: x8 or the full dim
    G = B // TB
    return pl.pallas_call(
        fc_kernel,
        out_shape=jax.ShapeDtypeStruct((B, N), jnp.float32),
        grid=(G,),
        in_specs=[
            pl.BlockSpec((TB, F), lambda i: (i, 0)),
            pl.BlockSpec((F, N), lambda i: (0, 0)),
            pl.BlockSpec((1, N), lambda i: (0, 0)),
        ],
        out_specs=pl.BlockSpec((TB, N), lambda i: (i, 0)),
        compiler_params=pltpu.CompilerParams(
            dimension_semantics=("parallel",), vmem_limit_bytes=VMEM_LIMIT),
    )(x, w, b)


# ----------------------------------------------------------------------------
# JAX glue: layer-1 patches, BN reduction, parameter packing
# ----------------------------------------------------------------------------
def im2col_l1(x_nhwc, k=5, pad=2):
    """'same' 5x5 patches for the 1-channel first layer -> (B*H*W, k*k*C) bf16.
    Kept in JAX: with Cin=1 the patch matrix is tiny."""
    B, H, W, C = x_nhwc.shape
    xp = jnp.pad(x_nhwc, ((0, 0), (pad, pad), (pad, pad), (0, 0)))
    cols = [xp[:, dy:dy + H, dx:dx + W, :] for dy in range(k) for dx in range(k)]
    return jnp.concatenate(cols, axis=-1).reshape(B * H * W, k * k * C)


def bn_scale_shift(stats, n, gamma, beta, eps=1e-5):
    """Per-tile [sum, sumsq] partials -> BN affine scale/shift (train-mode batch stats)."""
    s = jnp.sum(stats[:, 0, :], axis=0)
    ss = jnp.sum(stats[:, 1, :], axis=0)
    mean = s / n
    var = jnp.maximum(ss / n - mean * mean, 0.0)      # biased variance (PyTorch train)
    scale = gamma * jax.lax.rsqrt(var + eps)
    shift = beta - mean * scale
    return scale.reshape(1, -1), shift.reshape(1, -1)


def init_params(key, num_classes=10, in_channels=1):
    ks = jax.random.split(key, 6)
    p = {}
    p["w1"] = 0.05 * jax.random.normal(ks[0], (32, in_channels, 5, 5), jnp.float32)
    p["b1"] = 0.05 * jax.random.normal(ks[1], (32,), jnp.float32)
    p["g1"] = jnp.ones((32,), jnp.float32)            # BatchNorm2d default init
    p["be1"] = jnp.zeros((32,), jnp.float32)
    p["w2"] = 0.05 * jax.random.normal(ks[2], (64, 32, 5, 5), jnp.float32)
    p["b2"] = 0.05 * jax.random.normal(ks[3], (64,), jnp.float32)
    p["g2"] = jnp.ones((64,), jnp.float32)
    p["be2"] = jnp.zeros((64,), jnp.float32)
    p["wfc"] = 0.02 * jax.random.normal(ks[4], (num_classes, 7 * 7 * 64), jnp.float32)
    p["bfc"] = 0.02 * jax.random.normal(ks[5], (num_classes,), jnp.float32)
    return p


def pack_params(p):
    """One-time repack of PyTorch-layout params into kernel-friendly layouts.

    Conv biases b1/b2 are intentionally dropped: a per-channel bias added before
    BatchNorm cancels exactly against the batch-mean subtraction, so the network
    output is mathematically unchanged without them.
    """
    num_classes = p["wfc"].shape[0]
    cout1, cin2, cout2 = p["w1"].shape[0], p["w2"].shape[1], p["w2"].shape[0]
    w1 = jnp.transpose(p["w1"], (2, 3, 1, 0)).reshape(-1, cout1)            # (25, 32)
    w2 = jnp.transpose(p["w2"], (2, 3, 1, 0)).reshape(5, 5 * cin2, cout2)   # (5, 160, 64)
    # FC weight: PyTorch columns are NCHW-flattened (c, h, w); re-order rows to the
    # NHWC-flatten (h, w, c) order of the pooled features, once, ahead of time.
    wfc = jnp.transpose(p["wfc"].reshape(num_classes, cout2, 7, 7), (2, 3, 1, 0))
    wfc = wfc.reshape(7 * 7 * cout2, num_classes)
    return {
        "w1": w1.astype(jnp.bfloat16),
        "g1": p["g1"].astype(jnp.float32), "be1": p["be1"].astype(jnp.float32),
        "w2": w2.astype(jnp.bfloat16),
        "g2": p["g2"].astype(jnp.float32), "be2": p["be2"].astype(jnp.float32),
        "wfc": wfc.astype(jnp.bfloat16),
        "bfc": p["bfc"].reshape(1, -1).astype(jnp.float32),
    }


@jax.jit
def convnet_forward(x_nchw, params):
    B = x_nchw.shape[0]
    x = jnp.transpose(x_nchw, (0, 2, 3, 1)).astype(jnp.bfloat16)      # NCHW -> NHWC bf16

    # ---- layer1: Conv(1->32, 5x5, pad 2) -> BN -> ReLU -> MaxPool2 ----
    p1 = im2col_l1(x)                                                 # (B*784, 25) bf16
    c1, st1 = conv1_layer(p1, params["w1"])                           # (B*784, 32) bf16
    sc1, sh1 = bn_scale_shift(st1, B * 28 * 28, params["g1"], params["be1"])
    # Contiguous (free) reshape packs adjacent-W pixel pairs into the lane dim.
    c1p = c1.reshape(B, 28, 14, 64)
    # Pool writes a zero-padded (B, 18, 18, 32) map = conv2's 'same'-padded input.
    o1 = bn_relu_pool(c1p, jnp.tile(sc1, (1, 2)), jnp.tile(sh1, (1, 2)), C=32, pad=2)

    # ---- layer2: Conv(32->64, 5x5, pad 2) -> BN -> ReLU -> MaxPool2 ----
    c2, st2 = conv2_layer(o1, params["w2"], H=14, W=14)               # (B, 14, 14, 64) bf16
    sc2, sh2 = bn_scale_shift(st2, B * 14 * 14, params["g2"], params["be2"])
    c2p = c2.reshape(B, 14, 7, 128)
    o2 = bn_relu_pool(c2p, jnp.tile(sc2, (1, 2)), jnp.tile(sh2, (1, 2)), C=64)  # (B,7,7,64)

    # ---- fc: weight rows are pre-permuted to NHWC-flatten order ----
    feat = o2.reshape(B, 7 * 7 * 64)                                  # bf16, no transpose
    return fc_layer(feat, params["wfc"], params["bfc"])               # (B, 10) f32


if __name__ == "__main__":
    key = jax.random.PRNGKey(0)
    k_x, k_p = jax.random.split(key)
    # MNIST-style shapes implied by fc = Linear(7*7*64, 10): 28x28 spatial, 1 channel.
    x = jax.random.normal(k_x, (2, 1, 28, 28), dtype=jnp.float32)
    params = pack_params(init_params(k_p, num_classes=10, in_channels=1))

    logits = convnet_forward(x, params)
    jax.block_until_ready(logits)
    assert logits.shape == (2, 10) and logits.dtype == jnp.float32
    print("KERNEL_OK")
</pallas_src>

<mosaic_0001>
module attributes {stable_mosaic.version = 11 : i64} {
  func.func @conv1_kernel(%arg0: i32, %arg1: memref<784x25xbf16, #tpu.memory_space<vmem>>, %arg2: memref<25x32xbf16, #tpu.memory_space<vmem>>, %arg3: memref<784x32xbf16, #tpu.memory_space<vmem>>, %arg4: memref<1x2x32xf32, #tpu.memory_space<vmem>>) attributes {dimension_semantics = [#tpu.dimension_semantics<parallel>], iteration_bounds = array<i64: 2>, scalar_prefetch = 0 : i64, scratch_operands = 0 : i64, tpu.core_type = #tpu.core_type<tc>, window_params = [{transform_indices = @transform_0, window_bounds = array<i64: 784, 25>}, {pipeline_mode = #tpu.pipeline_mode<synchronous>, transform_indices = @transform_1, window_bounds = array<i64: 25, 32>}, {transform_indices = @transform_2, window_bounds = array<i64: 784, 32>}, {transform_indices = @transform_3, window_bounds = array<i64: 1, 2, 32>}]} {
    %c0 = arith.constant 0 : index
    %c0_0 = arith.constant 0 : index
    %0 = vector.load %arg1[%c0, %c0_0] : memref<784x25xbf16, #tpu.memory_space<vmem>>, vector<784x25xbf16>
    %c0_1 = arith.constant 0 : index
    %c0_2 = arith.constant 0 : index
    %1 = vector.load %arg2[%c0_1, %c0_2] : memref<25x32xbf16, #tpu.memory_space<vmem>>, vector<25x32xbf16>
    %cst = arith.constant dense<0.000000e+00> : vector<784x32xf32>
    %2 = tpu.matmul %0, %1, %cst {dimension_numbers = #tpu.dot_dimension_numbers<[1], [0], [0], [1], [0, 0, 1, 1], [], []>} : vector<784x25xbf16>, vector<25x32xbf16>, vector<784x32xf32> -> vector<784x32xf32>
    %3 = arith.truncf %2 : vector<784x32xf32> to vector<784x32xbf16>
    %c0_3 = arith.constant 0 : index
    %c0_4 = arith.constant 0 : index
    %4 = vector.load %arg3[%c0_3, %c0_4] : memref<784x32xbf16, #tpu.memory_space<vmem>>, vector<784x32xbf16>
    tpu.vector_store %arg3[%c0_3, %c0_4], %3 {strides = array<i32>} : memref<784x32xbf16, #tpu.memory_space<vmem>>, vector<784x32xbf16>,
    %cst_5 = arith.constant dense<0.000000e+00> : vector<32xf32>
    %5 = vector.multi_reduction <add>, %2, %cst_5 [0] : vector<784x32xf32> to vector<32xf32>
    %6 = vector.shape_cast %5 : vector<32xf32> to vector<1x32xf32>
    %c0_6 = arith.constant 0 : index
    %c0_7 = arith.constant 0 : index
    %c0_8 = arith.constant 0 : index
    %7 = vector.load %arg4[%c0_6, %c0_7, %c0_8] : memref<1x2x32xf32, #tpu.memory_space<vmem>>, vector<1x1x32xf32>
    %8 = vector.shape_cast %7 : vector<1x1x32xf32> to vector<1x32xf32>
    %9 = vector.shape_cast %6 : vector<1x32xf32> to vector<1x1x32xf32>
    tpu.vector_store %arg4[%c0_6, %c0_7, %c0_8], %9 {strides = array<i32>} : memref<1x2x32xf32, #tpu.memory_space<vmem>>, vector<1x1x32xf32>,
    %10 = arith.mulf %2, %2 : vector<784x32xf32>
    %cst_9 = arith.constant dense<0.000000e+00> : vector<32xf32>
    %11 = vector.multi_reduction <add>, %10, %cst_9 [0] : vector<784x32xf32> to vector<32xf32>
    %12 = vector.shape_cast %11 : vector<32xf32> to vector<1x32xf32>
    %c0_10 = arith.constant 0 : index
    %c1 = arith.constant 1 : index
    %c0_11 = arith.constant 0 : index
    %13 = vector.load %arg4[%c0_10, %c1, %c0_11] : memref<1x2x32xf32, #tpu.memory_space<vmem>>, vector<1x1x32xf32>
    %14 = vector.shape_cast %13 : vector<1x1x32xf32> to vector<1x32xf32>
    %15 = vector.shape_cast %12 : vector<1x32xf32> to vector<1x1x32xf32>
    tpu.vector_store %arg4[%c0_10, %c1, %c0_11], %15 {strides = array<i32>} : memref<1x2x32xf32, #tpu.memory_space<vmem>>, vector<1x1x32xf32>,
    return
  }
  func.func @transform_0(%arg0: i32) -> (i32, i32) {
    %c0_i32 = arith.constant 0 : i32
    %c0_i32_0 = arith.constant 0 : i32
    return %arg0, %c0_i32 : i32, i32
  }
  func.func @transform_1(%arg0: i32) -> (i32, i32) {
    %c0_i32 = arith.constant 0 : i32
    %c0_i32_0 = arith.constant 0 : i32
    %c0_i32_1 = arith.constant 0 : i32
    return %c0_i32, %c0_i32_0 : i32, i32
  }
  func.func @transform_2(%arg0: i32) -> (i32, i32) {
    %c0_i32 = arith.constant 0 : i32
    %c0_i32_0 = arith.constant 0 : i32
    return %arg0, %c0_i32 : i32, i32
  }
  func.func @transform_3(%arg0: i32) -> (i32, i32, i32) {
    %c0_i32 = arith.constant 0 : i32
    %c0_i32_0 = arith.constant 0 : i32
    %c0_i32_1 = arith.constant 0 : i32
    return %arg0, %c0_i32, %c0_i32_0 : i32, i32, i32
  }
}

module attributes {stable_mosaic.version = 11 : i64} {
  func.func @bn_relu_pool_kernel(%arg0: i32, %arg1: memref<1x28x14x64xbf16, #tpu.memory_space<vmem>>, %arg2: memref<1x64xf32, #tpu.memory_space<vmem>>, %arg3: memref<1x64xf32, #tpu.memory_space<vmem>>, %arg4: memref<1x18x18x32xbf16, #tpu.memory_space<vmem>>) attributes {dimension_semantics = [#tpu.dimension_semantics<parallel>], iteration_bounds = array<i64: 2>, scalar_prefetch = 0 : i64, scratch_operands = 0 : i64, tpu.core_type = #tpu.core_type<tc>, window_params = [{transform_indices = @transform_0, window_bounds = array<i64: 1, 28, 14, 64>}, {pipeline_mode = #tpu.pipeline_mode<synchronous>, transform_indices = @transform_1, window_bounds = array<i64: 1, 64>}, {pipeline_mode = #tpu.pipeline_mode<synchronous>, transform_indices = @transform_2, window_bounds = array<i64: 1, 64>}, {transform_indices = @transform_3, window_bounds = array<i64: 1, 18, 18, 32>}]} {
    %c0 = arith.constant 0 : index
    %c0_0 = arith.constant 0 : index
    %c0_1 = arith.constant 0 : index
    %c0_2 = arith.constant 0 : index
    %0 = vector.load %arg1[%c0, %c0_0, %c0_1, %c0_2] : memref<1x28x14x64xbf16, #tpu.memory_space<vmem>>, vector<1x28x14x64xbf16>
    %1 = arith.extf %0 : vector<1x28x14x64xbf16> to vector<1x28x14x64xf32>
    %c0_3 = arith.constant 0 : index
    %c0_4 = arith.constant 0 : index
    %2 = vector.load %arg2[%c0_3, %c0_4] : memref<1x64xf32, #tpu.memory_space<vmem>>, vector<1x64xf32>
    %3 = vector.shape_cast %2 : vector<1x64xf32> to vector<1x1x1x64xf32>
    %4 = vector.broadcast %3 : vector<1x1x1x64xf32> to vector<1x28x14x64xf32>
    %5 = arith.mulf %1, %4 : vector<1x28x14x64xf32>
    %c0_5 = arith.constant 0 : index
    %c0_6 = arith.constant 0 : index
    %6 = vector.load %arg3[%c0_5, %c0_6] : memref<1x64xf32, #tpu.memory_space<vmem>>, vector<1x64xf32>
    %7 = vector.shape_cast %6 : vector<1x64xf32> to vector<1x1x1x64xf32>
    %8 = vector.broadcast %7 : vector<1x1x1x64xf32> to vector<1x28x14x64xf32>
    %9 = arith.addf %5, %8 : vector<1x28x14x64xf32>
    %10 = vector.extract_strided_slice %9 {offsets = [0, 0, 0, 0], sizes = [1, 28, 14, 32], strides = [1, 1, 1, 1]} : vector<1x28x14x64xf32> to vector<1x28x14x32xf32>
    %11 = vector.extract_strided_slice %9 {offsets = [0, 0, 0, 32], sizes = [1, 28, 14, 32], strides = [1, 1, 1, 1]} : vector<1x28x14x64xf32> to vector<1x28x14x32xf32>
    %12 = arith.maximumf %10, %11 : vector<1x28x14x32xf32>
    %13 = vector.shape_cast %12 : vector<1x28x14x32xf32> to vector<1x14x2x14x32xf32>
    %14 = vector.extract_strided_slice %13 {offsets = [0, 0, 0, 0, 0], sizes = [1, 14, 1, 14, 32], strides = [1, 1, 1, 1, 1]} : vector<1x14x2x14x32xf32> to vector<1x14x1x14x32xf32>
    %15 = vector.shape_cast %14 : vector<1x14x1x14x32xf32> to vector<1x14x14x32xf32>
    %16 = vector.extract_strided_slice %13 {offsets = [0, 0, 1, 0, 0], sizes = [1, 14, 1, 14, 32], strides = [1, 1, 1, 1, 1]} : vector<1x14x2x14x32xf32> to vector<1x14x1x14x32xf32>
    %17 = vector.shape_cast %16 : vector<1x14x1x14x32xf32> to vector<1x14x14x32xf32>
    %18 = arith.maximumf %15, %17 : vector<1x14x14x32xf32>
    %cst = arith.constant 0.000000e+00 : f32
    %19 = vector.broadcast %cst : f32 to vector<1x14x14x32xf32>
    %20 = arith.maximumf %18, %19 : vector<1x14x14x32xf32>
    %21 = arith.truncf %20 : vector<1x14x14x32xf32> to vector<1x14x14x32xbf16>
    %cst_7 = arith.constant 0.000000e+00 : bf16
    %22 = vector.broadcast %cst_7 : bf16 to vector<1x18x18x32xbf16>
    %c0_8 = arith.constant 0 : index
    %c0_9 = arith.constant 0 : index
    %c0_10 = arith.constant 0 : index
    %c0_11 = arith.constant 0 : index
    %23 = vector.load %arg4[%c0_8, %c0_9, %c0_10, %c0_11] : memref<1x18x18x32xbf16, #tpu.memory_space<vmem>>, vector<1x18x18x32xbf16>
    tpu.vector_store %arg4[%c0_8, %c0_9, %c0_10, %c0_11], %22 {strides = array<i32>} : memref<1x18x18x32xbf16, #tpu.memory_space<vmem>>, vector<1x18x18x32xbf16>,
    %c0_12 = arith.constant 0 : index
    %c2 = arith.constant 2 : index
    %c2_13 = arith.constant 2 : index
    %c0_14 = arith.constant 0 : index
    %24 = vector.load %arg4[%c0_12, %c2, %c2_13, %c0_14] : memref<1x18x18x32xbf16, #tpu.memory_space<vmem>>, vector<1x14x14x32xbf16>
    tpu.vector_store %arg4[%c0_12, %c2, %c2_13, %c0_14], %21 {strides = array<i32>} : memref<1x18x18x32xbf16, #tpu.memory_space<vmem>>, vector<1x14x14x32xbf16>,
    return
  }
  func.func @transform_0(%arg0: i32) -> (i32, i32, i32, i32) {
    %c0_i32 = arith.constant 0 : i32
    %c0_i32_0 = arith.constant 0 : i32
    %c0_i32_1 = arith.constant 0 : i32
    %c0_i32_2 = arith.constant 0 : i32
    return %arg0, %c0_i32, %c0_i32_0, %c0_i32_1 : i32, i32, i32, i32
  }
  func.func @transform_1(%arg0: i32) -> (i32, i32) {
    %c0_i32 = arith.constant 0 : i32
    %c0_i32_0 = arith.constant 0 : i32
    %c0_i32_1 = arith.constant 0 : i32
    return %c0_i32, %c0_i32_0 : i32, i32
  }
  func.func @transform_2(%arg0: i32) -> (i32, i32) {
    %c0_i32 = arith.constant 0 : i32
    %c0_i32_0 = arith.constant 0 : i32
    %c0_i32_1 = arith.constant 0 : i32
    return %c0_i32, %c0_i32_0 : i32, i32
  }
  func.func @transform_3(%arg0: i32) -> (i32, i32, i32, i32) {
    %c0_i32 = arith.constant 0 : i32
    %c0_i32_0 = arith.constant 0 : i32
    %c0_i32_1 = arith.constant 0 : i32
    %c0_i32_2 = arith.constant 0 : i32
    return %arg0, %c0_i32, %c0_i32_0, %c0_i32_1 : i32, i32, i32, i32
  }
}

module attributes {stable_mosaic.version = 11 : i64} {
  func.func @conv2_kernel(%arg0: i32, %arg1: memref<1x18x18x32xbf16, #tpu.memory_space<vmem>>, %arg2: memref<5x160x64xbf16, #tpu.memory_space<vmem>>, %arg3: memref<1x14x14x64xbf16, #tpu.memory_space<vmem>>, %arg4: memref<1x2x64xf32, #tpu.memory_space<vmem>>) attributes {dimension_semantics = [#tpu.dimension_semantics<parallel>], iteration_bounds = array<i64: 2>, scalar_prefetch = 0 : i64, scratch_operands = 0 : i64, tpu.core_type = #tpu.core_type<tc>, window_params = [{transform_indices = @transform_0, window_bounds = array<i64: 1, 18, 18, 32>}, {pipeline_mode = #tpu.pipeline_mode<synchronous>, transform_indices = @transform_1, window_bounds = array<i64: 5, 160, 64>}, {transform_indices = @transform_2, window_bounds = array<i64: 1, 14, 14, 64>}, {transform_indices = @transform_3, window_bounds = array<i64: 1, 2, 64>}]} {
    %cst = arith.constant 0.000000e+00 : f32
    %0 = vector.broadcast %cst : f32 to vector<1x64xf32>
    %c0_i32 = arith.constant 0 : i32
    %c7_i32 = arith.constant 7 : i32
    %1 = arith.addi %c0_i32, %c7_i32 : i32
    %c1_i32 = arith.constant 1 : i32
    %2:2 = scf.for %arg5 = %c0_i32 to %1 step %c1_i32 iter_args(%arg6 = %0, %arg7 = %0) -> (vector<1x64xf32>, vector<1x64xf32>)  : i32 {
      %c2_i32 = arith.constant 2 : i32
      %9 = arith.muli %arg5, %c2_i32 : i32
      %10 = tpu.assume_multiple %9, 2 : i32
      %cst_5 = arith.constant 0.000000e+00 : f32
      %11 = vector.broadcast %cst_5 : f32 to vector<28x64xf32>
      %c0_i32_6 = arith.constant 0 : i32
      %12 = arith.addi %10, %c0_i32_6 : i32
      %c0_7 = arith.constant 0 : index
      %13 = arith.index_cast %12 : i32 to index
      %c0_8 = arith.constant 0 : index
      %c0_9 = arith.constant 0 : index
      %14 = vector.load %arg1[%c0_7, %13, %c0_8, %c0_9] : memref<1x18x18x32xbf16, #tpu.memory_space<vmem>>, vector<1x2x14x32xbf16>
      %c0_i32_10 = arith.constant 0 : i32
      %15 = arith.addi %10, %c0_i32_10 : i32
      %c0_11 = arith.constant 0 : index
      %16 = arith.index_cast %15 : i32 to index
      %c1_12 = arith.constant 1 : index
      %c0_13 = arith.constant 0 : index
      %17 = vector.load %arg1[%c0_11, %16, %c1_12, %c0_13] : memref<1x18x18x32xbf16, #tpu.memory_space<vmem>>, vector<1x2x14x32xbf16>
      %c0_i32_14 = arith.constant 0 : i32
      %18 = arith.addi %10, %c0_i32_14 : i32
      %c0_15 = arith.constant 0 : index
      %19 = arith.index_cast %18 : i32 to index
      %c2 = arith.constant 2 : index
      %c0_16 = arith.constant 0 : index
      %20 = vector.load %arg1[%c0_15, %19, %c2, %c0_16] : memref<1x18x18x32xbf16, #tpu.memory_space<vmem>>, vector<1x2x14x32xbf16>
      %c0_i32_17 = arith.constant 0 : i32
      %21 = arith.addi %10, %c0_i32_17 : i32
      %c0_18 = arith.constant 0 : index
      %22 = arith.index_cast %21 : i32 to index
      %c3 = arith.constant 3 : index
      %c0_19 = arith.constant 0 : index
      %23 = vector.load %arg1[%c0_18, %22, %c3, %c0_19] : memref<1x18x18x32xbf16, #tpu.memory_space<vmem>>, vector<1x2x14x32xbf16>
      %c0_i32_20 = arith.constant 0 : i32
      %24 = arith.addi %10, %c0_i32_20 : i32
      %c0_21 = arith.constant 0 : index
      %25 = arith.index_cast %24 : i32 to index
      %c4 = arith.constant 4 : index
      %c0_22 = arith.constant 0 : index
      %26 = vector.load %arg1[%c0_21, %25, %c4, %c0_22] : memref<1x18x18x32xbf16, #tpu.memory_space<vmem>>, vector<1x2x14x32xbf16>
      %27 = tpu.concatenate %14, %17, %20, %23, %26 in 3 : vector<1x2x14x32xbf16>, vector<1x2x14x32xbf16>, vector<1x2x14x32xbf16>, vector<1x2x14x32xbf16>, vector<1x2x14x32xbf16> -> vector<1x2x14x160xbf16>
      %28 = vector.shape_cast %27 : vector<1x2x14x160xbf16> to vector<28x160xbf16>
      %c0_23 = arith.constant 0 : index
      %c0_24 = arith.constant 0 : index
      %c0_25 = arith.constant 0 : index
      %29 = vector.load %arg2[%c0_23, %c0_24, %c0_25] : memref<5x160x64xbf16, #tpu.memory_space<vmem>>, vector<1x160x64xbf16>
      %30 = vector.shape_cast %29 : vector<1x160x64xbf16> to vector<160x64xbf16>
      %cst_26 = arith.constant dense<0.000000e+00> : vector<28x64xf32>
      %31 = tpu.matmul %28, %30, %cst_26 {dimension_numbers = #tpu.dot_dimension_numbers<[1], [0], [0], [1], [0, 0, 1, 1], [], []>} : vector<28x160xbf16>, vector<160x64xbf16>, vector<28x64xf32> -> vector<28x64xf32>
      %32 = arith.addf %11, %31 : vector<28x64xf32>
      %c1_i32_27 = arith.constant 1 : i32
      %33 = arith.addi %10, %c1_i32_27 : i32
      %c0_28 = arith.constant 0 : index
      %34 = arith.index_cast %33 : i32 to index
      %c0_29 = arith.constant 0 : index
      %c0_30 = arith.constant 0 : index
      %35 = vector.load %arg1[%c0_28, %34, %c0_29, %c0_30] : memref<1x18x18x32xbf16, #tpu.memory_space<vmem>>, vector<1x2x14x32xbf16>
      %c1_i32_31 = arith.constant 1 : i32
      %36 = arith.addi %10, %c1_i32_31 : i32
      %c0_32 = arith.constant 0 : index
      %37 = arith.index_cast %36 : i32 to index
      %c1_33 = arith.constant 1 : index
      %c0_34 = arith.constant 0 : index
      %38 = vector.load %arg1[%c0_32, %37, %c1_33, %c0_34] : memref<1x18x18x32xbf16, #tpu.memory_space<vmem>>, vector<1x2x14x32xbf16>
      %c1_i32_35 = arith.constant 1 : i32
      %39 = arith.addi %10, %c1_i32_35 : i32
      %c0_36 = arith.constant 0 : index
      %40 = arith.index_cast %39 : i32 to index
      %c2_37 = arith.constant 2 : index
      %c0_38 = arith.constant 0 : index
      %41 = vector.load %arg1[%c0_36, %40, %c2_37, %c0_38] : memref<1x18x18x32xbf16, #tpu.memory_space<vmem>>, vector<1x2x14x32xbf16>
      %c1_i32_39 = arith.constant 1 : i32
      %42 = arith.addi %10, %c1_i32_39 : i32
      %c0_40 = arith.constant 0 : index
      %43 = arith.index_cast %42 : i32 to index
      %c3_41 = arith.constant 3 : index
      %c0_42 = arith.constant 0 : index
      %44 = vector.load %arg1[%c0_40, %43, %c3_41, %c0_42] : memref<1x18x18x32xbf16, #tpu.memory_space<vmem>>, vector<1x2x14x32xbf16>
      %c1_i32_43 = arith.constant 1 : i32
      %45 = arith.addi %10, %c1_i32_43 : i32
      %c0_44 = arith.constant 0 : index
      %46 = arith.index_cast %45 : i32 to index
      %c4_45 = arith.constant 4 : index
      %c0_46 = arith.constant 0 : index
      %47 = vector.load %arg1[%c0_44, %46, %c4_45, %c0_46] : memref<1x18x18x32xbf16, #tpu.memory_space<vmem>>, vector<1x2x14x32xbf16>
      %48 = tpu.concatenate %35, %38, %41, %44, %47 in 3 : vector<1x2x14x32xbf16>, vector<1x2x14x32xbf16>, vector<1x2x14x32xbf16>, vector<1x2x14x32xbf16>, vector<1x2x14x32xbf16> -> vector<1x2x14x160xbf16>
      %49 = vector.shape_cast %48 : vector<1x2x14x160xbf16> to vector<28x160xbf16>
      %c1_47 = arith.constant 1 : index
      %c0_48 = arith.constant 0 : index
      %c0_49 = arith.constant 0 : index
      %50 = vector.load %arg2[%c1_47, %c0_48, %c0_49] : memref<5x160x64xbf16, #tpu.memory_space<vmem>>, vector<1x160x64xbf16>
      %51 = vector.shape_cast %50 : vector<1x160x64xbf16> to vector<160x64xbf16>
      %cst_50 = arith.constant dense<0.000000e+00> : vector<28x64xf32>
      %52 = tpu.matmul %49, %51, %cst_50 {dimension_numbers = #tpu.dot_dimension_numbers<[1], [0], [0], [1], [0, 0, 1, 1], [], []>} : vector<28x160xbf16>, vector<160x64xbf16>, vector<28x64xf32> -> vector<28x64xf32>
      %53 = arith.addf %32, %52 : vector<28x64xf32>
      %c2_i32_51 = arith.constant 2 : i32
      %54 = arith.addi %10, %c2_i32_51 : i32
      %c0_52 = arith.constant 0 : index
      %55 = arith.index_cast %54 : i32 to index
      %c0_53 = arith.constant 0 : index
      %c0_54 = arith.constant 0 : index
      %56 = vector.load %arg1[%c0_52, %55, %c0_53, %c0_54] : memref<1x18x18x32xbf16, #tpu.memory_space<vmem>>, vector<1x2x14x32xbf16>
      %c2_i32_55 = arith.constant 2 : i32
      %57 = arith.addi %10, %c2_i32_55 : i32
      %c0_56 = arith.constant 0 : index
      %58 = arith.index_cast %57 : i32 to index
      %c1_57 = arith.constant 1 : index
      %c0_58 = arith.constant 0 : index
      %59 = vector.load %arg1[%c0_56, %58, %c1_57, %c0_58] : memref<1x18x18x32xbf16, #tpu.memory_space<vmem>>, vector<1x2x14x32xbf16>
      %c2_i32_59 = arith.constant 2 : i32
      %60 = arith.addi %10, %c2_i32_59 : i32
      %c0_60 = arith.constant 0 : index
      %61 = arith.index_cast %60 : i32 to index
      %c2_61 = arith.constant 2 : index
      %c0_62 = arith.constant 0 : index
      %62 = vector.load %arg1[%c0_60, %61, %c2_61, %c0_62] : memref<1x18x18x32xbf16, #tpu.memory_space<vmem>>, vector<1x2x14x32xbf16>
      %c2_i32_63 = arith.constant 2 : i32
      %63 = arith.addi %10, %c2_i32_63 : i32
      %c0_64 = arith.constant 0 : index
      %64 = arith.index_cast %63 : i32 to index
      %c3_65 = arith.constant 3 : index
      %c0_66 = arith.constant 0 : index
      %65 = vector.load %arg1[%c0_64, %64, %c3_65, %c0_66] : memref<1x18x18x32xbf16, #tpu.memory_space<vmem>>, vector<1x2x14x32xbf16>
      %c2_i32_67 = arith.constant 2 : i32
      %66 = arith.addi %10, %c2_i32_67 : i32
      %c0_68 = arith.constant 0 : index
      %67 = arith.index_cast %66 : i32 to index
      %c4_69 = arith.constant 4 : index
      %c0_70 = arith.constant 0 : index
      %68 = vector.load %arg1[%c0_68, %67, %c4_69, %c0_70] : memref<1x18x18x32xbf16, #tpu.memory_space<vmem>>, vector<1x2x14x32xbf16>
      %69 = tpu.concatenate %56, %59, %62, %65, %68 in 3 : vector<1x2x14x32xbf16>, vector<1x2x14x32xbf16>, vector<1x2x14x32xbf16>, vector<1x2x14x32xbf16>, vector<1x2x14x32xbf16> -> vector<1x2x14x160xbf16>
      %70 = vector.shape_cast %69 : vector<1x2x14x160xbf16> to vector<28x160xbf16>
      %c2_71 = arith.constant 2 : index
      %c0_72 = arith.constant 0 : index
      %c0_73 = arith.constant 0 : index
      %71 = vector.load %arg2[%c2_71, %c0_72, %c0_73] : memref<5x160x64xbf16, #tpu.memory_space<vmem>>, vector<1x160x64xbf16>
      %72 = vector.shape_cast %71 : vector<1x160x64xbf16> to vector<160x64xbf16>
      %cst_74 = arith.constant dense<0.000000e+00> : vector<28x64xf32>
      %73 = tpu.matmul %70, %72, %cst_74 {dimension_numbers = #tpu.dot_dimension_numbers<[1], [0], [0], [1], [0, 0, 1, 1], [], []>} : vector<28x160xbf16>, vector<160x64xbf16>, vector<28x64xf32> -> vector<28x64xf32>
      %74 = arith.addf %53, %73 : vector<28x64xf32>
      %c3_i32 = arith.constant 3 : i32
      %75 = arith.addi %10, %c3_i32 : i32
      %c0_75 = arith.constant 0 : index
      %76 = arith.index_cast %75 : i32 to index
      %c0_76 = arith.constant 0 : index
      %c0_77 = arith.constant 0 : index
      %77 = vector.load %arg1[%c0_75, %76, %c0_76, %c0_77] : memref<1x18x18x32xbf16, #tpu.memory_space<vmem>>, vector<1x2x14x32xbf16>
      %c3_i32_78 = arith.constant 3 : i32
      %78 = arith.addi %10, %c3_i32_78 : i32
      %c0_79 = arith.constant 0 : index
      %79 = arith.index_cast %78 : i32 to index
      %c1_80 = arith.constant 1 : index
      %c0_81 = arith.constant 0 : index
      %80 = vector.load %arg1[%c0_79, %79, %c1_80, %c0_81] : memref<1x18x18x32xbf16, #tpu.memory_space<vmem>>, vector<1x2x14x32xbf16>
      %c3_i32_82 = arith.constant 3 : i32
      %81 = arith.addi %10, %c3_i32_82 : i32
      %c0_83 = arith.constant 0 : index
      %82 = arith.index_cast %81 : i32 to index
      %c2_84 = arith.constant 2 : index
      %c0_85 = arith.constant 0 : index
      %83 = vector.load %arg1[%c0_83, %82, %c2_84, %c0_85] : memref<1x18x18x32xbf16, #tpu.memory_space<vmem>>, vector<1x2x14x32xbf16>
      %c3_i32_86 = arith.constant 3 : i32
      %84 = arith.addi %10, %c3_i32_86 : i32
      %c0_87 = arith.constant 0 : index
      %85 = arith.index_cast %84 : i32 to index
      %c3_88 = arith.constant 3 : index
      %c0_89 = arith.constant 0 : index
      %86 = vector.load %arg1[%c0_87, %85, %c3_88, %c0_89] : memref<1x18x18x32xbf16, #tpu.memory_space<vmem>>, vector<1x2x14x32xbf16>
      %c3_i32_90 = arith.constant 3 : i32
      %87 = arith.addi %10, %c3_i32_90 : i32
      %c0_91 = arith.constant 0 : index
      %88 = arith.index_cast %87 : i32 to index
      %c4_92 = arith.constant 4 : index
      %c0_93 = arith.constant 0 : index
      %89 = vector.load %arg1[%c0_91, %88, %c4_92, %c0_93] : memref<1x18x18x32xbf16, #tpu.memory_space<vmem>>, vector<1x2x14x32xbf16>
      %90 = tpu.concatenate %77, %80, %83, %86, %89 in 3 : vector<1x2x14x32xbf16>, vector<1x2x14x32xbf16>, vector<1x2x14x32xbf16>, vector<1x2x14x32xbf16>, vector<1x2x14x32xbf16> -> vector<1x2x14x160xbf16>
      %91 = vector.shape_cast %90 : vector<1x2x14x160xbf16> to vector<28x160xbf16>
      %c3_94 = arith.constant 3 : index
      %c0_95 = arith.constant 0 : index
      %c0_96 = arith.constant 0 : index
      %92 = vector.load %arg2[%c3_94, %c0_95, %c0_96] : memref<5x160x64xbf16, #tpu.memory_space<vmem>>, vector<1x160x64xbf16>
      %93 = vector.shape_cast %92 : vector<1x160x64xbf16> to vector<160x64xbf16>
      %cst_97 = arith.constant dense<0.000000e+00> : vector<28x64xf32>
      %94 = tpu.matmul %91, %93, %cst_97 {dimension_numbers = #tpu.dot_dimension_numbers<[1], [0], [0], [1], [0, 0, 1, 1], [], []>} : vector<28x160xbf16>, vector<160x64xbf16>, vector<28x64xf32> -> vector<28x64xf32>
      %95 = arith.addf %74, %94 : vector<28x64xf32>
      %c4_i32 = arith.constant 4 : i32
      %96 = arith.addi %10, %c4_i32 : i32
      %c0_98 = arith.constant 0 : index
      %97 = arith.index_cast %96 : i32 to index
      %c0_99 = arith.constant 0 : index
      %c0_100 = arith.constant 0 : index
      %98 = vector.load %arg1[%c0_98, %97, %c0_99, %c0_100] : memref<1x18x18x32xbf16, #tpu.memory_space<vmem>>, vector<1x2x14x32xbf16>
      %c4_i32_101 = arith.constant 4 : i32
      %99 = arith.addi %10, %c4_i32_101 : i32
      %c0_102 = arith.constant 0 : index
      %100 = arith.index_cast %99 : i32 to index
      %c1_103 = arith.constant 1 : index
      %c0_104 = arith.constant 0 : index
      %101 = vector.load %arg1[%c0_102, %100, %c1_103, %c0_104] : memref<1x18x18x32xbf16, #tpu.memory_space<vmem>>, vector<1x2x14x32xbf16>
      %c4_i32_105 = arith.constant 4 : i32
      %102 = arith.addi %10, %c4_i32_105 : i32
      %c0_106 = arith.constant 0 : index
      %103 = arith.index_cast %102 : i32 to index
      %c2_107 = arith.constant 2 : index
      %c0_108 = arith.constant 0 : index
      %104 = vector.load %arg1[%c0_106, %103, %c2_107, %c0_108] : memref<1x18x18x32xbf16, #tpu.memory_space<vmem>>, vector<1x2x14x32xbf16>
      %c4_i32_109 = arith.constant 4 : i32
      %105 = arith.addi %10, %c4_i32_109 : i32
      %c0_110 = arith.constant 0 : index
      %106 = arith.index_cast %105 : i32 to index
      %c3_111 = arith.constant 3 : index
      %c0_112 = arith.constant 0 : index
      %107 = vector.load %arg1[%c0_110, %106, %c3_111, %c0_112] : memref<1x18x18x32xbf16, #tpu.memory_space<vmem>>, vector<1x2x14x32xbf16>
      %c4_i32_113 = arith.constant 4 : i32
      %108 = arith.addi %10, %c4_i32_113 : i32
      %c0_114 = arith.constant 0 : index
      %109 = arith.index_cast %108 : i32 to index
      %c4_115 = arith.constant 4 : index
      %c0_116 = arith.constant 0 : index
      %110 = vector.load %arg1[%c0_114, %109, %c4_115, %c0_116] : memref<1x18x18x32xbf16, #tpu.memory_space<vmem>>, vector<1x2x14x32xbf16>
      %111 = tpu.concatenate %98, %101, %104, %107, %110 in 3 : vector<1x2x14x32xbf16>, vector<1x2x14x32xbf16>, vector<1x2x14x32xbf16>, vector<1x2x14x32xbf16>, vector<1x2x14x32xbf16> -> vector<1x2x14x160xbf16>
      %112 = vector.shape_cast %111 : vector<1x2x14x160xbf16> to vector<28x160xbf16>
      %c4_117 = arith.constant 4 : index
      %c0_118 = arith.constant 0 : index
      %c0_119 = arith.constant 0 : index
      %113 = vector.load %arg2[%c4_117, %c0_118, %c0_119] : memref<5x160x64xbf16, #tpu.memory_space<vmem>>, vector<1x160x64xbf16>
      %114 = vector.shape_cast %113 : vector<1x160x64xbf16> to vector<160x64xbf16>
      %cst_120 = arith.constant dense<0.000000e+00> : vector<28x64xf32>
      %115 = tpu.matmul %112, %114, %cst_120 {dimension_numbers = #tpu.dot_dimension_numbers<[1], [0], [0], [1], [0, 0, 1, 1], [], []>} : vector<28x160xbf16>, vector<160x64xbf16>, vector<28x64xf32> -> vector<28x64xf32>
      %116 = arith.addf %95, %115 : vector<28x64xf32>
      %117 = vector.shape_cast %116 : vector<28x64xf32> to vector<1x2x14x64xf32>
      %118 = arith.truncf %117 : vector<1x2x14x64xf32> to vector<1x2x14x64xbf16>
      %c0_121 = arith.constant 0 : index
      %119 = arith.index_cast %10 : i32 to index
      %c0_122 = arith.constant 0 : index
      %c0_123 = arith.constant 0 : index
      %120 = vector.load %arg3[%c0_121, %119, %c0_122, %c0_123] : memref<1x14x14x64xbf16, #tpu.memory_space<vmem>>, vector<1x2x14x64xbf16>
      tpu.vector_store %arg3[%c0_121, %119, %c0_122, %c0_123], %118 {strides = array<i32>} : memref<1x14x14x64xbf16, #tpu.memory_space<vmem>>, vector<1x2x14x64xbf16>,
      %cst_124 = arith.constant dense<0.000000e+00> : vector<64xf32>
      %121 = vector.multi_reduction <add>, %116, %cst_124 [0] : vector<28x64xf32> to vector<64xf32>
      %122 = vector.shape_cast %121 : vector<64xf32> to vector<1x64xf32>
      %123 = arith.addf %arg6, %122 : vector<1x64xf32>
      %124 = arith.mulf %116, %116 : vector<28x64xf32>
      %cst_125 = arith.constant dense<0.000000e+00> : vector<64xf32>
      %125 = vector.multi_reduction <add>, %124, %cst_125 [0] : vector<28x64xf32> to vector<64xf32>
      %126 = vector.shape_cast %125 : vector<64xf32> to vector<1x64xf32>
      %127 = arith.addf %arg7, %126 : vector<1x64xf32>
      scf.yield %123, %127 : vector<1x64xf32>, vector<1x64xf32>
    }
    %c7_i32_0 = arith.constant 7 : i32
    %c0 = arith.constant 0 : index
    %c0_1 = arith.constant 0 : index
    %c0_2 = arith.constant 0 : index
    %3 = vector.load %arg4[%c0, %c0_1, %c0_2] : memref<1x2x64xf32, #tpu.memory_space<vmem>>, vector<1x1x64xf32>
    %4 = vector.shape_cast %3 : vector<1x1x64xf32> to vector<1x64xf32>
    %5 = vector.shape_cast %2#0 : vector<1x64xf32> to vector<1x1x64xf32>
    tpu.vector_store %arg4[%c0, %c0_1, %c0_2], %5 {strides = array<i32>} : memref<1x2x64xf32, #tpu.memory_space<vmem>>, vector<1x1x64xf32>,
    %c0_3 = arith.constant 0 : index
    %c1 = arith.constant 1 : index
    %c0_4 = arith.constant 0 : index
    %6 = vector.load %arg4[%c0_3, %c1, %c0_4] : memref<1x2x64xf32, #tpu.memory_space<vmem>>, vector<1x1x64xf32>
    %7 = vector.shape_cast %6 : vector<1x1x64xf32> to vector<1x64xf32>
    %8 = vector.shape_cast %2#1 : vector<1x64xf32> to vector<1x1x64xf32>
    tpu.vector_store %arg4[%c0_3, %c1, %c0_4], %8 {strides = array<i32>} : memref<1x2x64xf32, #tpu.memory_space<vmem>>, vector<1x1x64xf32>,
    return
  }
  func.func @transform_0(%arg0: i32) -> (i32, i32, i32, i32) {
    %c0_i32 = arith.constant 0 : i32
    %c0_i32_0 = arith.constant 0 : i32
    %c0_i32_1 = arith.constant 0 : i32
    %c0_i32_2 = arith.constant 0 : i32
    return %arg0, %c0_i32, %c0_i32_0, %c0_i32_1 : i32, i32, i32, i32
  }
  func.func @transform_1(%arg0: i32) -> (i32, i32, i32) {
    %c0_i32 = arith.constant 0 : i32
    %c0_i32_0 = arith.constant 0 : i32
    %c0_i32_1 = arith.constant 0 : i32
    %c0_i32_2 = arith.constant 0 : i32
    return %c0_i32, %c0_i32_0, %c0_i32_1 : i32, i32, i32
  }
  func.func @transform_2(%arg0: i32) -> (i32, i32, i32, i32) {
    %c0_i32 = arith.constant 0 : i32
    %c0_i32_0 = arith.constant 0 : i32
    %c0_i32_1 = arith.constant 0 : i32
    %c0_i32_2 = arith.constant 0 : i32
    return %arg0, %c0_i32, %c0_i32_0, %c0_i32_1 : i32, i32, i32, i32
  }
  func.func @transform_3(%arg0: i32) -> (i32, i32, i32) {
    %c0_i32 = arith.constant 0 : i32
    %c0_i32_0 = arith.constant 0 : i32
    %c0_i32_1 = arith.constant 0 : i32
    return %arg0, %c0_i32, %c0_i32_0 : i32, i32, i32
  }
}

module attributes {stable_mosaic.version = 11 : i64} {
  func.func @bn_relu_pool_kernel(%arg0: i32, %arg1: memref<1x14x7x128xbf16, #tpu.memory_space<vmem>>, %arg2: memref<1x128xf32, #tpu.memory_space<vmem>>, %arg3: memref<1x128xf32, #tpu.memory_space<vmem>>, %arg4: memref<1x7x7x64xbf16, #tpu.memory_space<vmem>>) attributes {dimension_semantics = [#tpu.dimension_semantics<parallel>], iteration_bounds = array<i64: 2>, scalar_prefetch = 0 : i64, scratch_operands = 0 : i64, tpu.core_type = #tpu.core_type<tc>, window_params = [{transform_indices = @transform_0, window_bounds = array<i64: 1, 14, 7, 128>}, {pipeline_mode = #tpu.pipeline_mode<synchronous>, transform_indices = @transform_1, window_bounds = array<i64: 1, 128>}, {pipeline_mode = #tpu.pipeline_mode<synchronous>, transform_indices = @transform_2, window_bounds = array<i64: 1, 128>}, {transform_indices = @transform_3, window_bounds = array<i64: 1, 7, 7, 64>}]} {
    %c0 = arith.constant 0 : index
    %c0_0 = arith.constant 0 : index
    %c0_1 = arith.constant 0 : index
    %c0_2 = arith.constant 0 : index
    %0 = vector.load %arg1[%c0, %c0_0, %c0_1, %c0_2] : memref<1x14x7x128xbf16, #tpu.memory_space<vmem>>, vector<1x14x7x128xbf16>
    %1 = arith.extf %0 : vector<1x14x7x128xbf16> to vector<1x14x7x128xf32>
    %c0_3 = arith.constant 0 : index
    %c0_4 = arith.constant 0 : index
    %2 = vector.load %arg2[%c0_3, %c0_4] : memref<1x128xf32, #tpu.memory_space<vmem>>, vector<1x128xf32>
    %3 = vector.shape_cast %2 : vector<1x128xf32> to vector<1x1x1x128xf32>
    %4 = vector.broadcast %3 : vector<1x1x1x128xf32> to vector<1x14x7x128xf32>
    %5 = arith.mulf %1, %4 : vector<1x14x7x128xf32>
    %c0_5 = arith.constant 0 : index
    %c0_6 = arith.constant 0 : index
    %6 = vector.load %arg3[%c0_5, %c0_6] : memref<1x128xf32, #tpu.memory_space<vmem>>, vector<1x128xf32>
    %7 = vector.shape_cast %6 : vector<1x128xf32> to vector<1x1x1x128xf32>
    %8 = vector.broadcast %7 : vector<1x1x1x128xf32> to vector<1x14x7x128xf32>
    %9 = arith.addf %5, %8 : vector<1x14x7x128xf32>
    %10 = vector.extract_strided_slice %9 {offsets = [0, 0, 0, 0], sizes = [1, 14, 7, 64], strides = [1, 1, 1, 1]} : vector<1x14x7x128xf32> to vector<1x14x7x64xf32>
    %11 = vector.extract_strided_slice %9 {offsets = [0, 0, 0, 64], sizes = [1, 14, 7, 64], strides = [1, 1, 1, 1]} : vector<1x14x7x128xf32> to vector<1x14x7x64xf32>
    %12 = arith.maximumf %10, %11 : vector<1x14x7x64xf32>
    %13 = vector.shape_cast %12 : vector<1x14x7x64xf32> to vector<1x7x2x7x64xf32>
    %14 = vector.extract_strided_slice %13 {offsets = [0, 0, 0, 0, 0], sizes = [1, 7, 1, 7, 64], strides = [1, 1, 1, 1, 1]} : vector<1x7x2x7x64xf32> to vector<1x7x1x7x64xf32>
    %15 = vector.shape_cast %14 : vector<1x7x1x7x64xf32> to vector<1x7x7x64xf32>
    %16 = vector.extract_strided_slice %13 {offsets = [0, 0, 1, 0, 0], sizes = [1, 7, 1, 7, 64], strides = [1, 1, 1, 1, 1]} : vector<1x7x2x7x64xf32> to vector<1x7x1x7x64xf32>
    %17 = vector.shape_cast %16 : vector<1x7x1x7x64xf32> to vector<1x7x7x64xf32>
    %18 = arith.maximumf %15, %17 : vector<1x7x7x64xf32>
    %cst = arith.constant 0.000000e+00 : f32
    %19 = vector.broadcast %cst : f32 to vector<1x7x7x64xf32>
    %20 = arith.maximumf %18, %19 : vector<1x7x7x64xf32>
    %21 = arith.truncf %20 : vector<1x7x7x64xf32> to vector<1x7x7x64xbf16>
    %c0_7 = arith.constant 0 : index
    %c0_8 = arith.constant 0 : index
    %c0_9 = arith.constant 0 : index
    %c0_10 = arith.constant 0 : index
    %22 = vector.load %arg4[%c0_7, %c0_8, %c0_9, %c0_10] : memref<1x7x7x64xbf16, #tpu.memory_space<vmem>>, vector<1x7x7x64xbf16>
    tpu.vector_store %arg4[%c0_7, %c0_8, %c0_9, %c0_10], %21 {strides = array<i32>} : memref<1x7x7x64xbf16, #tpu.memory_space<vmem>>, vector<1x7x7x64xbf16>,
    return
  }
  func.func @transform_0(%arg0: i32) -> (i32, i32, i32, i32) {
    %c0_i32 = arith.constant 0 : i32
    %c0_i32_0 = arith.constant 0 : i32
    %c0_i32_1 = arith.constant 0 : i32
    %c0_i32_2 = arith.constant 0 : i32
    return %arg0, %c0_i32, %c0_i32_0, %c0_i32_1 : i32, i32, i32, i32
  }
  func.func @transform_1(%arg0: i32) -> (i32, i32) {
    %c0_i32 = arith.constant 0 : i32
    %c0_i32_0 = arith.constant 0 : i32
    %c0_i32_1 = arith.constant 0 : i32
    return %c0_i32, %c0_i32_0 : i32, i32
  }
  func.func @transform_2(%arg0: i32) -> (i32, i32) {
    %c0_i32 = arith.constant 0 : i32
    %c0_i32_0 = arith.constant 0 : i32
    %c0_i32_1 = arith.constant 0 : i32
    return %c0_i32, %c0_i32_0 : i32, i32
  }
  func.func @transform_3(%arg0: i32) -> (i32, i32, i32, i32) {
    %c0_i32 = arith.constant 0 : i32
    %c0_i32_0 = arith.constant 0 : i32
    %c0_i32_1 = arith.constant 0 : i32
    %c0_i32_2 = arith.constant 0 : i32
    return %arg0, %c0_i32, %c0_i32_0, %c0_i32_1 : i32, i32, i32, i32
  }
}

module attributes {stable_mosaic.version = 11 : i64} {
  func.func @fc_kernel(%arg0: i32, %arg1: memref<2x3136xbf16, #tpu.memory_space<vmem>>, %arg2: memref<3136x10xbf16, #tpu.memory_space<vmem>>, %arg3: memref<1x10xf32, #tpu.memory_space<vmem>>, %arg4: memref<2x10xf32, #tpu.memory_space<vmem>>) attributes {dimension_semantics = [#tpu.dimension_semantics<parallel>], iteration_bounds = array<i64: 1>, scalar_prefetch = 0 : i64, scratch_operands = 0 : i64, tpu.core_type = #tpu.core_type<tc>, window_params = [{transform_indices = @transform_0, window_bounds = array<i64: 2, 3136>}, {pipeline_mode = #tpu.pipeline_mode<synchronous>, transform_indices = @transform_1, window_bounds = array<i64: 3136, 10>}, {pipeline_mode = #tpu.pipeline_mode<synchronous>, transform_indices = @transform_2, window_bounds = array<i64: 1, 10>}, {transform_indices = @transform_3, window_bounds = array<i64: 2, 10>}]} {
    %c0 = arith.constant 0 : index
    %c0_0 = arith.constant 0 : index
    %0 = vector.load %arg1[%c0, %c0_0] : memref<2x3136xbf16, #tpu.memory_space<vmem>>, vector<2x3136xbf16>
    %c0_1 = arith.constant 0 : index
    %c0_2 = arith.constant 0 : index
    %1 = vector.load %arg2[%c0_1, %c0_2] : memref<3136x10xbf16, #tpu.memory_space<vmem>>, vector<3136x10xbf16>
    %cst = arith.constant dense<0.000000e+00> : vector<2x10xf32>
    %2 = tpu.matmul %0, %1, %cst {dimension_numbers = #tpu.dot_dimension_numbers<[1], [0], [0], [1], [0, 0, 1, 1], [], []>} : vector<2x3136xbf16>, vector<3136x10xbf16>, vector<2x10xf32> -> vector<2x10xf32>
    %c0_3 = arith.constant 0 : index
    %c0_4 = arith.constant 0 : index
    %3 = vector.load %arg3[%c0_3, %c0_4] : memref<1x10xf32, #tpu.memory_space<vmem>>, vector<1x10xf32>
    %4 = vector.broadcast %3 : vector<1x10xf32> to vector<2x10xf32>
    %5 = arith.addf %2, %4 : vector<2x10xf32>
    %c0_5 = arith.constant 0 : index
    %c0_6 = arith.constant 0 : index
    %6 = vector.load %arg4[%c0_5, %c0_6] : memref<2x10xf32, #tpu.memory_space<vmem>>, vector<2x10xf32>
    tpu.vector_store %arg4[%c0_5, %c0_6], %5 {strides = array<i32>} : memref<2x10xf32, #tpu.memory_space<vmem>>, vector<2x10xf32>,
    return
  }
  func.func @transform_0(%arg0: i32) -> (i32, i32) {
    %c0_i32 = arith.constant 0 : i32
    %c0_i32_0 = arith.constant 0 : i32
    return %arg0, %c0_i32 : i32, i32
  }
  func.func @transform_1(%arg0: i32) -> (i32, i32) {
    %c0_i32 = arith.constant 0 : i32
    %c0_i32_0 = arith.constant 0 : i32
    %c0_i32_1 = arith.constant 0 : i32
    return %c0_i32, %c0_i32_0 : i32, i32
  }
  func.func @transform_2(%arg0: i32) -> (i32, i32) {
    %c0_i32 = arith.constant 0 : i32
    %c0_i32_0 = arith.constant 0 : i32
    %c0_i32_1 = arith.constant 0 : i32
    return %c0_i32, %c0_i32_0 : i32, i32
  }
  func.func @transform_3(%arg0: i32) -> (i32, i32) {
    %c0_i32 = arith.constant 0 : i32
    %c0_i32_0 = arith.constant 0 : i32
    return %arg0, %c0_i32 : i32, i32
  }
}

</mosaic_0001>

<bundles_post_ra>
// kernel: convnet_forward.5
= control target key start
LH: loop header
LB: loop body
LE: loop exit
PB: predicated region body
PF: predicated region fallthrough
CT: control target
= control target key end

     0   :  { %s2099_s12 = smov 0   ;;  %s3207_s0 = inlined_call_operand.vmem [shape: bf16[1568,25], index: 0, kind: input, shape index: {}]   ;;  %s3208_s1 = inlined_call_operand.vmem [shape: bf16[25,32], index: 1, kind: input, shape index: {}]   ;;  %s3209_s2 = inlined_call_operand.vmem [shape: bf16[1568,32], index: 2, kind: output, shape index: {0}]   ;;  %s3210_s3 = inlined_call_operand.vmem [shape: f32[2,2,32], index: 3, kind: output, shape index: {1}]  }
   0x1 LB: > { %s2105_s13 = sadd.s32 4294967295, %s2076_s12   ;;  %p1745_p0 = scmp.ge.s32.totalorder %s2076_s12, 1  ;;  %s2076_s12 = sphi %s2099_s12, %s14_s12  }
   0x2   : > { %p141_p1 = scmp.lt.s32.totalorder %s2076_s12, 3 }
   0x4   : > { %p142_p2 = pnand %p1745_p0, %p141_p1 }
   0x6   : > { %145 = sbr.rel (%p142_p2) target bundleno = 500 (0x1f4), region = 28 }
   0xb   : > { %v1951_v0 = vld [vmem:[%s3208_s1 + $0x8] sm:$0xf]  ;;  %v2054_v1 = vld [vmem:[%s3208_s1 + $0x8] sm:$0x10]  ;;  %vm692_vm0 = vcmask 1043456   ;;  %vm693_vm1 = vcmask 1044480  }
   0xc   : > { %v1952_v2 = vor.u32 %v2054_v1, %v1951_v0  ;;  %s169_s18 = smul.u32 98, %s2105_s13  ;;  %v2078_v3 = vmov 65535   ;;  %v2053_v7 = vld [vmem:[%s3208_s1] sm:$0xff]  ;;  %vm544_vm2 = vcmask 203776   ;;  %vm1051_vm3 = vcmask 257024   ;;  %p181_p4 = scmp.lt.s32.totalorder %s2105_s13, 1 }
   0xd   : > { %v694_v4 = vsel %vm692_vm0, 4294967295, %v2078_v3  ;;  %vm1150_vm4 = vcmask 261120   ;;  %vm1352_vm5 = vcmask 253952  }
   0xe   : > { %v695_v5 = vsel %vm693_vm1, %v694_v4, 0  ;;  %p170_p3 = scmp.lt.s32.totalorder %s169_s18, 195  ;;  %s3230_s13 = smov (!%p181_p4, %s2105_s13), 1 }
   0xf   : > { %v697_v6 = vand.u32 %v1952_v2, %v695_v5  ;;  %s1748_s28 = sshll.u32 %s3230_s13, 1 }
  0x10   : > { %s3228_s18 = smov (!%p170_p3, %s169_s18), 195  ;;  %s184_s4 = scalar_lea.vmem %s3210_s3, %s1748_s28 }
  0x11   : > { %705 = vmatpush.bf16.msra.mxu0 %v697_v6  ;;  %2055 = vmatpush.bf16.msra.mxu1 %v697_v6  ;;  %s1746_s21 = sshll.u32 %s3228_s18, 2 }
  0x12   : > { %2056 = vmatpush.bf16.msra.mxu2 %v697_v6  ;;  %2057 = vmatpush.bf16.msra.mxu3 %v697_v6  ;;  %s2127_s24 = scalar_lea.vmem %s3207_s0, %s1746_s21  ;;  %s2182_s27 = scalar_lea.vmem %s3209_s2, %s1746_s21 }
  0x13   : > { %v2004_v8 = vld [vmem:[%s2127_s24] sm:$0xff]  ;;  %v2005_v10 = vld [vmem:[%s2127_s24 + $0x8] sm:$0xff]  ;;  %v2006_v12 = vld [vmem:[%s2127_s24 + $0x10] sm:$0xff] }
  0x14   : > { %v2016_v9 = vld [vmem:[%s2127_s24 + $0x60] sm:$0xff]  ;;  %v2017_v11 = vld [vmem:[%s2127_s24 + $0x68] sm:$0xff]  ;;  %v2018_v13 = vld [vmem:[%s2127_s24 + $0x70] sm:$0xff] }
  0x15   : > { %706 = vmatpush.bf16.msra.mxu0 %v2053_v7  ;;  %2058 = vmatpush.bf16.msra.mxu1 %v2053_v7  ;;  %v2029_v14 = vld [vmem:[%s2127_s24 + $0xc8] sm:$0xff]  ;;  %v2007_v15 = vld [vmem:[%s2127_s24 + $0x18] sm:$0xff]  ;;  %v2030_v17 = vld [vmem:[%s2127_s24 + $0xd0] sm:$0xff] }
  0x16   : > { %2059 = vmatpush.bf16.msra.mxu2 %v2053_v7  ;;  %2060 = vmatpush.bf16.msra.mxu3 %v2053_v7  ;;  %v2019_v16 = vld [vmem:[%s2127_s24 + $0x78] sm:$0xff]  ;;  %v2008_v18 = vld [vmem:[%s2127_s24 + $0x20] sm:$0xff]  ;;  %v2009_v21 = vld [vmem:[%s2127_s24 + $0x28] sm:$0xff] }
  0x17   : > { %v2020_v19 = vld [vmem:[%s2127_s24 + $0x80] sm:$0xff]  ;;  %v2031_v20 = vld [vmem:[%s2127_s24 + $0xd8] sm:$0xff]  ;;  %v2021_v22 = vld [vmem:[%s2127_s24 + $0x88] sm:$0xff] }
  0x18   : > { %1953 = vmatmul.msk.bf16.vlgmr.msra.gmra.mxu0 %vm544_vm2, %v2004_v8  ;;  %1965 = vmatmul.msk.bf16.vlgmr.msra.gmra.mxu1 %vm544_vm2, %v2016_v9  ;;  %v2032_v23 = vld [vmem:[%s2127_s24 + $0xe0] sm:$0xff]  ;;  %v2010_v24 = vld [vmem:[%s2127_s24 + $0x30] sm:$0xff]  ;;  %v2033_v26 = vld [vmem:[%s2127_s24 + $0xe8] sm:$0xff] }
  0x19   : > { %1978 = vmatmul.msk.bf16.vlgmr.msra.gmra.mxu2 %vm544_vm2, %v2029_v14  ;;  %v2022_v25 = vld [vmem:[%s2127_s24 + $0x90] sm:$0xff]  ;;  %v2011_v27 = vld [vmem:[%s2127_s24 + $0x38] sm:$0xff]  ;;  %v2012_v31 = vld [vmem:[%s2127_s24 + $0x40] sm:$0xff] }
  0x1a   : > { %v2023_v28 = vld [vmem:[%s2127_s24 + $0x98] sm:$0xff]  ;;  %v2042_v29 = vld [vmem:[%s2127_s24 + $0x130] sm:$0xff]  ;;  %v2024_v32 = vld [vmem:[%s2127_s24 + $0xa0] sm:$0xff] }
  0x1b   : > { %1991 = vmatmul.msk.bf16.vlgmr.msra.gmra.mxu3 %vm544_vm2, %v2042_v29  ;;  %v2034_v30 = vld [vmem:[%s2127_s24 + $0xf0] sm:$0xff]  ;;  %v2043_v38 = vld [vmem:[%s2127_s24 + $0x138] sm:$0xff]  ;;  %v2013_v51 = vld [vmem:[%s2127_s24 + $0x48] sm:$0xff] }
  0x1c   : > { %v2035_v49 = vld [vmem:[%s2127_s24 + $0xf8] sm:$0xff]  ;;  %v2025_v52 = vld [vmem:[%s2127_s24 + $0xa8] sm:$0xff]  ;;  %v2044_v62 = vld [vmem:[%s2127_s24 + $0x140] sm:$0xff] }
  0x1d   : > { %v2036_v7 = vld [vmem:[%s2127_s24 + $0x100] sm:$0xff]  ;;  %v2014_v9 = vld [vmem:[%s2127_s24 + $0x50] sm:$0xff]  ;;  %v2037_v29 = vld [vmem:[%s2127_s24 + $0x108] sm:$0xff] }
  0x28   : > { %1954 = vmatmul.msk.bf16.gmra.mxu0 %vm544_vm2, %v2005_v10  ;;  %1966 = vmatmul.msk.bf16.gmra.mxu1 %vm544_vm2, %v2017_v11  ;;  %v2026_v10 = vld [vmem:[%s2127_s24 + $0xb0] sm:$0xff] }
  0x29   : > { %1979 = vmatmul.msk.bf16.gmra.mxu2 %vm544_vm2, %v2030_v17 }
  0x2b   : > { %1992 = vmatmul.msk.bf16.gmra.mxu3 %vm544_vm2, %v2043_v38 }
  0x38   : > { %1955 = vmatmul.msk.bf16.gmra.mxu0 %vm544_vm2, %v2006_v12  ;;  %1967 = vmatmul.msk.bf16.gmra.mxu1 %vm544_vm2, %v2018_v13 }
  0x39   : > { %1980 = vmatmul.msk.bf16.gmra.mxu2 %vm544_vm2, %v2031_v20  ;;  %v2045_v20 = vld [vmem:[%s2127_s24 + $0x148] sm:$0xff] }
  0x3b   : > { %1993 = vmatmul.msk.bf16.gmra.mxu3 %vm544_vm2, %v2044_v62 }
  0x48   : > { %1956 = vmatmul.msk.bf16.gmra.mxu0 %vm544_vm2, %v2007_v15  ;;  %1968 = vmatmul.msk.bf16.gmra.mxu1 %vm544_vm2, %v2019_v16 }
  0x49   : > { %1981 = vmatmul.msk.bf16.gmra.mxu2 %vm544_vm2, %v2032_v23 }
  0x4b   : > { %1994 = vmatmul.msk.bf16.gmra.mxu3 %vm544_vm2, %v2045_v20 }
  0x58   : > { %1957 = vmatmul.msk.bf16.gmra.mxu0 %vm544_vm2, %v2008_v18  ;;  %1969 = vmatmul.msk.bf16.gmra.mxu1 %vm544_vm2, %v2020_v19 }
  0x59   : > { %1982 = vmatmul.msk.bf16.gmra.mxu2 %vm544_vm2, %v2033_v26 }
  0x68   : > { %1958 = vmatmul.msk.bf16.gmra.mxu0 %vm544_vm2, %v2009_v21  ;;  %1970 = vmatmul.msk.bf16.gmra.mxu1 %vm544_vm2, %v2021_v22 }
  0x69   : > { %1983 = vmatmul.msk.bf16.gmra.mxu2 %vm544_vm2, %v2034_v30 }
  0x78   : > { %1959 = vmatmul.msk.bf16.gmra.mxu0 %vm544_vm2, %v2010_v24  ;;  %1971 = vmatmul.msk.bf16.gmra.mxu1 %vm544_vm2, %v2022_v25 }
  0x79   : > { %1984 = vmatmul.msk.bf16.gmra.mxu2 %vm544_vm2, %v2035_v49 }
  0x88   : > { %1960 = vmatmul.msk.bf16.gmra.mxu0 %vm544_vm2, %v2011_v27  ;;  %1972 = vmatmul.msk.bf16.gmra.mxu1 %vm544_vm2, %v2023_v28 }
  0x89   : > { %1985 = vmatmul.msk.bf16.gmra.mxu2 %vm544_vm2, %v2036_v7 }
  0x95   : > { %v708_v33 = vpop.f32.mrf.mxu0  ;;  %v2184_v34 = vpop.f32.mrf.mxu1 }
  0x96   : > { %v953_v35 = vpack.c.bf16 %v708_v33, %v708_v33  ;;  %v977_v36 = vpack.c.bf16 %v2184_v34, %v2184_v34  ;;  %v1354_v37 = vmul.f32 %v708_v33, %v708_v33  ;;  %v1151_v39 = vsel %vm1150_vm4, %v708_v33, 0.0 }
  0x98   : > { %1052 = vst.msk [vmem:[%s2182_s27] sm:$0xf] %vm1051_vm3, %v953_v35  ;;  %1961 = vmatmul.msk.bf16.gmra.mxu0 %vm544_vm2, %v2012_v31  ;;  %1973 = vmatmul.msk.bf16.gmra.mxu1 %vm544_vm2, %v2024_v32  ;;  %v1452_v47 = vsel %vm1150_vm4, %v1354_v37, 0.0  ;;  %v2015_v31 = vld [vmem:[%s2127_s24 + $0x58] sm:$0xff] }
  0x99   : > { %1076 = vst.msk [vmem:[%s2182_s27 + $0x60] sm:$0xf] %vm1051_vm3, %v977_v36  ;;  %1986 = vmatmul.msk.bf16.gmra.mxu2 %vm544_vm2, %v2037_v29  ;;  %v2027_v32 = vld [vmem:[%s2127_s24 + $0xb8] sm:$0xff] }
  0x9d   : > { %v710_v40 = vpop.f32.mrf.mxu0  ;;  %v2196_v41 = vpop.f32.mrf.mxu1 }
  0x9e   : > { %v954_v42 = vpack.c.bf16 %v710_v40, %v710_v40  ;;  %v1152_v43 = vsel %vm1150_vm4, %v710_v40, 0.0  ;;  %v1355_v44 = vmul.f32 %v710_v40, %v710_v40  ;;  %v978_v45 = vpack.c.bf16 %v2196_v41, %v2196_v41  ;;  %v2273_v40 = vpop.f32.mrf.mxu2 }
  0x9f   : > { %v1153_v46 = vadd.f32 %v1152_v43, %v1151_v39 }
  0xa0   : > { %1053 = vst.msk [vmem:[%s2182_s27 + $0x4] sm:$0xf] %vm1051_vm3, %v954_v42  ;;  %v1453_v48 = vsel %vm1150_vm4, %v1355_v44, 0.0 }
  0xa1   : > { %v1454_v50 = vadd.f32 %v1453_v48, %v1452_v47  ;;  %1077 = vst.msk [vmem:[%s2182_s27 + $0x64] sm:$0xf] %vm1051_vm3, %v978_v45  ;;  %v1003_v45 = vpack.c.bf16 %v2273_v40, %v2273_v40 }
  0xa3   : > { %1102 = vst.msk [vmem:[%s2182_s27 + $0xc8] sm:$0xf] %vm1051_vm3, %v1003_v45 }
  0xa5   : > { %v713_v53 = vpop.f32.mrf.mxu0  ;;  %v2212_v54 = vpop.f32.mrf.mxu1 }
  0xa6   : > { %v955_v55 = vpack.c.bf16 %v713_v53, %v713_v53  ;;  %v1154_v56 = vsel %vm1150_vm4, %v713_v53, 0.0  ;;  %v1356_v57 = vmul.f32 %v713_v53, %v713_v53  ;;  %v979_v58 = vpack.c.bf16 %v2212_v54, %v2212_v54  ;;  %v2292_v53 = vpop.f32.mrf.mxu2 }
  0xa7   : > { %v1155_v59 = vadd.f32 %v1154_v56, %v1153_v46  ;;  %v2046_v46 = vld [vmem:[%s2127_s24 + $0x150] sm:$0xff]  ;;  %v1004_v56 = vpack.c.bf16 %v2292_v53, %v2292_v53 }
  0xa8   : > { %1054 = vst.msk [vmem:[%s2182_s27 + $0x8] sm:$0xf] %vm1051_vm3, %v955_v55  ;;  %v1455_v60 = vsel %vm1150_vm4, %v1356_v57, 0.0  ;;  %1962 = vmatmul.msk.bf16.gmra.mxu0 %vm544_vm2, %v2013_v51  ;;  %1974 = vmatmul.msk.bf16.gmra.mxu1 %vm544_vm2, %v2025_v52 }
  0xa9   : > { %v1456_v61 = vadd.f32 %v1455_v60, %v1454_v50  ;;  %1078 = vst.msk [vmem:[%s2182_s27 + $0x68] sm:$0xf] %vm1051_vm3, %v979_v58  ;;  %1995 = vmatmul.msk.bf16.gmra.mxu3 %vm544_vm2, %v2046_v46  ;;  %v2038_v58 = vld [vmem:[%s2127_s24 + $0x110] sm:$0xff]  ;;  %v2028_v60 = vld [vmem:[%s2127_s24 + $0xc0] sm:$0xff] }
  0xaa   : > { %1103 = vst.msk [vmem:[%s2182_s27 + $0xcc] sm:$0xf] %vm1051_vm3, %v1004_v56  ;;  %1987 = vmatmul.msk.bf16.gmra.mxu2 %vm544_vm2, %v2038_v58 }
  0xad   : > { %v715_v63 = vpop.f32.mrf.mxu0  ;;  %v2225_v0 = vpop.f32.mrf.mxu1 }
  0xae   : > { %v956_v1 = vpack.c.bf16 %v715_v63, %v715_v63  ;;  %v1156_v2 = vsel %vm1150_vm4, %v715_v63, 0.0  ;;  %v1357_v3 = vmul.f32 %v715_v63, %v715_v63  ;;  %v980_v4 = vpack.c.bf16 %v2225_v0, %v2225_v0 }
  0xaf   : > { %v1157_v5 = vadd.f32 %v1156_v2, %v1155_v59 }
  0xb0   : > { %1055 = vst.msk [vmem:[%s2182_s27 + $0xc] sm:$0xf] %vm1051_vm3, %v956_v1  ;;  %v1457_v6 = vsel %vm1150_vm4, %v1357_v3, 0.0 }
  0xb1   : > { %v1458_v8 = vadd.f32 %v1457_v6, %v1456_v61  ;;  %1079 = vst.msk [vmem:[%s2182_s27 + $0x6c] sm:$0xf] %vm1051_vm3, %v980_v4  ;;  %v2312_v4 = vpop.f32.mrf.mxu2 }
  0xb5   : > { %v718_v11 = vpop.f32.mrf.mxu0  ;;  %v2240_v12 = vpop.f32.mrf.mxu1 }
  0xb6   : > { %v957_v13 = vpack.c.bf16 %v718_v11, %v718_v11  ;;  %v1158_v14 = vsel %vm1150_vm4, %v718_v11, 0.0  ;;  %v1358_v15 = vmul.f32 %v718_v11, %v718_v11  ;;  %v981_v16 = vpack.c.bf16 %v2240_v12, %v2240_v12 }
  0xb7   : > { %v1159_v17 = vadd.f32 %v1158_v14, %v1157_v5 }
  0xb8   : > { %1056 = vst.msk [vmem:[%s2182_s27 + $0x10] sm:$0xf] %vm1051_vm3, %v957_v13  ;;  %v1459_v18 = vsel %vm1150_vm4, %v1358_v15, 0.0  ;;  %1963 = vmatmul.msk.bf16.gmra.mxu0 %vm544_vm2, %v2014_v9  ;;  %1975 = vmatmul.msk.bf16.gmra.mxu1 %vm544_vm2, %v2026_v10  ;;  %v2047_v9 = vld [vmem:[%s2127_s24 + $0x158] sm:$0xff] }
  0xb9   : > { %v1460_v19 = vadd.f32 %v1459_v18, %v1458_v8  ;;  %1080 = vst.msk [vmem:[%s2182_s27 + $0x70] sm:$0xf] %vm1051_vm3, %v981_v16  ;;  %v1005_v8 = vpack.c.bf16 %v2312_v4, %v2312_v4  ;;  %1996 = vmatmul.msk.bf16.gmra.mxu3 %vm544_vm2, %v2047_v9 }
  0xbb   : > { %1104 = vst.msk [vmem:[%s2182_s27 + $0xd0] sm:$0xf] %vm1051_vm3, %v1005_v8 }
  0xbd   : > { %v720_v21 = vpop.f32.mrf.mxu0  ;;  %v2253_v22 = vpop.f32.mrf.mxu1 }
  0xbe   : > { %v958_v23 = vpack.c.bf16 %v720_v21, %v720_v21  ;;  %v1160_v24 = vsel %vm1150_vm4, %v720_v21, 0.0  ;;  %v1359_v25 = vmul.f32 %v720_v21, %v720_v21  ;;  %v982_v26 = vpack.c.bf16 %v2253_v22, %v2253_v22  ;;  %v2039_v21 = vld [vmem:[%s2127_s24 + $0x118] sm:$0xff] }
  0xbf   : > { %v1161_v27 = vadd.f32 %v1160_v24, %v1159_v17  ;;  %v2330_v17 = vpop.f32.mrf.mxu2  ;;  %1988 = vmatmul.msk.bf16.gmra.mxu2 %vm544_vm2, %v2039_v21 }
  0xc0   : > { %1057 = vst.msk [vmem:[%s2182_s27 + $0x14] sm:$0xf] %vm1051_vm3, %v958_v23  ;;  %v1461_v28 = vsel %vm1150_vm4, %v1359_v25, 0.0 }
  0xc1   : > { %v1462_v30 = vadd.f32 %v1461_v28, %v1460_v19  ;;  %1081 = vst.msk [vmem:[%s2182_s27 + $0x74] sm:$0xf] %vm1051_vm3, %v982_v26  ;;  %v1006_v19 = vpack.c.bf16 %v2330_v17, %v2330_v17 }
  0xc3   : > { %1105 = vst.msk [vmem:[%s2182_s27 + $0xd4] sm:$0xf] %vm1051_vm3, %v1006_v19 }
  0xc5   : > { %v723_v33 = vpop.f32.mrf.mxu0  ;;  %v2268_v35 = vpop.f32.mrf.mxu1 }
  0xc6   : > { %v959_v36 = vpack.c.bf16 %v723_v33, %v723_v33  ;;  %v1162_v37 = vsel %vm1150_vm4, %v723_v33, 0.0  ;;  %v1360_v38 = vmul.f32 %v723_v33, %v723_v33  ;;  %v983_v39 = vpack.c.bf16 %v2268_v35, %v2268_v35 }
  0xc7   : > { %v1163_v42 = vadd.f32 %v1162_v37, %v1161_v27  ;;  %v2048_v37 = vld [vmem:[%s2127_s24 + $0x160] sm:$0xff] }
  0xc8   : > { %1058 = vst.msk [vmem:[%s2182_s27 + $0x18] sm:$0xf] %vm1051_vm3, %v959_v36  ;;  %v1463_v43 = vsel %vm1150_vm4, %v1360_v38, 0.0  ;;  %1964 = vmatmul.msk.bf16.gmra.mxu0 %vm544_vm2, %v2015_v31  ;;  %1976 = vmatmul.msk.bf16.gmra.mxu1 %vm544_vm2, %v2027_v32 }
  0xc9   : > { %v1464_v44 = vadd.f32 %v1463_v43, %v1462_v30  ;;  %1082 = vst.msk [vmem:[%s2182_s27 + $0x78] sm:$0xf] %vm1051_vm3, %v983_v39  ;;  %v2349_v30 = vpop.f32.mrf.mxu2  ;;  %1997 = vmatmul.msk.bf16.gmra.mxu3 %vm544_vm2, %v2048_v37 }
  0xca   : > { %v1007_v36 = vpack.c.bf16 %v2349_v30, %v2349_v30 }
  0xcc   : > { %1106 = vst.msk [vmem:[%s2182_s27 + $0xd8] sm:$0xf] %vm1051_vm3, %v1007_v36 }
  0xcd   : > { %v725_v47 = vpop.f32.mrf.mxu0  ;;  %v2287_v48 = vpop.f32.mrf.mxu1 }
  0xce   : > { %v960_v49 = vpack.c.bf16 %v725_v47, %v725_v47  ;;  %v1164_v50 = vsel %vm1150_vm4, %v725_v47, 0.0  ;;  %v1361_v51 = vmul.f32 %v725_v47, %v725_v47  ;;  %v984_v52 = vpack.c.bf16 %v2287_v48, %v2287_v48 }
  0xcf   : > { %v1165_v55 = vadd.f32 %v1164_v50, %v1163_v42 }
  0xd0   : > { %1059 = vst.msk [vmem:[%s2182_s27 + $0x1c] sm:$0xf] %vm1051_vm3, %v960_v49  ;;  %v1465_v57 = vsel %vm1150_vm4, %v1361_v51, 0.0  ;;  %v2040_v51 = vld [vmem:[%s2127_s24 + $0x120] sm:$0xff] }
  0xd1   : > { %v1466_v59 = vadd.f32 %v1465_v57, %v1464_v44  ;;  %1083 = vst.msk [vmem:[%s2182_s27 + $0x7c] sm:$0xf] %vm1051_vm3, %v984_v52  ;;  %v2366_v46 = vpop.f32.mrf.mxu2  ;;  %1989 = vmatmul.msk.bf16.gmra.mxu2 %vm544_vm2, %v2040_v51 }
  0xd2   : > { %v1008_v49 = vpack.c.bf16 %v2366_v46, %v2366_v46 }
  0xd4   : > { %1107 = vst.msk [vmem:[%s2182_s27 + $0xdc] sm:$0xf] %vm1051_vm3, %v1008_v49  ;;  %v2051_v49 = vld [vmem:[%s2127_s24 + $0x178] sm:$0xff] }
  0xd5   : > { %v728_v61 = vpop.f32.mrf.mxu0  ;;  %v2307_v62 = vpop.f32.mrf.mxu1 }
  0xd6   : > { %v961_v63 = vpack.c.bf16 %v728_v61, %v728_v61  ;;  %v1166_v1 = vsel %vm1150_vm4, %v728_v61, 0.0  ;;  %v1362_v2 = vmul.f32 %v728_v61, %v728_v61  ;;  %v985_v3 = vpack.c.bf16 %v2307_v62, %v2307_v62 }
  0xd7   : > { %v1167_v5 = vadd.f32 %v1166_v1, %v1165_v55 }
  0xd8   : > { %1060 = vst.msk [vmem:[%s2182_s27 + $0x20] sm:$0xf] %vm1051_vm3, %v961_v63  ;;  %v1467_v6 = vsel %vm1150_vm4, %v1362_v2, 0.0  ;;  %1977 = vmatmul.msk.bf16.gmra.mxu1 %vm544_vm2, %v2028_v60 }
  0xd9   : > { %v1468_v7 = vadd.f32 %v1467_v6, %v1466_v59  ;;  %1084 = vst.msk [vmem:[%s2182_s27 + $0x80] sm:$0xf] %vm1051_vm3, %v985_v3  ;;  %v2385_v61 = vpop.f32.mrf.mxu2 }
  0xda   : > { %v1009_v3 = vpack.c.bf16 %v2385_v61, %v2385_v61 }
  0xdc   : > { %1108 = vst.msk [vmem:[%s2182_s27 + $0xe0] sm:$0xf] %vm1051_vm3, %v1009_v3 }
  0xdd   : > { %v730_v10 = vpop.f32.mrf.mxu0  ;;  %v2325_v11 = vpop.f32.mrf.mxu1 }
  0xde   : > { %v962_v13 = vpack.c.bf16 %v730_v10, %v730_v10  ;;  %v1168_v14 = vsel %vm1150_vm4, %v730_v10, 0.0  ;;  %v1363_v15 = vmul.f32 %v730_v10, %v730_v10  ;;  %v986_v16 = vpack.c.bf16 %v2325_v11, %v2325_v11 }
  0xdf   : > { %v1169_v18 = vadd.f32 %v1168_v14, %v1167_v5  ;;  %v2049_v5 = vld [vmem:[%s2127_s24 + $0x168] sm:$0xff] }
  0xe0   : > { %1061 = vst.msk [vmem:[%s2182_s27 + $0x24] sm:$0xf] %vm1051_vm3, %v962_v13  ;;  %v1469_v20 = vsel %vm1150_vm4, %v1363_v15, 0.0  ;;  %1998 = vmatmul.msk.bf16.gmra.mxu3 %vm544_vm2, %v2049_v5  ;;  %v2041_v14 = vld [vmem:[%s2127_s24 + $0x128] sm:$0xff] }
  0xe1   : > { %v1470_v23 = vadd.f32 %v1469_v20, %v1468_v7  ;;  %1085 = vst.msk [vmem:[%s2182_s27 + $0x84] sm:$0xf] %vm1051_vm3, %v986_v16  ;;  %v2409_v10 = vpop.f32.mrf.mxu2  ;;  %1990 = vmatmul.msk.bf16.gmra.mxu2 %vm544_vm2, %v2041_v14 }
  0xe2   : > { %v1010_v13 = vpack.c.bf16 %v2409_v10, %v2409_v10 }
  0xe4   : > { %1109 = vst.msk [vmem:[%s2182_s27 + $0xe4] sm:$0xf] %vm1051_vm3, %v1010_v13 }
  0xe5   : > { %v733_v24 = vpop.f32.mrf.mxu0  ;;  %v2344_v25 = vpop.f32.mrf.mxu1 }
  0xe6   : > { %v963_v26 = vpack.c.bf16 %v733_v24, %v733_v24  ;;  %v1170_v27 = vsel %vm1150_vm4, %v733_v24, 0.0  ;;  %v1364_v28 = vmul.f32 %v733_v24, %v733_v24  ;;  %v987_v29 = vpack.c.bf16 %v2344_v25, %v2344_v25 }
  0xe7   : > { %v1171_v31 = vadd.f32 %v1170_v27, %v1169_v18 }
  0xe8   : > { %1062 = vst.msk [vmem:[%s2182_s27 + $0x28] sm:$0xf] %vm1051_vm3, %v963_v26  ;;  %v1471_v32 = vsel %vm1150_vm4, %v1364_v28, 0.0 }
  0xe9   : > { %v1472_v33 = vadd.f32 %v1471_v32, %v1470_v23  ;;  %1086 = vst.msk [vmem:[%s2182_s27 + $0x88] sm:$0xf] %vm1051_vm3, %v987_v29  ;;  %v2430_v20 = vpop.f32.mrf.mxu2  ;;  %v2050_v23 = vld [vmem:[%s2127_s24 + $0x170] sm:$0xff]  ;;  %v2458_v32 = vpop.f32.mrf.mxu3 }
  0xea   : > { %v1011_v21 = vpack.c.bf16 %v2430_v20, %v2430_v20 }
  0xec   : > { %1110 = vst.msk [vmem:[%s2182_s27 + $0xe8] sm:$0xf] %vm1051_vm3, %v1011_v21 }
  0xed   : > { %v735_v38 = vpop.f32.mrf.mxu0  ;;  %v2361_v39 = vpop.f32.mrf.mxu1 }
  0xee   : > { %v964_v42 = vpack.c.bf16 %v735_v38, %v735_v38  ;;  %v1172_v43 = vsel %vm1150_vm4, %v735_v38, 0.0  ;;  %v1365_v44 = vmul.f32 %v735_v38, %v735_v38  ;;  %v988_v45 = vpack.c.bf16 %v2361_v39, %v2361_v39 }
  0xef   : > { %v1173_v47 = vadd.f32 %v1172_v43, %v1171_v31 }
  0xf0   : > { %1063 = vst.msk [vmem:[%s2182_s27 + $0x2c] sm:$0xf] %vm1051_vm3, %v964_v42  ;;  %v1473_v50 = vsel %vm1150_vm4, %v1365_v44, 0.0  ;;  %1999 = vmatmul.msk.bf16.gmra.mxu3 %vm544_vm2, %v2050_v23 }
  0xf1   : > { %v1474_v52 = vadd.f32 %v1473_v50, %v1472_v33  ;;  %1087 = vst.msk [vmem:[%s2182_s27 + $0x8c] sm:$0xf] %vm1051_vm3, %v988_v45  ;;  %v2449_v29 = vpop.f32.mrf.mxu2  ;;  %v1029_v33 = vpack.c.bf16 %v2458_v32, %v2458_v32  ;;  %v2482_v45 = vpop.f32.mrf.mxu3 }
  0xf2   : > { %v1012_v31 = vpack.c.bf16 %v2449_v29, %v2449_v29 }
  0xf3   : > { %1128 = vst.msk [vmem:[%s2182_s27 + $0x130] sm:$0xf] %vm1051_vm3, %v1029_v33 }
  0xf4   : > { %1111 = vst.msk [vmem:[%s2182_s27 + $0xec] sm:$0xf] %vm1051_vm3, %v1012_v31 }
  0xf5   : > { %v738_v55 = vpop.f32.mrf.mxu0  ;;  %v2380_v56 = vpop.f32.mrf.mxu1 }
  0xf6   : > { %v965_v57 = vpack.c.bf16 %v738_v55, %v738_v55  ;;  %v1174_v58 = vsel %vm1150_vm4, %v738_v55, 0.0  ;;  %v1366_v59 = vmul.f32 %v738_v55, %v738_v55  ;;  %v989_v60 = vpack.c.bf16 %v2380_v56, %v2380_v56 }
  0xf7   : > { %v2387_v63 = vadd.f32 %v1174_v58, %v1173_v47  ;;  %v1030_v47 = vpack.c.bf16 %v2482_v45, %v2482_v45 }
  0xf8   : > { %1064 = vst.msk [vmem:[%s2182_s27 + $0x30] sm:$0xf] %vm1051_vm3, %v965_v57  ;;  %v1475_v1 = vsel %vm1150_vm4, %v1366_v59, 0.0 }
  0xf9   : > { %v2392_v2 = vadd.f32 %v1475_v1, %v1474_v52  ;;  %1088 = vst.msk [vmem:[%s2182_s27 + $0x90] sm:$0xf] %vm1051_vm3, %v989_v60  ;;  %v2474_v43 = vpop.f32.mrf.mxu2  ;;  %v2508_v59 = vpop.f32.mrf.mxu3 }
  0xfa   : > { %v1013_v44 = vpack.c.bf16 %v2474_v43, %v2474_v43  ;;  %1129 = vst.msk [vmem:[%s2182_s27 + $0x134] sm:$0xf] %vm1051_vm3, %v1030_v47  ;;  %v1031_v60 = vpack.c.bf16 %v2508_v59, %v2508_v59 }
  0xfb   : > { %3219 = vst [vmem:[#allocation2_spill] sm:$0xff] %v2508_v59 }
  0xfc   : > { %1112 = vst.msk [vmem:[%s2182_s27 + $0xf0] sm:$0xf] %vm1051_vm3, %v1013_v44 }
  0xfd   : > { %v2401_v6 = vpop.f32.mrf.mxu0  ;;  %v2403_v7 = vpop.f32.mrf.mxu1  ;;  %1130 = vst.msk [vmem:[%s2182_s27 + $0x138] sm:$0xf] %vm1051_vm3, %v1031_v60 }
  0xfe   : > { %v966_v8 = vpack.c.bf16 %v2401_v6, %v2401_v6  ;;  %v990_v9 = vpack.c.bf16 %v2403_v7, %v2403_v7  ;;  %v1367_v47 = vmul.f32 %v2401_v6, %v2401_v6 }
 0x100   : > { %1065 = vst.msk [vmem:[%s2182_s27 + $0x34] sm:$0xf] %vm1051_vm3, %v966_v8  ;;  %2000 = vmatmul.msk.bf16.gmra.mxu3 %vm544_vm2, %v2051_v49 }
 0x101   : > { %1089 = vst.msk [vmem:[%s2182_s27 + $0x94] sm:$0xf] %vm1051_vm3, %v990_v9  ;;  %v2499_v57 = vpop.f32.mrf.mxu2  ;;  %v2532_v14 = vpop.f32.mrf.mxu3 }
 0x102   : > { %v1014_v58 = vpack.c.bf16 %v2499_v57, %v2499_v57  ;;  %3220 = vst [vmem:[#allocation3_spill] sm:$0xff] %v2532_v14 }
 0x104   : > { %1113 = vst.msk [vmem:[%s2182_s27 + $0xf4] sm:$0xf] %vm1051_vm3, %v1014_v58 }
 0x105   : > { %v2422_v15 = vpop.f32.mrf.mxu0  ;;  %v2424_v16 = vpop.f32.mrf.mxu1 }
 0x106   : > { %v967_v18 = vpack.c.bf16 %v2422_v15, %v2422_v15  ;;  %v991_v19 = vpack.c.bf16 %v2424_v16, %v2424_v16  ;;  %v1368_v58 = vmul.f32 %v2422_v15, %v2422_v15 }
 0x108   : > { %1066 = vst.msk [vmem:[%s2182_s27 + $0x38] sm:$0xf] %vm1051_vm3, %v967_v18  ;;  %v1032_v18 = vpack.c.bf16 %v2532_v14, %v2532_v14 }
 0x109   : > { %1090 = vst.msk [vmem:[%s2182_s27 + $0x98] sm:$0xf] %vm1051_vm3, %v991_v19  ;;  %v2524_v9 = vpop.f32.mrf.mxu2  ;;  %v2052_v19 = vld [vmem:[%s2127_s24 + $0x180] sm:$0xff] }
 0x10a   : > { %v1015_v13 = vpack.c.bf16 %v2524_v9, %v2524_v9  ;;  %1131 = vst.msk [vmem:[%s2182_s27 + $0x13c] sm:$0xf] %vm1051_vm3, %v1032_v18 }
 0x10c   : > { %1114 = vst.msk [vmem:[%s2182_s27 + $0xf8] sm:$0xf] %vm1051_vm3, %v1015_v13  ;;  %v1178_v13 = vsel %vm1150_vm4, %v2422_v15, 0.0 }
 0x10d   : > { %v2441_v24 = vpop.f32.mrf.mxu0  ;;  %v2443_v26 = vpop.f32.mrf.mxu1 }
 0x10e   : > { %v968_v27 = vpack.c.bf16 %v2441_v24, %v2441_v24  ;;  %v992_v28 = vpack.c.bf16 %v2443_v26, %v2443_v26  ;;  %v1369_v60 = vmul.f32 %v2441_v24, %v2441_v24 }
 0x110   : > { %1067 = vst.msk [vmem:[%s2182_s27 + $0x3c] sm:$0xf] %vm1051_vm3, %v968_v27  ;;  %2001 = vmatmul.msk.bf16.gmra.mxu3 %vm544_vm2, %v2052_v19 }
 0x111   : > { %1091 = vst.msk [vmem:[%s2182_s27 + $0x9c] sm:$0xf] %vm1051_vm3, %v992_v28  ;;  %v2549_v31 = vpop.f32.mrf.mxu2 }
 0x112   : > { %v1016_v33 = vpack.c.bf16 %v2549_v31, %v2549_v31 }
 0x114   : > { %1115 = vst.msk [vmem:[%s2182_s27 + $0xfc] sm:$0xf] %vm1051_vm3, %v1016_v33  ;;  %v1180_v33 = vsel %vm1150_vm4, %v2441_v24, 0.0 }
 0x115   : > { %v2466_v36 = vpop.f32.mrf.mxu0  ;;  %v2468_v37 = vpop.f32.mrf.mxu1 }
 0x116   : > { %v969_v38 = vpack.c.bf16 %v2466_v36, %v2466_v36  ;;  %v993_v42 = vpack.c.bf16 %v2468_v37, %v2468_v37  ;;  %v1370_v15 = vmul.f32 %v2466_v36, %v2466_v36  ;;  %v1182_v24 = vsel %vm1150_vm4, %v2466_v36, 0.0 }
 0x118   : > { %1068 = vst.msk [vmem:[%s2182_s27 + $0x40] sm:$0xf] %vm1051_vm3, %v969_v38  ;;  %v2558_v38 = vpop.f32.mrf.mxu3  ;;  %v1483_v36 = vsel %vm1150_vm4, %v1370_v15, 0.0 }
 0x119   : > { %1092 = vst.msk [vmem:[%s2182_s27 + $0xa0] sm:$0xf] %vm1051_vm3, %v993_v42 }
 0x11a   : > { %3221 = vst [vmem:[#allocation4_spill] sm:$0xff] %v2558_v38 }
 0x11d   : > { %v2491_v50 = vpop.f32.mrf.mxu0  ;;  %v2493_v51 = vpop.f32.mrf.mxu1 }
 0x11e   : > { %v970_v52 = vpack.c.bf16 %v2491_v50, %v2491_v50  ;;  %v994_v55 = vpack.c.bf16 %v2493_v51, %v2493_v51 }
 0x120   : > { %1069 = vst.msk [vmem:[%s2182_s27 + $0x44] sm:$0xf] %vm1051_vm3, %v970_v52  ;;  %v2566_v52 = vpop.f32.mrf.mxu2 }
 0x121   : > { %1093 = vst.msk [vmem:[%s2182_s27 + $0xa4] sm:$0xf] %vm1051_vm3, %v994_v55  ;;  %v1176_v55 = vsel %vm1150_vm4, %v2401_v6, 0.0  ;;  %v1033_v6 = vpack.c.bf16 %v2558_v38, %v2558_v38  ;;  %v1481_v38 = vsel %vm1150_vm4, %v1369_v60, 0.0 }
 0x122   : > { %v1177_v19 = vadd.f32 %v1176_v55, %v2387_v63 }
 0x123   : > { %1132 = vst.msk [vmem:[%s2182_s27 + $0x140] sm:$0xf] %vm1051_vm3, %v1033_v6  ;;  %v1184_v6 = vsel %vm1150_vm4, %v2491_v50, 0.0 }
 0x125   : > { %v2516_v1 = vpop.f32.mrf.mxu0  ;;  %v2518_v3 = vpop.f32.mrf.mxu1 }
 0x126   : > { %v971_v5 = vpack.c.bf16 %v2516_v1, %v2516_v1  ;;  %v995_v8 = vpack.c.bf16 %v2518_v3, %v2518_v3  ;;  %v1186_v15 = vsel %vm1150_vm4, %v2516_v1, 0.0 }
 0x128   : > { %1070 = vst.msk [vmem:[%s2182_s27 + $0x48] sm:$0xf] %vm1051_vm3, %v971_v5  ;;  %v2576_v5 = vpop.f32.mrf.mxu3  ;;  %v2609_v60 = vpop.f32.mrf.mxu2 }
 0x129   : > { %1094 = vst.msk [vmem:[%s2182_s27 + $0xa8] sm:$0xf] %vm1051_vm3, %v995_v8  ;;  %v1477_v8 = vsel %vm1150_vm4, %v1367_v47, 0.0 }
 0x12a   : > { %3222 = vst [vmem:[#allocation5_spill] sm:$0xff] %v2576_v5  ;;  %v1478_v47 = vadd.f32 %v1477_v8, %v2392_v2  ;;  %v1017_v2 = vpack.c.bf16 %v2566_v52, %v2566_v52 }
 0x12c   : > { %1116 = vst.msk [vmem:[%s2182_s27 + $0x100] sm:$0xf] %vm1051_vm3, %v1017_v2 }
 0x12d   : > { %v2541_v21 = vpop.f32.mrf.mxu0  ;;  %v2543_v23 = vpop.f32.mrf.mxu1 }
 0x12e   : > { %v972_v27 = vpack.c.bf16 %v2541_v21, %v2541_v21  ;;  %v996_v28 = vpack.c.bf16 %v2543_v23, %v2543_v23 }
 0x130   : > { %1071 = vst.msk [vmem:[%s2182_s27 + $0x4c] sm:$0xf] %vm1051_vm3, %v972_v27  ;;  %v1034_v27 = vpack.c.bf16 %v2576_v5, %v2576_v5 }
 0x131   : > { %1095 = vst.msk [vmem:[%s2182_s27 + $0xac] sm:$0xf] %vm1051_vm3, %v996_v28  ;;  %v1479_v28 = vsel %vm1150_vm4, %v1368_v58, 0.0  ;;  %v1371_v58 = vmul.f32 %v2491_v50, %v2491_v50  ;;  %v1373_v50 = vmul.f32 %v2541_v21, %v2541_v21 }
 0x132   : > { %1133 = vst.msk [vmem:[%s2182_s27 + $0x144] sm:$0xf] %vm1051_vm3, %v1034_v27  ;;  %v1480_v8 = vadd.f32 %v1479_v28, %v1478_v47  ;;  %v1018_v28 = vpack.c.bf16 %v2609_v60, %v2609_v60 }
 0x133   : > { %v1485_v47 = vsel %vm1150_vm4, %v1371_v58, 0.0  ;;  %v1489_v59 = vsel %vm1150_vm4, %v1373_v50, 0.0 }
 0x134   : > { %v1482_v27 = vadd.f32 %v1481_v38, %v1480_v8  ;;  %1117 = vst.msk [vmem:[%s2182_s27 + $0x104] sm:$0xf] %vm1051_vm3, %v1018_v28 }
 0x135   : > { %v758_v42 = vpop.f32.mrf.mxu0  ;;  %v2562_v44 = vpop.f32.mrf.mxu1 }
 0x136   : > { %v973_v49 = vpack.c.bf16 %v758_v42, %v758_v42  ;;  %v997_v18 = vpack.c.bf16 %v2562_v44, %v2562_v44  ;;  %v1374_v2 = vmul.f32 %v758_v42, %v758_v42 }
 0x138   : > { %1072 = vst.msk [vmem:[%s2182_s27 + $0x50] sm:$0xf] %vm1051_vm3, %v973_v49  ;;  %v1179_v49 = vadd.f32 %v1178_v13, %v1177_v19  ;;  %v1372_v19 = vmul.f32 %v2516_v1, %v2516_v1  ;;  %v1491_v28 = vsel %vm1150_vm4, %v1374_v2, 0.0 }
 0x139   : > { %1096 = vst.msk [vmem:[%s2182_s27 + $0xb0] sm:$0xf] %vm1051_vm3, %v997_v18 }
 0x13a   : > { %v1181_v13 = vadd.f32 %v1180_v33, %v1179_v49  ;;  %v2624_v33 = vpop.f32.mrf.mxu3  ;;  %v1487_v49 = vsel %vm1150_vm4, %v1372_v19, 0.0 }
 0x13c   : > { %v1183_v14 = vadd.f32 %v1182_v24, %v1181_v13  ;;  %v1188_v24 = vsel %vm1150_vm4, %v2541_v21, 0.0 }
 0x13d   : > { %v760_v63 = vpop.f32.mrf.mxu0  ;;  %v2599_v55 = vpop.f32.mrf.mxu1 }
 0x13e   : > { %v974_v5 = vpack.c.bf16 %v760_v63, %v760_v63  ;;  %v998_v18 = vpack.c.bf16 %v2599_v55, %v2599_v55  ;;  %v1185_v38 = vadd.f32 %v1184_v6, %v1183_v14  ;;  %v2642_v6 = vpop.f32.mrf.mxu2  ;;  %v1192_v21 = vsel %vm1150_vm4, %v760_v63, 0.0 }
 0x140   : > { %1073 = vst.msk [vmem:[%s2182_s27 + $0x54] sm:$0xf] %vm1051_vm3, %v974_v5  ;;  %v1484_v5 = vadd.f32 %v1483_v36, %v1482_v27  ;;  %v1187_v8 = vadd.f32 %v1186_v15, %v1185_v38  ;;  %v1375_v36 = vmul.f32 %v760_v63, %v760_v63 }
 0x141   : > { %1097 = vst.msk [vmem:[%s2182_s27 + $0xb4] sm:$0xf] %vm1051_vm3, %v998_v18  ;;  %v1190_v18 = vsel %vm1150_vm4, %v758_v42, 0.0 }
 0x142   : > { %v1486_v58 = vadd.f32 %v1485_v47, %v1484_v5  ;;  %v1189_v19 = vadd.f32 %v1188_v24, %v1187_v8  ;;  %v2648_v50 = vpop.f32.mrf.mxu3  ;;  %v1493_v42 = vsel %vm1150_vm4, %v1375_v36, 0.0  ;;  %v1035_v24 = vpack.c.bf16 %v2624_v33, %v2624_v33 }
 0x143   : > { %v1378_v8 = vmul.f32 %v2184_v34, %v2184_v34 }
 0x144   : > { %v1488_v27 = vadd.f32 %v1487_v49, %v1486_v58  ;;  %v1191_v5 = vadd.f32 %v1190_v18, %v1189_v19  ;;  %1134 = vst.msk [vmem:[%s2182_s27 + $0x148] sm:$0xf] %vm1051_vm3, %v1035_v24 }
 0x145   : > { %v763_v13 = vpop.f32.mrf.mxu0  ;;  %v2638_v1 = vpop.f32.mrf.mxu1 }
 0x146   : > { %v975_v14 = vpack.c.bf16 %v763_v13, %v763_v13  ;;  %v1376_v47 = vmul.f32 %v763_v13, %v763_v13  ;;  %v1490_v15 = vadd.f32 %v1489_v59, %v1488_v27  ;;  %v1194_v38 = vsel %vm1150_vm4, %v763_v13, 0.0 }
 0x147   : > { %v999_v49 = vpack.c.bf16 %v2638_v1, %v2638_v1  ;;  %v1193_v2 = vadd.f32 %v1192_v21, %v1191_v5  ;;  %v1036_v59 = vpack.c.bf16 %v2648_v50, %v2648_v50  ;;  %v1019_v21 = vpack.c.bf16 %v2642_v6, %v2642_v6 }
 0x148   : > { %1074 = vst.msk [vmem:[%s2182_s27 + $0x58] sm:$0xf] %vm1051_vm3, %v975_v14  ;;  %v1492_v63 = vadd.f32 %v1491_v28, %v1490_v15  ;;  %v1495_v58 = vsel %vm1150_vm4, %v1376_v47, 0.0  ;;  %v2672_v47 = vpop.f32.mrf.mxu2 }
 0x149   : > { %1098 = vst.msk [vmem:[%s2182_s27 + $0xb8] sm:$0xf] %vm1051_vm3, %v999_v49  ;;  %v1195_v18 = vadd.f32 %v1194_v38, %v1193_v2  ;;  %v1198_v38 = vsel %vm1150_vm4, %v2184_v34, 0.0  ;;  %v1379_v49 = vmul.f32 %v2196_v41, %v2196_v41  ;;  %v1200_v34 = vsel %vm1150_vm4, %v2196_v41, 0.0 }
 0x14a   : > { %v1494_v13 = vadd.f32 %v1493_v42, %v1492_v63  ;;  %1135 = vst.msk [vmem:[%s2182_s27 + $0x14c] sm:$0xf] %vm1051_vm3, %v1036_v59  ;;  %v1020_v59 = vpack.c.bf16 %v2672_v47, %v2672_v47 }
 0x14b   : > { %1118 = vst.msk [vmem:[%s2182_s27 + $0x108] sm:$0xf] %vm1051_vm3, %v1019_v21 }
 0x14c   : > { %v1496_v15 = vadd.f32 %v1495_v58, %v1494_v13  ;;  %v2687_v58 = vpop.f32.mrf.mxu3  ;;  %v1499_v13 = vsel %vm1150_vm4, %v1378_v8, 0.0  ;;  %1119 = vst.msk [vmem:[%s2182_s27 + $0x10c] sm:$0xf] %vm1051_vm3, %v1020_v59  ;;  %v1381_v8 = vmul.f32 %v2225_v0, %v2225_v0  ;;  %v1383_v59 = vmul.f32 %v2253_v22, %v2253_v22 }
 0x14d   : > { %v765_v36 = vpop.f32.mrf.mxu0  ;;  %v2665_v14 = vpop.f32.mrf.mxu1 }
 0x14e   : > { %v976_v27 = vpack.c.bf16 %v765_v36, %v765_v36  ;;  %v1196_v19 = vsel %vm1150_vm4, %v765_v36, 0.0  ;;  %v1377_v28 = vmul.f32 %v765_v36, %v765_v36  ;;  %v1000_v42 = vpack.c.bf16 %v2665_v14, %v2665_v14 }
 0x14f   : > { %v1197_v5 = vadd.f32 %v1196_v19, %v1195_v18  ;;  %v1380_v18 = vmul.f32 %v2212_v54, %v2212_v54  ;;  %v1501_v19 = vsel %vm1150_vm4, %v1379_v49, 0.0 }
 0x150   : > { %1075 = vst.msk [vmem:[%s2182_s27 + $0x5c] sm:$0xf] %vm1051_vm3, %v976_v27  ;;  %v1497_v24 = vsel %vm1150_vm4, %v1377_v28, 0.0  ;;  %v1202_v28 = vsel %vm1150_vm4, %v2212_v54, 0.0  ;;  %v1505_v54 = vsel %vm1150_vm4, %v1381_v8, 0.0 }
 0x151   : > { %v1199_v63 = vadd.f32 %v1198_v38, %v1197_v5  ;;  %v1498_v2 = vadd.f32 %v1497_v24, %v1496_v15  ;;  %1099 = vst.msk [vmem:[%s2182_s27 + $0xbc] sm:$0xf] %vm1051_vm3, %v1000_v42  ;;  %v1503_v5 = vsel %vm1150_vm4, %v1380_v18, 0.0  ;;  %v1204_v42 = vsel %vm1150_vm4, %v2225_v0, 0.0  ;;  %v2710_v24 = vpop.f32.mrf.mxu2 }
 0x152   : > { %v1382_v38 = vmul.f32 %v2240_v12, %v2240_v12 }
 0x153   : > { %v1201_v36 = vadd.f32 %v1200_v34, %v1199_v63  ;;  %v1500_v27 = vadd.f32 %v1499_v13, %v1498_v2  ;;  %v1206_v2 = vsel %vm1150_vm4, %v2240_v12, 0.0  ;;  %v1384_v13 = vmul.f32 %v2268_v35, %v2268_v35 }
 0x154   : > { %v2719_v18 = vpop.f32.mrf.mxu3  ;;  %v1037_v12 = vpack.c.bf16 %v2687_v58, %v2687_v58 }
 0x155   : > { %v1203_v21 = vadd.f32 %v1202_v28, %v1201_v36  ;;  %v1502_v15 = vadd.f32 %v1501_v19, %v1500_v27  ;;  %v2703_v41 = vpop.f32.mrf.mxu1  ;;  %v1507_v36 = vsel %vm1150_vm4, %v1382_v38, 0.0  ;;  %v1208_v27 = vsel %vm1150_vm4, %v2253_v22, 0.0 }
 0x156   : > { %v1001_v19 = vpack.c.bf16 %v2703_v41, %v2703_v41  ;;  %v1038_v22 = vpack.c.bf16 %v2719_v18, %v2719_v18  ;;  %1136 = vst.msk [vmem:[%s2182_s27 + $0x150] sm:$0xf] %vm1051_vm3, %v1037_v12 }
 0x157   : > { %v1205_v49 = vadd.f32 %v1204_v42, %v1203_v21  ;;  %v1504_v63 = vadd.f32 %v1503_v5, %v1502_v15  ;;  %v1509_v21 = vsel %vm1150_vm4, %v1383_v59, 0.0  ;;  %v1210_v15 = vsel %vm1150_vm4, %v2268_v35, 0.0 }
 0x158   : > { %v1385_v5 = vmul.f32 %v2287_v48, %v2287_v48  ;;  %1100 = vst.msk [vmem:[%s2182_s27 + $0xc0] sm:$0xf] %vm1051_vm3, %v1001_v19  ;;  %v1511_v42 = vsel %vm1150_vm4, %v1384_v13, 0.0  ;;  %v1212_v35 = vsel %vm1150_vm4, %v2287_v48, 0.0  ;;  %v1214_v48 = vsel %vm1150_vm4, %v2307_v62, 0.0 }
 0x159   : > { %v1207_v0 = vadd.f32 %v1206_v2, %v1205_v49  ;;  %v1506_v34 = vadd.f32 %v1505_v54, %v1504_v63  ;;  %v1386_v54 = vmul.f32 %v2307_v62, %v2307_v62  ;;  %v1021_v2 = vpack.c.bf16 %v2710_v24, %v2710_v24  ;;  %1137 = vst.msk [vmem:[%s2182_s27 + $0x154] sm:$0xf] %vm1051_vm3, %v1038_v22  ;;  %v2752_v13 = vpop.f32.mrf.mxu2 }
 0x15a   : > { %v1022_v19 = vpack.c.bf16 %v2752_v13, %v2752_v13  ;;  %v1388_v62 = vmul.f32 %v2344_v25, %v2344_v25 }
 0x15b   : > { %v1209_v28 = vadd.f32 %v1208_v27, %v1207_v0  ;;  %v1508_v8 = vadd.f32 %v1507_v36, %v1506_v34  ;;  %v1513_v36 = vsel %vm1150_vm4, %v1385_v5, 0.0  ;;  %v1387_v27 = vmul.f32 %v2325_v11, %v2325_v11  ;;  %1120 = vst.msk [vmem:[%s2182_s27 + $0x110] sm:$0xf] %vm1051_vm3, %v1021_v2 }
 0x15c   : > { %1121 = vst.msk [vmem:[%s2182_s27 + $0x114] sm:$0xf] %vm1051_vm3, %v1022_v19  ;;  %v1519_v2 = vsel %vm1150_vm4, %v1388_v62, 0.0 }
 0x15d   : > { %v1211_v38 = vadd.f32 %v1210_v15, %v1209_v28  ;;  %v1510_v49 = vadd.f32 %v1509_v21, %v1508_v8  ;;  %v2740_v63 = vpop.f32.mrf.mxu1  ;;  %v2765_v8 = vpop.f32.mrf.mxu3  ;;  %v1515_v21 = vsel %vm1150_vm4, %v1386_v54, 0.0  ;;  %v1216_v15 = vsel %vm1150_vm4, %v2325_v11, 0.0 }
 0x15e   : > { %v1002_v59 = vpack.c.bf16 %v2740_v63, %v2740_v63  ;;  %v1039_v62 = vpack.c.bf16 %v2765_v8, %v2765_v8 }
 0x15f   : > { %v1213_v0 = vadd.f32 %v1212_v35, %v1211_v38  ;;  %v1512_v34 = vadd.f32 %v1511_v42, %v1510_v49  ;;  %v1517_v42 = vsel %vm1150_vm4, %v1387_v27, 0.0  ;;  %v1218_v38 = vsel %vm1150_vm4, %v2344_v25, 0.0 }
 0x160   : > { %1101 = vst.msk [vmem:[%s2182_s27 + $0xc4] sm:$0xf] %vm1051_vm3, %v1002_v59  ;;  %v1389_v49 = vmul.f32 %v2361_v39, %v2361_v39  ;;  %v1390_v35 = vmul.f32 %v2380_v56, %v2380_v56  ;;  %v1220_v59 = vsel %vm1150_vm4, %v2361_v39, 0.0  ;;  %v1222_v25 = vsel %vm1150_vm4, %v2380_v56, 0.0 }
 0x161   : > { %v1215_v12 = vadd.f32 %v1214_v48, %v1213_v0  ;;  %v1514_v28 = vadd.f32 %v1513_v36, %v1512_v34  ;;  %v2784_v0 = vpop.f32.mrf.mxu2  ;;  %v1391_v27 = vmul.f32 %v2403_v7, %v2403_v7  ;;  %v1224_v39 = vsel %vm1150_vm4, %v2403_v7, 0.0  ;;  %1138 = vst.msk [vmem:[%s2182_s27 + $0x158] sm:$0xf] %vm1051_vm3, %v1039_v62 }
 0x162   : > { %v1521_v48 = vsel %vm1150_vm4, %v1389_v49, 0.0  ;;  %v1523_v19 = vsel %vm1150_vm4, %v1390_v35, 0.0  ;;  %v1393_v49 = vmul.f32 %v2443_v26, %v2443_v26  ;;  %v1396_v62 = vmul.f32 %v2518_v3, %v2518_v3 }
 0x163   : > { %v1217_v5 = vadd.f32 %v1216_v15, %v1215_v12  ;;  %v1516_v22 = vadd.f32 %v1515_v21, %v1514_v28  ;;  %v1392_v15 = vmul.f32 %v2424_v16, %v2424_v16 }
 0x165   : > { %v1518_v54 = vadd.f32 %v1517_v42, %v1516_v22  ;;  %v1219_v11 = vadd.f32 %v1218_v38, %v1217_v5  ;;  %v2792_v21 = vpop.f32.mrf.mxu3  ;;  %v1525_v42 = vsel %vm1150_vm4, %v1391_v27, 0.0  ;;  %v1226_v38 = vsel %vm1150_vm4, %v2424_v16, 0.0 }
 0x166   : > { %v1040_v56 = vpack.c.bf16 %v2792_v21, %v2792_v21  ;;  %v1023_v16 = vpack.c.bf16 %v2784_v0, %v2784_v0  ;;  %v1230_v27 = vsel %vm1150_vm4, %v2468_v37, 0.0 }
 0x167   : > { %v1221_v34 = vadd.f32 %v1220_v59, %v1219_v11  ;;  %v1520_v36 = vadd.f32 %v1519_v2, %v1518_v54  ;;  %v1527_v54 = vsel %vm1150_vm4, %v1392_v15, 0.0  ;;  %v1228_v11 = vsel %vm1150_vm4, %v2443_v26, 0.0 }
 0x168   : > { %1139 = vst.msk [vmem:[%s2182_s27 + $0x15c] sm:$0xf] %vm1051_vm3, %v1040_v56  ;;  %v1394_v2 = vmul.f32 %v2468_v37, %v2468_v37  ;;  %v1395_v26 = vmul.f32 %v2493_v51, %v2493_v51  ;;  %v1232_v15 = vsel %vm1150_vm4, %v2493_v51, 0.0  ;;  %v1535_v51 = vsel %vm1150_vm4, %v1396_v62, 0.0 }
 0x169   : > { %v1223_v12 = vadd.f32 %v1222_v25, %v1221_v34  ;;  %v1522_v28 = vadd.f32 %v1521_v48, %v1520_v36  ;;  %v2818_v59 = vpop.f32.mrf.mxu2  ;;  %v1529_v25 = vsel %vm1150_vm4, %v1393_v49, 0.0  ;;  %1122 = vst.msk [vmem:[%s2182_s27 + $0x118] sm:$0xf] %vm1051_vm3, %v1023_v16  ;;  %v1398_v49 = vmul.f32 %v2562_v44, %v2562_v44 }
 0x16a   : > { %v1024_v48 = vpack.c.bf16 %v2818_v59, %v2818_v59  ;;  %v1242_v62 = vsel %vm1150_vm4, %v2638_v1, 0.0 }
 0x16b   : > { %v1225_v5 = vadd.f32 %v1224_v39, %v1223_v12  ;;  %v1524_v22 = vadd.f32 %v1523_v19, %v1522_v28  ;;  %v1531_v39 = vsel %vm1150_vm4, %v1394_v2, 0.0 }
 0x16c   : > { %1123 = vst.msk [vmem:[%s2182_s27 + $0x11c] sm:$0xf] %vm1051_vm3, %v1024_v48 }
 0x16d   : > { %v1227_v7 = vadd.f32 %v1226_v38, %v1225_v5  ;;  %v1526_v35 = vadd.f32 %v1525_v42, %v1524_v22  ;;  %v2831_v28 = vpop.f32.mrf.mxu3  ;;  %v1533_v5 = vsel %vm1150_vm4, %v1395_v26, 0.0  ;;  %v1234_v22 = vsel %vm1150_vm4, %v2518_v3, 0.0 }
 0x16e   : > { %v1397_v42 = vmul.f32 %v2543_v23, %v2543_v23  ;;  %v1238_v3 = vsel %vm1150_vm4, %v2562_v44, 0.0  ;;  %v1400_v26 = vmul.f32 %v2638_v1, %v2638_v1 }
 0x16f   : > { %v1229_v34 = vadd.f32 %v1228_v11, %v1227_v7  ;;  %v1528_v36 = vadd.f32 %v1527_v54, %v1526_v35  ;;  %v1236_v35 = vsel %vm1150_vm4, %v2543_v23, 0.0  ;;  %v1240_v23 = vsel %vm1150_vm4, %v2599_v55, 0.0 }
 0x170   : > { %v1537_v16 = vsel %vm1150_vm4, %v1397_v42, 0.0  ;;  %v1402_v42 = vmul.f32 %v2703_v41, %v2703_v41 }
 0x171   : > { %v1231_v19 = vadd.f32 %v1230_v27, %v1229_v34  ;;  %v1530_v12 = vadd.f32 %v1529_v25, %v1528_v36  ;;  %v2848_v54 = vpop.f32.mrf.mxu2  ;;  %v1399_v34 = vmul.f32 %v2599_v55, %v2599_v55  ;;  %v1539_v25 = vsel %vm1150_vm4, %v1398_v49, 0.0 }
 0x172   : > { %v1025_v1 = vpack.c.bf16 %v2848_v54, %v2848_v54 }
 0x173   : > { %v1233_v37 = vadd.f32 %v1232_v15, %v1231_v19  ;;  %v1532_v56 = vadd.f32 %v1531_v39, %v1530_v12  ;;  %v1041_v19 = vpack.c.bf16 %v2831_v28, %v2831_v28  ;;  %v1541_v15 = vsel %vm1150_vm4, %v1399_v34, 0.0 }
 0x174   : > { %1124 = vst.msk [vmem:[%s2182_s27 + $0x120] sm:$0xf] %vm1051_vm3, %v1025_v1  ;;  %v1404_v34 = vmul.f32 %v2273_v40, %v2273_v40 }
 0x175   : > { %v1235_v38 = vadd.f32 %v1234_v22, %v1233_v37  ;;  %v1534_v7 = vadd.f32 %v1533_v5, %v1532_v56  ;;  %v2856_v27 = vpop.f32.mrf.mxu3  ;;  %v1401_v37 = vmul.f32 %v2665_v14, %v2665_v14  ;;  %1140 = vst.msk [vmem:[%s2182_s27 + $0x160] sm:$0xf] %vm1051_vm3, %v1041_v19  ;;  %v1543_v5 = vsel %vm1150_vm4, %v1400_v26, 0.0 }
 0x176   : > { %v1042_v44 = vpack.c.bf16 %v2856_v27, %v2856_v27  ;;  %v1244_v22 = vsel %vm1150_vm4, %v2665_v14, 0.0  ;;  %v1403_v14 = vmul.f32 %v2740_v63, %v2740_v63  ;;  %v1405_v26 = vmul.f32 %v2292_v53, %v2292_v53 }
 0x177   : > { %v1237_v11 = vadd.f32 %v1236_v35, %v1235_v38  ;;  %v1536_v2 = vadd.f32 %v1535_v51, %v1534_v7  ;;  %v1545_v35 = vsel %vm1150_vm4, %v1401_v37, 0.0 }
 0x178   : > { %1141 = vst.msk [vmem:[%s2182_s27 + $0x164] sm:$0xf] %vm1051_vm3, %v1042_v44  ;;  %v1549_v19 = vsel %vm1150_vm4, %v1403_v14, 0.0  ;;  %v1406_v44 = vmul.f32 %v2312_v4, %v2312_v4 }
 0x179   : > { %v1239_v36 = vadd.f32 %v1238_v3, %v1237_v11  ;;  %v1538_v48 = vadd.f32 %v1537_v16, %v1536_v2  ;;  %v2882_v38 = vpop.f32.mrf.mxu2  ;;  %v1246_v11 = vsel %vm1150_vm4, %v2703_v41, 0.0 }
 0x17a   : > { %v1026_v51 = vpack.c.bf16 %v2882_v38, %v2882_v38 }
 0x17b   : > { %v1540_v12 = vadd.f32 %v1539_v25, %v1538_v48  ;;  %v1241_v39 = vadd.f32 %v1240_v23, %v1239_v36  ;;  %v1547_v36 = vsel %vm1150_vm4, %v1402_v42, 0.0  ;;  %v1248_v48 = vsel %vm1150_vm4, %v2740_v63, 0.0 }
 0x17c   : > { %1125 = vst.msk [vmem:[%s2182_s27 + $0x124] sm:$0xf] %vm1051_vm3, %v1026_v51  ;;  %v1250_v23 = vsel %vm1150_vm4, %v2273_v40, 0.0  ;;  %v1252_v63 = vsel %vm1150_vm4, %v2292_v53, 0.0  ;;  %v1553_v40 = vsel %vm1150_vm4, %v1405_v26, 0.0  ;;  %v1256_v53 = vsel %vm1150_vm4, %v2330_v17, 0.0 }
 0x17d   : > { %v1542_v55 = vadd.f32 %v1541_v15, %v1540_v12  ;;  %v1243_v56 = vadd.f32 %v1242_v62, %v1241_v39  ;;  %v2895_v3 = vpop.f32.mrf.mxu3  ;;  %v1551_v15 = vsel %vm1150_vm4, %v1404_v34, 0.0 }
 0x17e   : > { %v1043_v51 = vpack.c.bf16 %v2895_v3, %v2895_v3 }
 0x17f   : > { %v1544_v49 = vadd.f32 %v1543_v5, %v1542_v55  ;;  %v1245_v7 = vadd.f32 %v1244_v22, %v1243_v56  ;;  %v1254_v56 = vsel %vm1150_vm4, %v2312_v4, 0.0  ;;  %v1407_v5 = vmul.f32 %v2330_v17, %v2330_v17 }
 0x180   : > { %v1555_v22 = vsel %vm1150_vm4, %v1406_v44, 0.0  ;;  %1142 = vst.msk [vmem:[%s2182_s27 + $0x168] sm:$0xf] %vm1051_vm3, %v1043_v51  ;;  %v1268_v51 = vsel %vm1150_vm4, %v2449_v29, 0.0 }
 0x181   : > { %v1546_v2 = vadd.f32 %v1545_v35, %v1544_v49  ;;  %v1247_v16 = vadd.f32 %v1246_v11, %v1245_v7  ;;  %v2912_v62 = vpop.f32.mrf.mxu2  ;;  %v1408_v7 = vmul.f32 %v2349_v30, %v2349_v30  ;;  %v1557_v14 = vsel %vm1150_vm4, %v1407_v5, 0.0 }
 0x183   : > { %v1548_v41 = vadd.f32 %v1547_v36, %v1546_v2  ;;  %v1249_v25 = vadd.f32 %v1248_v48, %v1247_v16  ;;  %v1258_v2 = vsel %vm1150_vm4, %v2349_v30, 0.0  ;;  %v1409_v16 = vmul.f32 %v2366_v46, %v2366_v46 }
 0x184   : > { %v1559_v36 = vsel %vm1150_vm4, %v1408_v7, 0.0  ;;  %v1260_v48 = vsel %vm1150_vm4, %v2366_v46, 0.0  ;;  %v1027_v30 = vpack.c.bf16 %v2912_v62, %v2912_v62  ;;  %v1411_v46 = vmul.f32 %v2409_v10, %v2409_v10 }
 0x185   : > { %v1251_v12 = vadd.f32 %v1250_v23, %v1249_v25  ;;  %v1550_v39 = vadd.f32 %v1549_v19, %v1548_v41  ;;  %v2920_v49 = vpop.f32.mrf.mxu3  ;;  %v1410_v41 = vmul.f32 %v2385_v61, %v2385_v61  ;;  %v1561_v44 = vsel %vm1150_vm4, %v1409_v16, 0.0 }
 0x186   : > { %v1044_v4 = vpack.c.bf16 %v2920_v49, %v2920_v49  ;;  %1126 = vst.msk [vmem:[%s2182_s27 + $0x128] sm:$0xf] %vm1051_vm3, %v1027_v30  ;;  %v1565_v5 = vsel %vm1150_vm4, %v1411_v46, 0.0  ;;  %v1276_v46 = vsel %vm1150_vm4, %v2549_v31, 0.0 }
 0x187   : > { %v1253_v37 = vadd.f32 %v1252_v63, %v1251_v12  ;;  %v1552_v55 = vadd.f32 %v1551_v15, %v1550_v39  ;;  %v1262_v12 = vsel %vm1150_vm4, %v2385_v61, 0.0 }
 0x188   : > { %1143 = vst.msk [vmem:[%s2182_s27 + $0x16c] sm:$0xf] %vm1051_vm3, %v1044_v4 }
 0x189   : > { %v1255_v42 = vadd.f32 %v1254_v56, %v1253_v37  ;;  %v1554_v1 = vadd.f32 %v1553_v40, %v1552_v55  ;;  %v2946_v25 = vpop.f32.mrf.mxu2  ;;  %v1563_v37 = vsel %vm1150_vm4, %v1410_v41, 0.0  ;;  %v1264_v55 = vsel %vm1150_vm4, %v2409_v10, 0.0 }
 0x18a   : > { %v1028_v19 = vpack.c.bf16 %v2946_v25, %v2946_v25  ;;  %v1412_v40 = vmul.f32 %v2430_v20, %v2430_v20 }
 0x18b   : > { %v1257_v35 = vadd.f32 %v1256_v53, %v1255_v42  ;;  %v1556_v11 = vadd.f32 %v1555_v22, %v1554_v1  ;;  %v1266_v22 = vsel %vm1150_vm4, %v2430_v20, 0.0  ;;  %v1413_v42 = vmul.f32 %v2449_v29, %v2449_v29 }
 0x18c   : > { %1127 = vst.msk [vmem:[%s2182_s27 + $0x12c] sm:$0xf] %vm1051_vm3, %v1028_v19  ;;  %v1414_v1 = vmul.f32 %v2474_v43, %v2474_v43  ;;  %v1567_v10 = vsel %vm1150_vm4, %v1412_v40, 0.0  ;;  %v1270_v20 = vsel %vm1150_vm4, %v2474_v43, 0.0  ;;  %v1272_v29 = vsel %vm1150_vm4, %v2499_v57, 0.0 }
 0x18d   : > { %v1259_v17 = vadd.f32 %v1258_v2, %v1257_v35  ;;  %v1558_v34 = vadd.f32 %v1557_v14, %v1556_v11  ;;  %v2959_v63 = vpop.f32.mrf.mxu3  ;;  %v1569_v11 = vsel %vm1150_vm4, %v1413_v42, 0.0  ;;  %v1415_v14 = vmul.f32 %v2499_v57, %v2499_v57 }
 0x18e   : > { %v1571_v2 = vsel %vm1150_vm4, %v1414_v1, 0.0  ;;  %v1417_v19 = vmul.f32 %v2549_v31, %v2549_v31  ;;  %v1419_v40 = vmul.f32 %v2609_v60, %v2609_v60  ;;  %v1280_v31 = vsel %vm1150_vm4, %v2609_v60, 0.0 }
 0x18f   : > { %v1261_v23 = vadd.f32 %v1260_v48, %v1259_v17  ;;  %v1560_v26 = vadd.f32 %v1559_v36, %v1558_v34  ;;  %v1416_v36 = vmul.f32 %v2524_v9, %v2524_v9  ;;  %v1045_v48 = vpack.c.bf16 %v2959_v63, %v2959_v63 }
 0x190   : > { %v1420_v42 = vmul.f32 %v2642_v6, %v2642_v6 }
 0x191   : > { %v1263_v39 = vadd.f32 %v1262_v12, %v1261_v23  ;;  %v1562_v15 = vadd.f32 %v1561_v44, %v1560_v26  ;;  %v1573_v23 = vsel %vm1150_vm4, %v1415_v14, 0.0  ;;  %v1274_v26 = vsel %vm1150_vm4, %v2524_v9, 0.0  ;;  %1144 = vst.msk [vmem:[%s2182_s27 + $0x170] sm:$0xf] %vm1051_vm3, %v1045_v48 }
 0x192   : > { %v1575_v12 = vsel %vm1150_vm4, %v1416_v36, 0.0  ;;  %v1577_v9 = vsel %vm1150_vm4, %v1417_v19, 0.0  ;;  %v1583_v60 = vsel %vm1150_vm4, %v1420_v42, 0.0  ;;  %v1290_v19 = vsel %vm1150_vm4, %v2784_v0, 0.0 }
 0x193   : > { %v1265_v61 = vadd.f32 %v1264_v55, %v1263_v39  ;;  %v1564_v56 = vadd.f32 %v1563_v37, %v1562_v15  ;;  %v1418_v39 = vmul.f32 %v2566_v52, %v2566_v52  ;;  %v1278_v55 = vsel %vm1150_vm4, %v2566_v52, 0.0 }
 0x194   : > { %v1282_v52 = vsel %vm1150_vm4, %v2642_v6, 0.0  ;;  %v1286_v6 = vsel %vm1150_vm4, %v2710_v24, 0.0 }
 0x195   : > { %v1267_v53 = vadd.f32 %v1266_v22, %v1265_v61  ;;  %v1566_v7 = vadd.f32 %v1565_v5, %v1564_v56  ;;  %v2982_v34 = vpop.f32.mrf.mxu3  ;;  %v1579_v22 = vsel %vm1150_vm4, %v1418_v39, 0.0  ;;  %v1426_v39 = vmul.f32 %v2848_v54, %v2848_v54 }
 0x196   : > { %v1046_v43 = vpack.c.bf16 %v2982_v34, %v2982_v34 }
 0x197   : > { %v1269_v4 = vadd.f32 %v1268_v51, %v1267_v53  ;;  %v1568_v35 = vadd.f32 %v1567_v10, %v1566_v7  ;;  %v1581_v7 = vsel %vm1150_vm4, %v1419_v40, 0.0  ;;  %v1421_v10 = vmul.f32 %v2672_v47, %v2672_v47 }
 0x198   : > { %1145 = vst.msk [vmem:[%s2182_s27 + $0x174] sm:$0xf] %vm1051_vm3, %v1046_v43  ;;  %v1422_v51 = vmul.f32 %v2710_v24, %v2710_v24  ;;  %v1424_v43 = vmul.f32 %v2784_v0, %v2784_v0 }
 0x199   : > { %v1570_v16 = vadd.f32 %v1569_v11, %v1568_v35  ;;  %v1271_v17 = vadd.f32 %v1270_v20, %v1269_v4  ;;  %v1284_v11 = vsel %vm1150_vm4, %v2672_v47, 0.0  ;;  %v1288_v47 = vsel %vm1150_vm4, %v2752_v13, 0.0 }
 0x19b   : > { %v1273_v41 = vadd.f32 %v1272_v29, %v1271_v17  ;;  %v1572_v30 = vadd.f32 %v1571_v2, %v1570_v16  ;;  %v1585_v2 = vsel %vm1150_vm4, %v1421_v10, 0.0  ;;  %v1423_v16 = vmul.f32 %v2752_v13, %v2752_v13 }
 0x19c   : > { %v1587_v17 = vsel %vm1150_vm4, %v1422_v51, 0.0 }
 0x19d   : > { %v1275_v57 = vadd.f32 %v1274_v26, %v1273_v41  ;;  %v1574_v44 = vadd.f32 %v1573_v23, %v1572_v30  ;;  %v3011_v5 = vpop.f32.mrf.mxu3  ;;  %v1589_v26 = vsel %vm1150_vm4, %v1423_v16, 0.0 }
 0x19e   : > { %v1047_v41 = vpack.c.bf16 %v3011_v5, %v3011_v5 }
 0x19f   : > { %v1277_v15 = vadd.f32 %v1276_v46, %v1275_v57  ;;  %v1576_v37 = vadd.f32 %v1575_v12, %v1574_v44  ;;  %v1425_v57 = vmul.f32 %v2818_v59, %v2818_v59  ;;  %v1591_v12 = vsel %vm1150_vm4, %v1424_v43, 0.0 }
 0x1a0   : > { %1146 = vst.msk [vmem:[%s2182_s27 + $0x178] sm:$0xf] %vm1051_vm3, %v1047_v41  ;;  %v1292_v46 = vsel %vm1150_vm4, %v2818_v59, 0.0  ;;  %v1296_v59 = vsel %vm1150_vm4, %v2882_v38, 0.0 }
 0x1a1   : > { %v1279_v61 = vadd.f32 %v1278_v55, %v1277_v15  ;;  %v1578_v56 = vadd.f32 %v1577_v9, %v1576_v37  ;;  %v1593_v0 = vsel %vm1150_vm4, %v1425_v57, 0.0  ;;  %v1294_v9 = vsel %vm1150_vm4, %v2848_v54, 0.0 }
 0x1a2   : > { %v1427_v55 = vmul.f32 %v2882_v38, %v2882_v38  ;;  %v1298_v54 = vsel %vm1150_vm4, %v2912_v62, 0.0 }
 0x1a3   : > { %v1281_v1 = vadd.f32 %v1280_v31, %v1279_v61  ;;  %v1580_v53 = vadd.f32 %v1579_v22, %v1578_v56  ;;  %v1595_v22 = vsel %vm1150_vm4, %v1426_v39, 0.0  ;;  %v1428_v31 = vmul.f32 %v2912_v62, %v2912_v62 }
 0x1a4   : > { %v1431_v62 = vmul.f32 %v2482_v45, %v2482_v45 }
 0x1a5   : > { %v1283_v4 = vadd.f32 %v1282_v52, %v1281_v1  ;;  %v1582_v35 = vadd.f32 %v1581_v7, %v1580_v53  ;;  %v3034_v48 = vpop.f32.mrf.mxu3  ;;  %v1597_v53 = vsel %vm1150_vm4, %v1427_v55, 0.0  ;;  %v1429_v7 = vmul.f32 %v2946_v25, %v2946_v25 }
 0x1a6   : > { %v1048_v24 = vpack.c.bf16 %v3034_v48, %v3034_v48  ;;  %v1430_v52 = vmul.f32 %v2458_v32, %v2458_v32  ;;  %v1599_v38 = vsel %vm1150_vm4, %v1428_v31, 0.0  ;;  %v1605_v41 = vsel %vm1150_vm4, %v1431_v62, 0.0 }
 0x1a7   : > { %v1285_v20 = vadd.f32 %v1284_v11, %v1283_v4  ;;  %v1584_v14 = vadd.f32 %v1583_v60, %v1582_v35  ;;  %v1300_v4 = vsel %vm1150_vm4, %v2946_v25, 0.0  ;;  %v1302_v11 = vsel %vm1150_vm4, %v2458_v32, 0.0 }
 0x1a8   : > { %1147 = vst.msk [vmem:[%s2182_s27 + $0x17c] sm:$0xf] %vm1051_vm3, %v1048_v24  ;;  %v1304_v25 = vsel %vm1150_vm4, %v2482_v45, 0.0 }
 0x1a9   : > { %v1287_v29 = vadd.f32 %v1286_v6, %v1285_v20  ;;  %v1586_v36 = vadd.f32 %v1585_v2, %v1584_v14  ;;  %v1601_v20 = vsel %vm1150_vm4, %v1429_v7, 0.0  ;;  %v1603_v14 = vsel %vm1150_vm4, %v1430_v52, 0.0 }
 0x1ab   : > { %v1289_v30 = vadd.f32 %v1288_v47, %v1287_v29  ;;  %v1588_v23 = vadd.f32 %v1587_v17, %v1586_v36  ;;  %v3223_v17 = vld [vmem:[#allocation2_spill] sm:$0xff] }
 0x1ac   : > { %v1432_v29 = vmul.f32 %v3223_v17, %v3223_v17  ;;  %v1306_v24 = vsel %vm1150_vm4, %v3223_v17, 0.0  ;;  %v1441_v17 = vmul.f32 %v2792_v21, %v2792_v21 }
 0x1ad   : > { %v1590_v13 = vadd.f32 %v1589_v26, %v1588_v23  ;;  %v1291_v44 = vadd.f32 %v1290_v19, %v1289_v30  ;;  %v3063_v56 = vpop.f32.mrf.mxu3  ;;  %v3224_v30 = vld [vmem:[#allocation3_spill] sm:$0xff] }
 0x1ae   : > { %v1049_v32 = vpack.c.bf16 %v3063_v56, %v3063_v56  ;;  %v1433_v23 = vmul.f32 %v3224_v30, %v3224_v30  ;;  %v1607_v19 = vsel %vm1150_vm4, %v1432_v29, 0.0  ;;  %v1308_v57 = vsel %vm1150_vm4, %v3224_v30, 0.0 }
 0x1af   : > { %v1592_v15 = vadd.f32 %v1591_v12, %v1590_v13  ;;  %v1293_v37 = vadd.f32 %v1292_v46, %v1291_v44  ;;  %v3225_v13 = vld [vmem:[#allocation4_spill] sm:$0xff]  ;;  %v1443_v30 = vmul.f32 %v2856_v27, %v2856_v27 }
 0x1b0   : > { %1148 = vst.msk [vmem:[%s2182_s27 + $0x180] sm:$0xf] %vm1051_vm3, %v1049_v32  ;;  %v1434_v44 = vmul.f32 %v3225_v13, %v3225_v13  ;;  %v1609_v39 = vsel %vm1150_vm4, %v1433_v23, 0.0 }
 0x1b1   : > { %v1594_v40 = vadd.f32 %v1593_v0, %v1592_v15  ;;  %v1295_v61 = vadd.f32 %v1294_v9, %v1293_v37  ;;  %v1310_v15 = vsel %vm1150_vm4, %v3225_v13, 0.0  ;;  %v3226_v37 = vld [vmem:[#allocation5_spill] sm:$0xff] }
 0x1b2   : > { %v1435_v0 = vmul.f32 %v3226_v37, %v3226_v37 }
 0x1b3   : > { %v1596_v42 = vadd.f32 %v1595_v22, %v1594_v40  ;;  %v1297_v1 = vadd.f32 %v1296_v59, %v1295_v61  ;;  %v1611_v40 = vsel %vm1150_vm4, %v1434_v44, 0.0  ;;  %v1312_v61 = vsel %vm1150_vm4, %v3226_v37, 0.0 }
 0x1b4   : > { %v1436_v22 = vmul.f32 %v2624_v33, %v2624_v33  ;;  %v1629_v44 = vsel %vm1150_vm4, %v1443_v30, 0.0  ;;  %v1446_v37 = vmul.f32 %v2959_v63, %v2959_v63 }
 0x1b5   : > { %v1598_v10 = vadd.f32 %v1597_v53, %v1596_v42  ;;  %v1299_v51 = vadd.f32 %v1298_v54, %v1297_v1  ;;  %v3086_v16 = vpop.f32.mrf.mxu3  ;;  %v1613_v42 = vsel %vm1150_vm4, %v1435_v0, 0.0  ;;  %v1314_v1 = vsel %vm1150_vm4, %v2624_v33, 0.0 }
 0x1b6   : > { %v1050_v36 = vpack.c.bf16 %v3086_v16, %v3086_v16  ;;  %v1437_v53 = vmul.f32 %v2648_v50, %v2648_v50  ;;  %v1615_v52 = vsel %vm1150_vm4, %v1436_v22, 0.0  ;;  %v1318_v33 = vsel %vm1150_vm4, %v2687_v58, 0.0 }
 0x1b7   : > { %v1600_v35 = vadd.f32 %v1599_v38, %v1598_v10  ;;  %v1301_v60 = vadd.f32 %v1300_v4, %v1299_v51  ;;  %v1316_v10 = vsel %vm1150_vm4, %v2648_v50, 0.0  ;;  %v1438_v51 = vmul.f32 %v2687_v58, %v2687_v58 }
 0x1b8   : > { %1149 = vst.msk [vmem:[%s2182_s27 + $0x184] sm:$0xf] %vm1051_vm3, %v1050_v36  ;;  %v1320_v50 = vsel %vm1150_vm4, %v2719_v18, 0.0  ;;  %v1322_v58 = vsel %vm1150_vm4, %v2765_v8, 0.0 }
 0x1b9   : > { %v1303_v2 = vadd.f32 %v1302_v11, %v1301_v60  ;;  %v1602_v6 = vadd.f32 %v1601_v20, %v1600_v35  ;;  %v1617_v35 = vsel %vm1150_vm4, %v1437_v53, 0.0  ;;  %v1439_v60 = vmul.f32 %v2719_v18, %v2719_v18 }
 0x1ba   : > { %v1619_v20 = vsel %vm1150_vm4, %v1438_v51, 0.0  ;;  %v1324_v18 = vsel %vm1150_vm4, %v2792_v21, 0.0  ;;  %v1328_v21 = vsel %vm1150_vm4, %v2856_v27, 0.0  ;;  %v1332_v27 = vsel %vm1150_vm4, %v2920_v49, 0.0 }
 0x1bb   : > { %v1305_v47 = vadd.f32 %v1304_v25, %v1303_v2  ;;  %v1604_v43 = vadd.f32 %v1603_v14, %v1602_v6  ;;  %v1440_v14 = vmul.f32 %v2765_v8, %v2765_v8  ;;  %v1621_v25 = vsel %vm1150_vm4, %v1439_v60, 0.0 }
 0x1bc   : > { %v1326_v8 = vsel %vm1150_vm4, %v2831_v28, 0.0  ;;  %v1450_v51 = vmul.f32 %v3063_v56, %v3063_v56 }
 0x1bd   : > { %v1307_v45 = vadd.f32 %v1306_v24, %v1305_v47  ;;  %v1606_v26 = vadd.f32 %v1605_v41, %v1604_v43  ;;  %v1623_v36 = vsel %vm1150_vm4, %v1440_v14, 0.0  ;;  %v1442_v47 = vmul.f32 %v2831_v28, %v2831_v28 }
 0x1be   : > { %v1625_v24 = vsel %vm1150_vm4, %v1441_v17, 0.0  ;;  %v1330_v28 = vsel %vm1150_vm4, %v2895_v3, 0.0 }
 0x1bf   : > { %v1309_v12 = vadd.f32 %v1308_v57, %v1307_v45  ;;  %v1608_v46 = vadd.f32 %v1607_v19, %v1606_v26  ;;  %v1627_v26 = vsel %vm1150_vm4, %v1442_v47, 0.0  ;;  %v1444_v19 = vmul.f32 %v2895_v3, %v2895_v3 }
 0x1c0   : > { %v1334_v3 = vsel %vm1150_vm4, %v2959_v63, 0.0  ;;  %v1338_v63 = vsel %vm1150_vm4, %v3011_v5, 0.0 }
 0x1c1   : > { %v1311_v9 = vadd.f32 %v1310_v15, %v1309_v12  ;;  %v1610_v55 = vadd.f32 %v1609_v39, %v1608_v46  ;;  %v1445_v12 = vmul.f32 %v2920_v49, %v2920_v49  ;;  %v1631_v15 = vsel %vm1150_vm4, %v1444_v19, 0.0 }
 0x1c2   : > { %v1336_v49 = vsel %vm1150_vm4, %v2982_v34, 0.0 }
 0x1c3   : > { %v1313_v59 = vadd.f32 %v1312_v61, %v1311_v9  ;;  %v1612_v31 = vadd.f32 %v1611_v40, %v1610_v55  ;;  %v1633_v55 = vsel %vm1150_vm4, %v1445_v12, 0.0  ;;  %v1447_v40 = vmul.f32 %v2982_v34, %v2982_v34 }
 0x1c4   : > { %v1340_v34 = vsel %vm1150_vm4, %v3034_v48, 0.0 }
 0x1c5   : > { %v1315_v54 = vadd.f32 %v1314_v1, %v1313_v59  ;;  %v1614_v7 = vadd.f32 %v1613_v42, %v1612_v31  ;;  %v1635_v59 = vsel %vm1150_vm4, %v1446_v37, 0.0  ;;  %v1448_v31 = vmul.f32 %v3011_v5, %v3011_v5 }
 0x1c6   : > { %v1637_v53 = vsel %vm1150_vm4, %v1447_v40, 0.0  ;;  %v1342_v5 = vsel %vm1150_vm4, %v3063_v56, 0.0 }
 0x1c7   : > { %v1317_v38 = vadd.f32 %v1316_v10, %v1315_v54  ;;  %v1616_v4 = vadd.f32 %v1615_v52, %v1614_v7  ;;  %v1449_v54 = vmul.f32 %v3034_v48, %v3034_v48  ;;  %v1639_v10 = vsel %vm1150_vm4, %v1448_v31, 0.0 }
 0x1c8   : > { %v1344_v48 = vsel %vm1150_vm4, %v3086_v16, 0.0 }
 0x1c9   : > { %v1618_v11 = vadd.f32 %v1617_v35, %v1616_v4  ;;  %v1319_v62 = vadd.f32 %v1318_v33, %v1317_v38  ;;  %v1641_v35 = vsel %vm1150_vm4, %v1449_v54, 0.0  ;;  %v1451_v33 = vmul.f32 %v3086_v16, %v3086_v16 }
 0x1cb   : > { %v1321_v2 = vadd.f32 %v1320_v50, %v1319_v62  ;;  %v1620_v6 = vadd.f32 %v1619_v20, %v1618_v11  ;;  %v1643_v62 = vsel %vm1150_vm4, %v1450_v51, 0.0  ;;  %v1645_v14 = vsel %vm1150_vm4, %v1451_v33, 0.0 }
 0x1cd   : > { %v1323_v29 = vadd.f32 %v1322_v58, %v1321_v2  ;;  %v1622_v32 = vadd.f32 %v1621_v25, %v1620_v6 }
 0x1cf   : > { %v1325_v43 = vadd.f32 %v1324_v18, %v1323_v29  ;;  %v1624_v41 = vadd.f32 %v1623_v36, %v1622_v32 }
 0x1d1   : > { %v1327_v23 = vadd.f32 %v1326_v8, %v1325_v43  ;;  %v1626_v45 = vadd.f32 %v1625_v24, %v1624_v41 }
 0x1d3   : > { %v1329_v57 = vadd.f32 %v1328_v21, %v1327_v23  ;;  %v1628_v13 = vadd.f32 %v1627_v26, %v1626_v45 }
 0x1d5   : > { %v1331_v46 = vadd.f32 %v1330_v28, %v1329_v57  ;;  %v1630_v39 = vadd.f32 %v1629_v44, %v1628_v13 }
 0x1d7   : > { %v1333_v0 = vadd.f32 %v1332_v27, %v1331_v46  ;;  %v1632_v9 = vadd.f32 %v1631_v15, %v1630_v39 }
 0x1d9   : > { %v1335_v61 = vadd.f32 %v1334_v3, %v1333_v0  ;;  %v1634_v22 = vadd.f32 %v1633_v55, %v1632_v9 }
 0x1db   : > { %v1636_v42 = vadd.f32 %v1635_v59, %v1634_v22  ;;  %v1337_v1 = vadd.f32 %v1336_v49, %v1335_v61 }
 0x1dd   : > { %v1638_v7 = vadd.f32 %v1637_v53, %v1636_v42  ;;  %v1339_v52 = vadd.f32 %v1338_v63, %v1337_v1 }
 0x1df   : > { %v1640_v38 = vadd.f32 %v1639_v10, %v1638_v7  ;;  %v1341_v4 = vadd.f32 %v1340_v34, %v1339_v52 }
 0x1e1   : > { %v1642_v60 = vadd.f32 %v1641_v35, %v1640_v38  ;;  %v1343_v11 = vadd.f32 %v1342_v5, %v1341_v4 }
 0x1e3   : > { %v1644_v20 = vadd.f32 %v1643_v62, %v1642_v60  ;;  %v1345_v50 = vadd.f32 %v1344_v48, %v1343_v11 }
 0x1e5   : > { %v1346_v2 = vrot.slane %v1345_v50, 4  ;;  %v1646_v6 = vadd.f32 %v1645_v14, %v1644_v20 }
 0x1e7   : > { %v1347_v25 = vadd.f32 %v1346_v2, %v1345_v50  ;;  %v1647_v56 = vrot.slane %v1646_v6, 4 }
 0x1e9   : > { %v1348_v58 = vrot.slane %v1347_v25, 2  ;;  %v1648_v17 = vadd.f32 %v1647_v56, %v1646_v6 }
 0x1eb   : > { %v1349_v29 = vadd.f32 %v1348_v58, %v1347_v25  ;;  %v1649_v32 = vrot.slane %v1648_v17, 2 }
 0x1ed   : > { %v1350_v36 = vrot.slane %v1349_v29, 1  ;;  %v1650_v18 = vadd.f32 %v1649_v32, %v1648_v17 }
 0x1ef   : > { %v1351_v16 = vadd.f32 %v1350_v36, %v1349_v29  ;;  %v1651_v47 = vrot.slane %v1650_v18, 1 }
 0x1f1   : > { %1353 = vst.msk [vmem:[%s184_s4] sm:$0x1] %vm1352_vm5, %v1351_v16  ;;  %v1652_v43 = vadd.f32 %v1651_v47, %v1650_v18 }
 0x1f3   : > { %1653 = vst.msk [vmem:[%s184_s4 + $0x1] sm:$0x1] %vm1352_vm5, %v1652_v43 }
 0x1f4 PF: > { %s14_s12 = sadd.s32 1, %s2076_s12  }
 0x1f5   : > { %p11_p5 = scmp.ge.s32.totalorder %s14_s12, 4  }
 0x1f7   :  { %13 = sbr.rel (!%p11_p5) target bundleno = 1 (0x1), region = 70 }

// kernel: convnet_forward.6
= control target key start
LH: loop header
LB: loop body
LE: loop exit
PB: predicated region body
PF: predicated region fallthrough
CT: control target
= control target key end

     0   :  { %s1245_s12 = smov 0   ;;  %s1974_s0 = inlined_call_operand.vmem [shape: bf16[2,28,14,64], index: 0, kind: input, shape index: {}]   ;;  %s1975_s1 = inlined_call_operand.vmem [shape: f32[1,64], index: 1, kind: input, shape index: {}]   ;;  %s1976_s2 = inlined_call_operand.vmem [shape: f32[1,64], index: 2, kind: input, shape index: {}]   ;;  %s1977_s3 = inlined_call_operand.vmem [shape: bf16[2,18,18,32], index: 3, kind: output, shape index: {}]  }
   0x1 LB: > { %s1024_s13 = sadd.s32 4294967295, %s1221_s12   ;;  %p1028_p0 = scmp.ge.s32.totalorder %s1221_s12, 1  ;;  %s1221_s12 = sphi %s1245_s12, %s13_s12  }
   0x2   : > { %p137_p1 = scmp.lt.s32.totalorder %s1221_s12, 3 }
   0x4   : > { %p138_p2 = pnand %p1028_p0, %p137_p1 }
   0x6   : > { %141 = sbr.rel (%p138_p2) target bundleno = 228 (0xe4), region = 32 }
   0xb   : > { %p161_p3 = scmp.lt.s32.totalorder %s1024_s13, 1  ;;  %v1264_v0 = vld [vmem:[%s1975_s1] ss:$0 sm:$0xff]  ;;  %s1223_s22 = smov 96   ;;  %vm768_vm0 = vcmask 257024   ;;  %vm771_vm1 = vcmask 253952  }
   0xc   : > { %v1269_v1 = vld [vmem:[%s1976_s2] ss:$0 sm:$0xff]  ;;  %vm852_vm2 = vcmask 1040384   ;;  %vm853_vm3 = vcmask 1044484   ;;  %vm940_vm4 = vcmask 257025  }
   0xd   : > { %s2014_s13 = smov (!%p161_p3, %s1024_s13), 1  ;;  %vm1791_vm5 = vmor %vm852_vm2, %vm853_vm3 }
   0xe   : > { %s1061_s14 = smul.u32 224, %s2014_s13 }
   0xf   : > { %s1062_s23 = smul.u32 216, %s2014_s13 }
  0x10   : > { %s1259_s17 = scalar_lea.vmem %s1974_s0, %s1061_s14 }
  0x11   : > { %v176_v2 = vld [vmem:[%s1259_s17 + $0x10] sm:$0xf]  ;;  %v177_v3 = vld [vmem:[%s1259_s17 + $0x14] sm:$0x7]  ;;  %v172_v4 = vld [vmem:[%s1259_s17] sm:$0xf]  ;;  %s1635_s26 = scalar_lea.vmem %s1977_s3, %s1062_s23 }
  0x12   : > { %v232_v5 = vunpack.c.l.bf16 %v176_v2  ;;  %v233_v6 = vunpack.c.l.bf16 %v177_v3  ;;  %v173_v7 = vld [vmem:[%s1259_s17 + $0x4] sm:$0x7]  ;;  %v228_v8 = vunpack.c.l.bf16 %v172_v4  ;;  %v178_v9 = vld [vmem:[%s1259_s17 + $0x18] sm:$0xf]  ;;  %v179_v10 = vld [vmem:[%s1259_s17 + $0x1c] sm:$0x7] }
  0x13   : > { %v229_v11 = vunpack.c.l.bf16 %v173_v7  ;;  %v234_v12 = vunpack.c.l.bf16 %v178_v9  ;;  %v235_v13 = vunpack.c.l.bf16 %v179_v10  ;;  %v174_v14 = vld [vmem:[%s1259_s17 + $0x8] sm:$0xf]  ;;  %v175_v15 = vld [vmem:[%s1259_s17 + $0xc] sm:$0x7]  ;;  %v180_v24 = vld [vmem:[%s1259_s17 + $0x20] sm:$0xf] }
  0x14   : > { %v292_v16 = vmul.f32 %v1264_v0, %v232_v5  ;;  %v293_v17 = vmul.f32 %v1264_v0, %v233_v6  ;;  %v288_v18 = vmul.f32 %v1264_v0, %v228_v8  ;;  %v230_v19 = vunpack.c.l.bf16 %v174_v14  ;;  %v181_v25 = vld [vmem:[%s1259_s17 + $0x24] sm:$0x7]  ;;  %v186_v30 = vld [vmem:[%s1259_s17 + $0x38] sm:$0xf]  ;;  %v187_v33 = vld [vmem:[%s1259_s17 + $0x3c] sm:$0x7] }
  0x15   : > { %v289_v20 = vmul.f32 %v1264_v0, %v229_v11  ;;  %v294_v21 = vmul.f32 %v1264_v0, %v234_v12  ;;  %v295_v22 = vmul.f32 %v1264_v0, %v235_v13  ;;  %v231_v23 = vunpack.c.l.bf16 %v175_v15  ;;  %v184_v37 = vld [vmem:[%s1259_s17 + $0x30] sm:$0xf]  ;;  %v185_v38 = vld [vmem:[%s1259_s17 + $0x34] sm:$0x7]  ;;  %v182_v39 = vld [vmem:[%s1259_s17 + $0x28] sm:$0xf] }
  0x16   : > { %v1288_v26 = vadd.f32 %v1269_v1, %v292_v16  ;;  %v1291_v27 = vadd.f32 %v1269_v1, %v293_v17  ;;  %v1294_v28 = vadd.f32 %v1269_v1, %v288_v18  ;;  %v290_v29 = vmul.f32 %v1264_v0, %v230_v19  ;;  %v183_v48 = vld [vmem:[%s1259_s17 + $0x2c] sm:$0x7]  ;;  %v192_v61 = vld [vmem:[%s1259_s17 + $0x50] sm:$0xf]  ;;  %v193_v62 = vld [vmem:[%s1259_s17 + $0x54] sm:$0x7] }
  0x17   : > { %v1299_v31 = vadd.f32 %v1269_v1, %v289_v20  ;;  %v291_v32 = vmul.f32 %v1264_v0, %v231_v23  ;;  %v236_v35 = vunpack.c.l.bf16 %v180_v24  ;;  %v237_v36 = vunpack.c.l.bf16 %v181_v25  ;;  %v188_v63 = vld [vmem:[%s1259_s17 + $0x40] sm:$0xf]  ;;  %v190_v6 = vld [vmem:[%s1259_s17 + $0x48] sm:$0xf]  ;;  %v191_v7 = vld [vmem:[%s1259_s17 + $0x4c] sm:$0x7] }
  0x18   : > { %v1083_v34 = vpack.i.bf16 %v1291_v27, %v1288_v26  ;;  %v1311_v41 = vadd.f32 %v1269_v1, %v294_v21  ;;  %v1314_v42 = vadd.f32 %v1269_v1, %v295_v22  ;;  %v242_v43 = vunpack.c.l.bf16 %v186_v30  ;;  %v189_v8 = vld [vmem:[%s1259_s17 + $0x44] sm:$0x7]  ;;  %v195_v30 = vld [vmem:[%s1259_s17 + $0x5c] sm:$0x7] }
  0x19   : > { %v1073_v40 = vpack.i.bf16 %v1299_v31, %v1294_v28  ;;  %v1318_v44 = vadd.f32 %v1269_v1, %v290_v29  ;;  %v296_v45 = vmul.f32 %v1264_v0, %v236_v35  ;;  %v297_v46 = vmul.f32 %v1264_v0, %v237_v36  ;;  %v194_v29 = vld [vmem:[%s1259_s17 + $0x58] sm:$0xf]  ;;  %v198_v36 = vld [vmem:[%s1259_s17 + $0x68] sm:$0xf] }
  0x1a   : > { %1084 = vrot.lane.b32.xlu1 %v1083_v34, %s1223_s22  ;;  %v243_v47 = vunpack.c.l.bf16 %v187_v33  ;;  %v1325_v49 = vadd.f32 %v1269_v1, %v291_v32  ;;  %v240_v50 = vunpack.c.l.bf16 %v184_v37  ;;  %v241_v51 = vunpack.c.l.bf16 %v185_v38  ;;  %v199_v37 = vld [vmem:[%s1259_s17 + $0x6c] sm:$0x7] }
  0x1b   : > { %1074 = vrot.lane.b32.xlu0 %v1073_v40, %s1223_s22  ;;  %v238_v52 = vunpack.c.l.bf16 %v182_v39  ;;  %v1328_v53 = vadd.f32 %v1269_v1, %v296_v45  ;;  %v1331_v54 = vadd.f32 %v1269_v1, %v297_v46  ;;  %v302_v55 = vmul.f32 %v1264_v0, %v242_v43  ;;  %v196_v40 = vld [vmem:[%s1259_s17 + $0x60] sm:$0xf]  ;;  %v197_v43 = vld [vmem:[%s1259_s17 + $0x64] sm:$0x7] }
  0x1c   : > { %v239_v56 = vunpack.c.l.bf16 %v183_v48  ;;  %v1088_v58 = vpack.i.bf16 %v1314_v42, %v1311_v41  ;;  %v303_v60 = vmul.f32 %v1264_v0, %v243_v47  ;;  %v1078_v2 = vpack.i.bf16 %v1325_v49, %v1318_v44 }
  0x1d   : > { %v298_v57 = vmul.f32 %v1264_v0, %v238_v52  ;;  %v1093_v59 = vpack.i.bf16 %v1331_v54, %v1328_v53  ;;  %v300_v3 = vmul.f32 %v1264_v0, %v240_v50  ;;  %v301_v4 = vmul.f32 %v1264_v0, %v241_v51 }
  0x1e   : > { %v299_v5 = vmul.f32 %v1264_v0, %v239_v56  ;;  %v1353_v9 = vadd.f32 %v1269_v1, %v302_v55  ;;  %v248_v12 = vunpack.c.l.bf16 %v192_v61  ;;  %v249_v13 = vunpack.c.l.bf16 %v193_v62  ;;  %v204_v56 = vld [vmem:[%s1259_s17 + $0x80] sm:$0xf] }
  0x1f   : > { %1094 = vrot.lane.b32.xlu2 %v1093_v59, %s1223_s22  ;;  %v1356_v10 = vadd.f32 %v1269_v1, %v298_v57  ;;  %v244_v14 = vunpack.c.l.bf16 %v188_v63  ;;  %v1363_v15 = vadd.f32 %v1269_v1, %v303_v60  ;;  %v246_v16 = vunpack.c.l.bf16 %v190_v6  ;;  %v205_v57 = vld [vmem:[%s1259_s17 + $0x84] sm:$0x7]  ;;  %v200_v63 = vld [vmem:[%s1259_s17 + $0x70] sm:$0xf] }
  0x20   : > { %v1359_v11 = vadd.f32 %v1269_v1, %v299_v5  ;;  %v247_v17 = vunpack.c.l.bf16 %v191_v7  ;;  %v245_v18 = vunpack.c.l.bf16 %v189_v8  ;;  %v1367_v19 = vadd.f32 %v1269_v1, %v300_v3  ;;  %v202_v5 = vld [vmem:[%s1259_s17 + $0x78] sm:$0xf] }
  0x21   : > { %v1370_v20 = vadd.f32 %v1269_v1, %v301_v4  ;;  %v304_v22 = vmul.f32 %v1264_v0, %v244_v14  ;;  %v308_v24 = vmul.f32 %v1264_v0, %v248_v12  ;;  %v309_v25 = vmul.f32 %v1264_v0, %v249_v13  ;;  %v203_v13 = vld [vmem:[%s1259_s17 + $0x7c] sm:$0x7] }
  0x22   : > { %1089 = vrot.lane.b32.xlu1 %v1088_v58, %s1223_s22  ;;  %v1098_v21 = vpack.i.bf16 %v1359_v11, %v1356_v10  ;;  %v305_v23 = vmul.f32 %v1264_v0, %v245_v18  ;;  %v1108_v32 = vpack.i.bf16 %v1363_v15, %v1353_v9  ;;  %v306_v33 = vmul.f32 %v1264_v0, %v246_v16 }
  0x23   : > { %1079 = vrot.lane.b32.xlu0 %v1078_v2, %s1223_s22  ;;  %v307_v34 = vmul.f32 %v1264_v0, %v247_v17  ;;  %v1103_v35 = vpack.i.bf16 %v1370_v20, %v1367_v19  ;;  %v1390_v38 = vadd.f32 %v1269_v1, %v304_v22  ;;  %v250_v45 = vunpack.c.l.bf16 %v194_v29  ;;  %v201_v2 = vld [vmem:[%s1259_s17 + $0x74] sm:$0x7] }
  0x24   : > { %v1393_v39 = vadd.f32 %v1269_v1, %v305_v23  ;;  %v251_v46 = vunpack.c.l.bf16 %v195_v30  ;;  %v1398_v47 = vadd.f32 %v1269_v1, %v308_v24  ;;  %v1401_v48 = vadd.f32 %v1269_v1, %v309_v25 }
  0x25   : > { %v1405_v50 = vadd.f32 %v1269_v1, %v306_v33  ;;  %v1408_v51 = vadd.f32 %v1269_v1, %v307_v34  ;;  %v254_v52 = vunpack.c.l.bf16 %v198_v36  ;;  %v255_v55 = vunpack.c.l.bf16 %v199_v37  ;;  %v210_v37 = vld [vmem:[%s1259_s17 + $0x98] sm:$0xf] }
  0x26   : > { %v252_v58 = vunpack.c.l.bf16 %v196_v40  ;;  %v253_v59 = vunpack.c.l.bf16 %v197_v43  ;;  %v1113_v60 = vpack.i.bf16 %v1393_v39, %v1390_v38  ;;  %v310_v61 = vmul.f32 %v1264_v0, %v250_v45  ;;  %v212_v45 = vld [vmem:[%s1259_s17 + $0xa0] sm:$0xf] }
  0x27   : > { %1099 = vrot.lane.b32.xlu2 %v1098_v21, %s1223_s22  ;;  %v311_v62 = vmul.f32 %v1264_v0, %v251_v46  ;;  %v260_v3 = vunpack.c.l.bf16 %v204_v56  ;;  %v261_v4 = vunpack.c.l.bf16 %v205_v57  ;;  %v1123_v6 = vpack.i.bf16 %v1401_v48, %v1398_v47  ;;  %v206_v56 = vld [vmem:[%s1259_s17 + $0x88] sm:$0xf]  ;;  %v207_v57 = vld [vmem:[%s1259_s17 + $0x8c] sm:$0x7] }
  0x28   : > { %v1118_v7 = vpack.i.bf16 %v1408_v51, %v1405_v50  ;;  %v314_v8 = vmul.f32 %v1264_v0, %v254_v52  ;;  %v315_v12 = vmul.f32 %v1264_v0, %v255_v55  ;;  %v312_v14 = vmul.f32 %v1264_v0, %v252_v58  ;;  %v217_v58 = vld [vmem:[%s1259_s17 + $0xb4] sm:$0x7] }
  0x29   : > { %v313_v16 = vmul.f32 %v1264_v0, %v253_v59  ;;  %v256_v17 = vunpack.c.l.bf16 %v200_v63  ;;  %v257_v18 = vunpack.c.l.bf16 %v201_v2  ;;  %v1431_v21 = vadd.f32 %v1269_v1, %v310_v61  ;;  %v208_v61 = vld [vmem:[%s1259_s17 + $0x90] sm:$0xf] }
  0x2a   : > { %1109 = vrot.lane.b32.xlu1 %v1108_v32, %s1223_s22  ;;  %v1434_v22 = vadd.f32 %v1269_v1, %v311_v62  ;;  %v258_v23 = vunpack.c.l.bf16 %v202_v5  ;;  %v320_v24 = vmul.f32 %v1264_v0, %v260_v3  ;;  %v321_v25 = vmul.f32 %v1264_v0, %v261_v4  ;;  %v219_v62 = vld [vmem:[%s1259_s17 + $0xbc] sm:$0x7]  ;;  %v209_v5 = vld [vmem:[%s1259_s17 + $0x94] sm:$0x7] }
  0x2b   : > { %1104 = vrot.lane.b32.xlu0 %v1103_v35, %s1223_s22  ;;  %v259_v29 = vunpack.c.l.bf16 %v203_v13  ;;  %v1440_v30 = vadd.f32 %v1269_v1, %v314_v8  ;;  %v1443_v32 = vadd.f32 %v1269_v1, %v315_v12  ;;  %v1447_v33 = vadd.f32 %v1269_v1, %v312_v14  ;;  %v215_v14 = vld [vmem:[%s1259_s17 + $0xac] sm:$0x7] }
  0x2c   : > { %v1450_v34 = vadd.f32 %v1269_v1, %v313_v16  ;;  %v316_v35 = vmul.f32 %v1264_v0, %v256_v17  ;;  %v317_v36 = vmul.f32 %v1264_v0, %v257_v18  ;;  %v1128_v40 = vpack.i.bf16 %v1434_v22, %v1431_v21 }
  0x2d   : > { %v318_v43 = vmul.f32 %v1264_v0, %v258_v23  ;;  %v1460_v46 = vadd.f32 %v1269_v1, %v320_v24  ;;  %v1463_v52 = vadd.f32 %v1269_v1, %v321_v25  ;;  %v319_v55 = vmul.f32 %v1264_v0, %v259_v29 }
  0x2e   : > { %v1138_v59 = vpack.i.bf16 %v1443_v32, %v1440_v30  ;;  %v1133_v63 = vpack.i.bf16 %v1450_v34, %v1447_v33  ;;  %v1476_v2 = vadd.f32 %v1269_v1, %v316_v35  ;;  %v1479_v3 = vadd.f32 %v1269_v1, %v317_v36  ;;  %v225_v36 = vld [vmem:[%s1259_s17 + $0xd4] sm:$0x7] }
  0x2f   : > { %1114 = vrot.lane.b32.xlu2 %v1113_v60, %s1223_s22  ;;  %1989 = vst [vmem:[#allocation2_spill] sm:$0xff] %v1460_v46  ;;  %v266_v60 = vunpack.c.l.bf16 %v210_v37  ;;  %v268_v4 = vunpack.c.l.bf16 %v212_v45  ;;  %v262_v8 = vunpack.c.l.bf16 %v206_v56  ;;  %v263_v12 = vunpack.c.l.bf16 %v207_v57 }
  0x30   : > { %1990 = vst [vmem:[#allocation3_spill] sm:$0xff] %v1463_v52  ;;  %v273_v13 = vunpack.c.l.bf16 %v217_v58  ;;  %v1153_v16 = vpack.i.bf16 %v1463_v52, %v1460_v46  ;;  %v1491_v17 = vadd.f32 %v1269_v1, %v319_v55  ;;  %v264_v18 = vunpack.c.l.bf16 %v208_v61  ;;  %v227_v55 = vld [vmem:[%s1259_s17 + $0xdc] sm:$0x7]  ;;  %v214_v58 = vld [vmem:[%s1259_s17 + $0xa8] sm:$0xf] }
  0x31   : > { %v275_v23 = vunpack.c.l.bf16 %v219_v62  ;;  %v326_v24 = vmul.f32 %v1264_v0, %v266_v60  ;;  %v265_v25 = vunpack.c.l.bf16 %v209_v5  ;;  %v1143_v37 = vpack.i.bf16 %v1479_v3, %v1476_v2  ;;  %v211_v46 = vld [vmem:[%s1259_s17 + $0x9c] sm:$0x7] }
  0x32   : > { %1124 = vrot.lane.b32.xlu1 %v1123_v6, %s1223_s22  ;;  %v213_v6 = vld [vmem:[%s1259_s17 + $0xa4] sm:$0x7]  ;;  %1992 = vst [vmem:[#allocation5_spill] sm:$0xff] %v1491_v17  ;;  %v333_v29 = vmul.f32 %v1264_v0, %v273_v13  ;;  %v271_v45 = vunpack.c.l.bf16 %v215_v14  ;;  %v322_v56 = vmul.f32 %v1264_v0, %v262_v8  ;;  %v323_v57 = vmul.f32 %v1264_v0, %v263_v12  ;;  %v222_v12 = vld [vmem:[%s1259_s17 + $0xc8] sm:$0xf] }
  0x33   : > { %1119 = vrot.lane.b32.xlu0 %v1118_v7, %s1223_s22  ;;  %v1485_v7 = vadd.f32 %v1269_v1, %v318_v43  ;;  %v269_v35 = vunpack.c.l.bf16 %v213_v6  ;;  %v335_v43 = vmul.f32 %v1264_v0, %v275_v23  ;;  %v281_v5 = vunpack.c.l.bf16 %v225_v36  ;;  %v224_v23 = vld [vmem:[%s1259_s17 + $0xd0] sm:$0xf] }
  0x34   : > { %v1508_v60 = vadd.f32 %v1269_v1, %v333_v29  ;;  %v324_v6 = vmul.f32 %v1264_v0, %v264_v18  ;;  %v325_v8 = vmul.f32 %v1264_v0, %v265_v25  ;;  %v283_v14 = vunpack.c.l.bf16 %v227_v55  ;;  %v218_v25 = vld [vmem:[%s1259_s17 + $0xb8] sm:$0xf] }
  0x35   : > { %1991 = vst [vmem:[#allocation4_spill] sm:$0xff] %v1485_v7  ;;  %v329_v61 = vmul.f32 %v1264_v0, %v269_v35  ;;  %v1148_v62 = vpack.i.bf16 %v1491_v17, %v1485_v7  ;;  %v270_v29 = vunpack.c.l.bf16 %v214_v58  ;;  %v341_v7 = vmul.f32 %v1264_v0, %v281_v5 }
  0x36   : > { %1993 = vst [vmem:[#allocation6_spill] sm:$0xff] %v1508_v60  ;;  %v1530_v36 = vadd.f32 %v1269_v1, %v322_v56  ;;  %v1533_v18 = vadd.f32 %v1269_v1, %v323_v57  ;;  %v343_v55 = vmul.f32 %v1264_v0, %v283_v14  ;;  %v1539_v58 = vadd.f32 %v1269_v1, %v326_v24 }
  0x37   : > { %1129 = vrot.lane.b32.xlu2 %v1128_v40, %s1223_s22  ;;  %v328_v40 = vmul.f32 %v1264_v0, %v268_v4  ;;  %v331_v4 = vmul.f32 %v1264_v0, %v271_v45  ;;  %v1521_v13 = vadd.f32 %v1269_v1, %v329_v61  ;;  %v220_v45 = vld [vmem:[%s1259_s17 + $0xc0] sm:$0xf]  ;;  %v278_v61 = vunpack.c.l.bf16 %v222_v12  ;;  %v221_v12 = vld [vmem:[%s1259_s17 + $0xc4] sm:$0x7] }
  0x38   : > { %1996 = vst [vmem:[#allocation9_spill] sm:$0xff] %v1539_v58  ;;  %v1549_v56 = vadd.f32 %v1269_v1, %v324_v6  ;;  %v1552_v57 = vadd.f32 %v1269_v1, %v325_v8  ;;  %v1555_v24 = vadd.f32 %v1269_v1, %v343_v55  ;;  %v276_v5 = vunpack.c.l.bf16 %v220_v45  ;;  %v223_v6 = vld [vmem:[%s1259_s17 + $0xcc] sm:$0x7] }
  0x39   : > { %1994 = vst [vmem:[#allocation7_spill] sm:$0xff] %v1521_v13  ;;  %v1158_v14 = vpack.i.bf16 %v1533_v18, %v1530_v36  ;;  %v277_v8 = vunpack.c.l.bf16 %v221_v12  ;;  %v279_v17 = vunpack.c.l.bf16 %v223_v6  ;;  %v338_v55 = vmul.f32 %v1264_v0, %v278_v61 }
  0x3a   : > { %1139 = vrot.lane.b32.xlu1 %v1138_v59, %s1223_s22  ;;  %v216_v59 = vld [vmem:[%s1259_s17 + $0xb0] sm:$0xf]  ;;  %1998 = vst [vmem:[#allocation11_spill] sm:$0xff] %v1549_v56  ;;  %v336_v12 = vmul.f32 %v1264_v0, %v276_v5 }
  0x3b   : > { %1134 = vrot.lane.b32.xlu0 %v1133_v63, %s1223_s22  ;;  %v1514_v63 = vadd.f32 %v1269_v1, %v335_v43  ;;  %v272_v35 = vunpack.c.l.bf16 %v216_v59  ;;  %v1525_v43 = vadd.f32 %v1269_v1, %v331_v4  ;;  %v1542_v59 = vadd.f32 %v1269_v1, %v328_v40  ;;  %1999 = vst [vmem:[#allocation12_spill] sm:$0xff] %v1555_v24 }
  0x3c   : > { %v280_v4 = vunpack.c.l.bf16 %v224_v23  ;;  %v274_v40 = vunpack.c.l.bf16 %v218_v25  ;;  %v1163_v25 = vpack.i.bf16 %v1552_v57, %v1549_v56  ;;  %v339_v45 = vmul.f32 %v1264_v0, %v279_v17 }
  0x3d   : > { %1995 = vst [vmem:[#allocation8_spill] sm:$0xff] %v1525_v43  ;;  %v1168_v23 = vpack.i.bf16 %v1542_v59, %v1539_v58  ;;  %v267_v58 = vunpack.c.l.bf16 %v211_v46  ;;  %v1591_v17 = vadd.f32 %v1269_v1, %v338_v55  ;;  %v1601_v46 = vadd.f32 %v1269_v1, %v336_v12 }
  0x3e   : > { %v334_v52 = vmul.f32 %v1264_v0, %v274_v40 }
  0x3f   : > { %1144 = vrot.lane.b32.xlu2 %v1143_v37, %s1223_s22  ;;  %v1545_v37 = vadd.f32 %v1269_v1, %v341_v7  ;;  %v330_v7 = vmul.f32 %v1264_v0, %v270_v29  ;;  %v340_v29 = vmul.f32 %v1264_v0, %v280_v4 }
  0x40   : > { %v1598_v5 = vadd.f32 %v1269_v1, %v334_v52 }
  0x41   : > { %1997 = vst [vmem:[#allocation10_spill] sm:$0xff] %v1545_v37  ;;  %v1577_v6 = vadd.f32 %v1269_v1, %v330_v7  ;;  %v1594_v40 = vadd.f32 %v1269_v1, %v340_v29  ;;  %v1208_v29 = vpack.i.bf16 %v1555_v24, %v1545_v37 }
  0x42   : > { %1154 = vrot.lane.b32.xlu1 %v1153_v16, %s1223_s22  ;;  %v332_v16 = vmul.f32 %v1264_v0, %v272_v35  ;;  %v337_v35 = vmul.f32 %v1264_v0, %v277_v8  ;;  %v1587_v8 = vadd.f32 %v1269_v1, %v339_v45  ;;  %v1178_v55 = vpack.i.bf16 %v1601_v46, %v1598_v5 }
  0x43   : > { %1149 = vrot.lane.b32.xlu0 %v1148_v62, %s1223_s22  ;;  %v226_v62 = vld [vmem:[%s1259_s17 + $0xd8] sm:$0xf] }
  0x44   : > { %v1580_v61 = vadd.f32 %v1269_v1, %v332_v16  ;;  %v282_v56 = vunpack.c.l.bf16 %v226_v62  ;;  %v1584_v4 = vadd.f32 %v1269_v1, %v337_v35  ;;  %v327_v16 = vmul.f32 %v1264_v0, %v267_v58 }
  0x45   : > { %v1198_v58 = vpack.i.bf16 %v1514_v63, %v1508_v60 }
  0x46   : > { %v1173_v7 = vpack.i.bf16 %v1580_v61, %v1577_v6  ;;  %v1613_v52 = vadd.f32 %v1269_v1, %v327_v16 }
  0x47   : > { %1159 = vrot.lane.b32.xlu2 %v1158_v14, %s1223_s22  ;;  %v342_v14 = vmul.f32 %v1264_v0, %v282_v56  ;;  %v1193_v56 = vpack.i.bf16 %v1525_v43, %v1521_v13 }
  0x49   : > { %v1616_v62 = vadd.f32 %v1269_v1, %v342_v14  ;;  %v1203_v1 = vpack.i.bf16 %v1587_v8, %v1584_v4 }
  0x4a   : > { %1169 = vrot.lane.b32.xlu1 %v1168_v23, %s1223_s22  ;;  %v1183_v23 = vpack.i.bf16 %v1594_v40, %v1591_v17 }
  0x4b   : > { %1164 = vrot.lane.b32.xlu0 %v1163_v25, %s1223_s22  ;;  %v1188_v0 = vpack.i.bf16 %v1613_v52, %v1616_v62  ;;  %v1224_v25 = vmov 0  }
  0x4c   : > { %769 = vst.msk [vmem:[%s1635_s26] sm:$0xf] %vm768_vm0, %v1224_v25 }
  0x4d   : > { %770 = vst.msk [vmem:[%s1635_s26 + $0x4] sm:$0xf] %vm768_vm0, %v1224_v25 }
  0x4e   : > { %772 = vst.msk [vmem:[%s1635_s26 + $0x8] sm:$0x1] %vm771_vm1, %v1224_v25 }
  0x4f   : > { %1174 = vrot.lane.b32.xlu2 %v1173_v7, %s1223_s22  ;;  %773 = vst.msk [vmem:[%s1635_s26 + $0xc] sm:$0xf] %vm768_vm0, %v1224_v25 }
  0x50   : > { %774 = vst.msk [vmem:[%s1635_s26 + $0x10] sm:$0xf] %vm768_vm0, %v1224_v25 }
  0x51   : > { %775 = vst.msk [vmem:[%s1635_s26 + $0x14] sm:$0x1] %vm771_vm1, %v1224_v25 }
  0x52   : > { %1184 = vrot.lane.b32.xlu1 %v1183_v23, %s1223_s22  ;;  %778 = vst.msk [vmem:[%s1635_s26 + $0x20] sm:$0x1] %vm771_vm1, %v1224_v25 }
  0x53   : > { %1179 = vrot.lane.b32.xlu0 %v1178_v55, %s1223_s22  ;;  %781 = vst.msk [vmem:[%s1635_s26 + $0x2c] sm:$0x1] %vm771_vm1, %v1224_v25 }
  0x54   : > { %782 = vst.msk [vmem:[%s1635_s26 + $0x30] sm:$0xf] %vm768_vm0, %v1224_v25 }
  0x55   : > { %783 = vst.msk [vmem:[%s1635_s26 + $0x34] sm:$0xf] %vm768_vm0, %v1224_v25 }
  0x56   : > { %784 = vst.msk [vmem:[%s1635_s26 + $0x38] sm:$0x1] %vm771_vm1, %v1224_v25 }
  0x57   : > { %1189 = vrot.lane.b32.xlu2 %v1188_v0, %s1223_s22  ;;  %787 = vst.msk [vmem:[%s1635_s26 + $0x44] sm:$0x1] %vm771_vm1, %v1224_v25 }
  0x58   : > { %790 = vst.msk [vmem:[%s1635_s26 + $0x50] sm:$0x1] %vm771_vm1, %v1224_v25 }
  0x59   : > { %793 = vst.msk [vmem:[%s1635_s26 + $0x5c] sm:$0x1] %vm771_vm1, %v1224_v25 }
  0x5a   : > { %1199 = vrot.lane.b32.xlu1 %v1198_v58, %s1223_s22  ;;  %796 = vst.msk [vmem:[%s1635_s26 + $0x68] sm:$0x1] %vm771_vm1, %v1224_v25 }
  0x5b   : > { %1194 = vrot.lane.b32.xlu0 %v1193_v56, %s1223_s22  ;;  %799 = vst.msk [vmem:[%s1635_s26 + $0x74] sm:$0x1] %vm771_vm1, %v1224_v25 }
  0x5c   : > { %802 = vst.msk [vmem:[%s1635_s26 + $0x80] sm:$0x1] %vm771_vm1, %v1224_v25 }
  0x5d   : > { %805 = vst.msk [vmem:[%s1635_s26 + $0x8c] sm:$0x1] %vm771_vm1, %v1224_v25 }
  0x5e   : > { %808 = vst.msk [vmem:[%s1635_s26 + $0x98] sm:$0x1] %vm771_vm1, %v1224_v25 }
  0x5f   : > { %1204 = vrot.lane.b32.xlu2 %v1203_v1, %s1223_s22  ;;  %811 = vst.msk [vmem:[%s1635_s26 + $0xa4] sm:$0x1] %vm771_vm1, %v1224_v25 }
  0x60   : > { %814 = vst.msk [vmem:[%s1635_s26 + $0xb0] sm:$0x1] %vm771_vm1, %v1224_v25 }
  0x61   : > { %817 = vst.msk [vmem:[%s1635_s26 + $0xbc] sm:$0x1] %vm771_vm1, %v1224_v25 }
  0x62   : > { %818 = vst.msk [vmem:[%s1635_s26 + $0xc0] sm:$0xf] %vm768_vm0, %v1224_v25 }
  0x63   : > { %1209 = vrot.lane.b32.xlu0 %v1208_v29, %s1223_s22  ;;  %819 = vst.msk [vmem:[%s1635_s26 + $0xc4] sm:$0xf] %vm768_vm0, %v1224_v25 }
  0x64   : > { %820 = vst.msk [vmem:[%s1635_s26 + $0xc8] sm:$0x1] %vm771_vm1, %v1224_v25 }
  0x65   : > { %821 = vst.msk [vmem:[%s1635_s26 + $0xcc] sm:$0xf] %vm768_vm0, %v1224_v25 }
  0x66   : > { %822 = vst.msk [vmem:[%s1635_s26 + $0xd0] sm:$0xf] %vm768_vm0, %v1224_v25 }
  0x67   : > { %823 = vst.msk [vmem:[%s1635_s26 + $0xd4] sm:$0x1] %vm771_vm1, %v1224_v25 }
  0x68   : > { %776 = vst.msk [vmem:[%s1635_s26 + $0x18] sm:$0xf] %vm768_vm0, %v1224_v25 }
  0x69   : > { %777 = vst.msk [vmem:[%s1635_s26 + $0x1c] sm:$0xf] %vm768_vm0, %v1224_v25 }
  0x6a   : > { %779 = vst.msk [vmem:[%s1635_s26 + $0x24] sm:$0xf] %vm768_vm0, %v1224_v25 }
  0x6b   : > { %780 = vst.msk [vmem:[%s1635_s26 + $0x28] sm:$0xf] %vm768_vm0, %v1224_v25 }
  0x6c   : > { %785 = vst.msk [vmem:[%s1635_s26 + $0x3c] sm:$0xf] %vm768_vm0, %v1224_v25 }
  0x6d   : > { %786 = vst.msk [vmem:[%s1635_s26 + $0x40] sm:$0xf] %vm768_vm0, %v1224_v25 }
  0x6e   : > { %788 = vst.msk [vmem:[%s1635_s26 + $0x48] sm:$0xf] %vm768_vm0, %v1224_v25 }
  0x6f   : > { %789 = vst.msk [vmem:[%s1635_s26 + $0x4c] sm:$0xf] %vm768_vm0, %v1224_v25 }
  0x70   : > { %791 = vst.msk [vmem:[%s1635_s26 + $0x54] sm:$0xf] %vm768_vm0, %v1224_v25 }
  0x71   : > { %792 = vst.msk [vmem:[%s1635_s26 + $0x58] sm:$0xf] %vm768_vm0, %v1224_v25 }
  0x72   : > { %794 = vst.msk [vmem:[%s1635_s26 + $0x60] sm:$0xf] %vm768_vm0, %v1224_v25 }
  0x73   : > { %795 = vst.msk [vmem:[%s1635_s26 + $0x64] sm:$0xf] %vm768_vm0, %v1224_v25 }
  0x74   : > { %797 = vst.msk [vmem:[%s1635_s26 + $0x6c] sm:$0xf] %vm768_vm0, %v1224_v25 }
  0x75   : > { %798 = vst.msk [vmem:[%s1635_s26 + $0x70] sm:$0xf] %vm768_vm0, %v1224_v25 }
  0x76   : > { %800 = vst.msk [vmem:[%s1635_s26 + $0x78] sm:$0xf] %vm768_vm0, %v1224_v25 }
  0x77   : > { %801 = vst.msk [vmem:[%s1635_s26 + $0x7c] sm:$0xf] %vm768_vm0, %v1224_v25 }
  0x78   : > { %803 = vst.msk [vmem:[%s1635_s26 + $0x84] sm:$0xf] %vm768_vm0, %v1224_v25 }
  0x79   : > { %v1095_v35 = vpop.permute.xlu2 %1094  ;;  %804 = vst.msk [vmem:[%s1635_s26 + $0x88] sm:$0xf] %vm768_vm0, %v1224_v25 }
  0x7a   : > { %v1097_v45 = vunpack.i.h.bf16 %v1095_v35  ;;  %v1096_v12 = vunpack.i.l.bf16 %v1095_v35  ;;  %806 = vst.msk [vmem:[%s1635_s26 + $0x90] sm:$0xf] %vm768_vm0, %v1224_v25 }
  0x7b   : > { %807 = vst.msk [vmem:[%s1635_s26 + $0x94] sm:$0xf] %vm768_vm0, %v1224_v25 }
  0x7c   : > { %v637_v16 = vmax.f32 %v1331_v54, %v1097_v45  ;;  %v636_v14 = vmax.f32 %v1328_v53, %v1096_v12  ;;  %809 = vst.msk [vmem:[%s1635_s26 + $0x9c] sm:$0xf] %vm768_vm0, %v1224_v25 }
  0x7d   : > { %810 = vst.msk [vmem:[%s1635_s26 + $0xa0] sm:$0xf] %vm768_vm0, %v1224_v25 }
  0x7e   : > { %812 = vst.msk [vmem:[%s1635_s26 + $0xa8] sm:$0xf] %vm768_vm0, %v1224_v25 }
  0x7f   : > { %813 = vst.msk [vmem:[%s1635_s26 + $0xac] sm:$0xf] %vm768_vm0, %v1224_v25 }
  0x80   : > { %815 = vst.msk [vmem:[%s1635_s26 + $0xb4] sm:$0xf] %vm768_vm0, %v1224_v25 }
  0x81   : > { %v1100_v7 = vpop.permute.xlu2 %1099  ;;  %816 = vst.msk [vmem:[%s1635_s26 + $0xb8] sm:$0xf] %vm768_vm0, %v1224_v25 }
  0x82   : > { %v1102_v23 = vunpack.i.h.bf16 %v1100_v7  ;;  %v1101_v55 = vunpack.i.l.bf16 %v1100_v7 }
  0x84   : > { %v639_v0 = vmax.f32 %v1359_v11, %v1102_v23  ;;  %v638_v58 = vmax.f32 %v1356_v10, %v1101_v55 }
  0x86   : > { %v688_v53 = vmax.f32 %v636_v14, %v638_v58  ;;  %v689_v54 = vmax.f32 %v637_v16, %v639_v0 }
  0x88   : > { %v716_v11 = vmax.f32 %v688_v53, 0.0  ;;  %v717_v56 = vmax.f32 %v689_v54, 0.0 }
  0x89   : > { %v1780_v10 = vpop.permute.xlu2 %1114 }
  0x8a   : > { %v744_v1 = vpack.c.bf16 %v716_v11, %v716_v11  ;;  %v745_v29 = vpack.c.bf16 %v717_v56, %v717_v56 }
  0x8c   : > { %v1085_v35 = vpop.permute.xlu1 %1084  ;;  %v863_v45 = vrot.slane %v744_v1, 7  ;;  %v865_v12 = vrot.slane %v745_v29, 7 }
  0x8d   : > { %v1075_v7 = vpop.permute.xlu0 %1074  ;;  %v1087_v55 = vunpack.i.h.bf16 %v1085_v35  ;;  %v1086_v0 = vunpack.i.l.bf16 %v1085_v35 }
  0x8e   : > { %v864_v14 = vrot.slane %v863_v45, 4  ;;  %1035 = vst.msk [vmem:[%s1635_s26 + $0x30] sm:$0xe] %vm940_vm4, %v863_v45  ;;  %v1077_v53 = vunpack.i.h.bf16 %v1075_v7  ;;  %v1076_v54 = vunpack.i.l.bf16 %v1075_v7 }
  0x8f   : > { %v633_v56 = vmax.f32 %v1291_v27, %v1087_v55  ;;  %v632_v1 = vmax.f32 %v1288_v26, %v1086_v0 }
  0x90   : > { %v866_v23 = vsel %vm1791_vm5, %v864_v14, %v865_v12  ;;  %v629_v24 = vmax.f32 %v1299_v31, %v1077_v53  ;;  %v628_v7 = vmax.f32 %v1294_v28, %v1076_v54 }
  0x91   : > { %1036 = vst.msk [vmem:[%s1635_s26 + $0x34] sm:$0xf] %vm768_vm0, %v866_v23  ;;  %v1810_v58 = vpop.permute.xlu2 %1129 }
  0x94   : > { %v1090_v11 = vpop.permute.xlu1 %1089 }
  0x95   : > { %v1092_v29 = vunpack.i.h.bf16 %v1090_v11  ;;  %v1091_v35 = vunpack.i.l.bf16 %v1090_v11  ;;  %v1080_v45 = vpop.permute.xlu0 %1079 }
  0x96   : > { %v1082_v12 = vunpack.i.h.bf16 %v1080_v45  ;;  %v1081_v14 = vunpack.i.l.bf16 %v1080_v45 }
  0x97   : > { %v635_v23 = vmax.f32 %v1314_v42, %v1092_v29  ;;  %v634_v37 = vmax.f32 %v1311_v41, %v1091_v35 }
  0x98   : > { %v631_v13 = vmax.f32 %v1325_v49, %v1082_v12  ;;  %v630_v25 = vmax.f32 %v1318_v44, %v1081_v14  ;;  %v1116_v12 = vunpack.i.l.bf16 %v1780_v10 }
  0x99   : > { %v686_v27 = vmax.f32 %v632_v1, %v634_v37  ;;  %v687_v55 = vmax.f32 %v633_v56, %v635_v23  ;;  %v1829_v11 = vpop.permute.xlu2 %1144 }
  0x9a   : > { %v684_v26 = vmax.f32 %v628_v7, %v630_v25  ;;  %v685_v0 = vmax.f32 %v629_v24, %v631_v13  ;;  %v1117_v13 = vunpack.i.h.bf16 %v1780_v10  ;;  %v1132_v25 = vunpack.i.h.bf16 %v1810_v58 }
  0x9b   : > { %v714_v43 = vmax.f32 %v686_v27, 0.0  ;;  %v715_v45 = vmax.f32 %v687_v55, 0.0  ;;  %v1131_v27 = vunpack.i.l.bf16 %v1810_v58 }
  0x9c   : > { %v712_v60 = vmax.f32 %v684_v26, 0.0  ;;  %v713_v42 = vmax.f32 %v685_v0, 0.0  ;;  %v1110_v29 = vpop.permute.xlu1 %1109  ;;  %v644_v0 = vmax.f32 %v1390_v38, %v1116_v12 }
  0x9d   : > { %v742_v41 = vpack.c.bf16 %v714_v43, %v714_v43  ;;  %v743_v35 = vpack.c.bf16 %v715_v45, %v715_v45  ;;  %v1112_v31 = vunpack.i.h.bf16 %v1110_v29  ;;  %v1111_v53 = vunpack.i.l.bf16 %v1110_v29  ;;  %v1105_v28 = vpop.permute.xlu0 %1104 }
  0x9e   : > { %v740_v49 = vpack.c.bf16 %v712_v60, %v712_v60  ;;  %v741_v54 = vpack.c.bf16 %v713_v42, %v713_v42  ;;  %v1107_v44 = vunpack.i.h.bf16 %v1105_v28  ;;  %v1106_v37 = vunpack.i.l.bf16 %v1105_v28 }
  0x9f   : > { %v859_v24 = vrot.slane %v742_v41, 7  ;;  %v643_v56 = vmax.f32 %v1363_v15, %v1112_v31  ;;  %v642_v1 = vmax.f32 %v1353_v9, %v1111_v53  ;;  %v861_v7 = vrot.slane %v743_v35, 7 }
  0xa0   : > { %v855_v43 = vrot.slane %v740_v49, 7  ;;  %v641_v14 = vmax.f32 %v1370_v20, %v1107_v44  ;;  %v640_v23 = vmax.f32 %v1367_v19, %v1106_v37  ;;  %v857_v55 = vrot.slane %v741_v54, 7 }
  0xa1   : > { %v860_v60 = vrot.slane %v859_v24, 4  ;;  %1033 = vst.msk [vmem:[%s1635_s26 + $0x24] sm:$0xe] %vm940_vm4, %v859_v24  ;;  %v1843_v26 = vpop.permute.xlu2 %1159  ;;  %v645_v20 = vmax.f32 %v1393_v39, %v1117_v13  ;;  %v651_v41 = vmax.f32 %v1434_v22, %v1132_v25  ;;  %v650_v35 = vmax.f32 %v1431_v21, %v1131_v27 }
  0xa2   : > { %v856_v15 = vrot.slane %v855_v43, 4  ;;  %1031 = vst.msk [vmem:[%s1635_s26 + $0x18] sm:$0xe] %vm940_vm4, %v855_v43  ;;  %v691_v9 = vmax.f32 %v641_v14, %v643_v56  ;;  %v690_v10 = vmax.f32 %v640_v23, %v642_v1 }
  0xa3   : > { %v862_v19 = vsel %vm1791_vm5, %v860_v60, %v861_v7 }
  0xa4   : > { %1034 = vst.msk [vmem:[%s1635_s26 + $0x28] sm:$0xf] %vm768_vm0, %v862_v19  ;;  %v858_v58 = vsel %vm1791_vm5, %v856_v15, %v857_v55  ;;  %v719_v45 = vmax.f32 %v691_v9, 0.0  ;;  %v718_v42 = vmax.f32 %v690_v10, 0.0  ;;  %v1125_v29 = vpop.permute.xlu1 %1124 }
  0xa5   : > { %1032 = vst.msk [vmem:[%s1635_s26 + $0x1c] sm:$0xf] %vm768_vm0, %v858_v58  ;;  %v1127_v39 = vunpack.i.h.bf16 %v1125_v29  ;;  %v1126_v31 = vunpack.i.l.bf16 %v1125_v29  ;;  %v1120_v53 = vpop.permute.xlu0 %1119 }
  0xa6   : > { %v747_v28 = vpack.c.bf16 %v719_v45, %v719_v45  ;;  %v746_v38 = vpack.c.bf16 %v718_v42, %v718_v42  ;;  %v1122_v49 = vunpack.i.h.bf16 %v1120_v53  ;;  %v1121_v54 = vunpack.i.l.bf16 %v1120_v53 }
  0xa7   : > { %v649_v44 = vmax.f32 %v1401_v48, %v1127_v39  ;;  %v648_v37 = vmax.f32 %v1398_v47, %v1126_v31  ;;  %v1147_v48 = vunpack.i.h.bf16 %v1829_v11  ;;  %v1162_v39 = vunpack.i.h.bf16 %v1843_v26 }
  0xa8   : > { %v867_v13 = vrot.slane %v746_v38, 7  ;;  %v647_v24 = vmax.f32 %v1408_v51, %v1122_v49  ;;  %v646_v56 = vmax.f32 %v1405_v50, %v1121_v54  ;;  %v869_v1 = vrot.slane %v747_v28, 7 }
  0xa9   : > { %v695_v22 = vmax.f32 %v649_v44, %v651_v41  ;;  %v694_v21 = vmax.f32 %v648_v37, %v650_v35  ;;  %v1863_v23 = vpop.permute.xlu2 %1174  ;;  %v1146_v50 = vunpack.i.l.bf16 %v1829_v11  ;;  %v1161_v38 = vunpack.i.l.bf16 %v1843_v26 }
  0xaa   : > { %v868_v12 = vrot.slane %v867_v13, 4  ;;  %1037 = vst.msk [vmem:[%s1635_s26 + $0x3c] sm:$0xe] %vm940_vm4, %v867_v13  ;;  %v693_v43 = vmax.f32 %v645_v20, %v647_v24  ;;  %v692_v14 = vmax.f32 %v644_v0, %v646_v56  ;;  %v657_v37 = vmax.f32 %v1479_v3, %v1147_v48 }
  0xab   : > { %v723_v60 = vmax.f32 %v695_v22, 0.0  ;;  %v722_v47 = vmax.f32 %v694_v21, 0.0  ;;  %v663_v13 = vmax.f32 %v1533_v18, %v1162_v39  ;;  %v662_v21 = vmax.f32 %v1530_v36, %v1161_v38  ;;  %v2003_v18 = vld [vmem:[#allocation2_spill] sm:$0xff]  ;;  %v2005_v36 = vld [vmem:[#allocation4_spill] sm:$0xff] }
  0xac   : > { %v870_v51 = vsel %vm1791_vm5, %v868_v12, %v869_v1  ;;  %v721_v7 = vmax.f32 %v693_v43, 0.0  ;;  %v720_v25 = vmax.f32 %v692_v14, 0.0  ;;  %v1140_v27 = vpop.permute.xlu1 %1139  ;;  %v1176_v3 = vunpack.i.l.bf16 %v1863_v23 }
  0xad   : > { %1038 = vst.msk [vmem:[%s1635_s26 + $0x40] sm:$0xf] %vm768_vm0, %v870_v51  ;;  %v751_v15 = vpack.c.bf16 %v723_v60, %v723_v60  ;;  %v750_v55 = vpack.c.bf16 %v722_v47, %v722_v47  ;;  %v1142_v9 = vunpack.i.h.bf16 %v1140_v27  ;;  %v1141_v10 = vunpack.i.l.bf16 %v1140_v27  ;;  %v1135_v20 = vpop.permute.xlu0 %1134  ;;  %v2002_v47 = vld [vmem:[#allocation3_spill] sm:$0xff]  ;;  %v2004_v27 = vld [vmem:[#allocation5_spill] sm:$0xff] }
  0xae   : > { %v749_v19 = vpack.c.bf16 %v721_v7, %v721_v7  ;;  %v748_v0 = vpack.c.bf16 %v720_v25, %v720_v25  ;;  %v1137_v58 = vunpack.i.h.bf16 %v1135_v20  ;;  %v1136_v45 = vunpack.i.l.bf16 %v1135_v20 }
  0xaf   : > { %v877_v42 = vrot.slane %v751_v15, 7  ;;  %v875_v29 = vrot.slane %v750_v55, 7  ;;  %v655_v11 = vmax.f32 %v1443_v32, %v1142_v9  ;;  %v654_v41 = vmax.f32 %v1440_v30, %v1141_v10 }
  0xb0   : > { %v871_v35 = vrot.slane %v748_v0, 7  ;;  %v653_v31 = vmax.f32 %v1450_v34, %v1137_v58  ;;  %v652_v53 = vmax.f32 %v1447_v33, %v1136_v45  ;;  %v873_v49 = vrot.slane %v749_v19, 7 }
  0xb1   : > { %v876_v28 = vrot.slane %v875_v29, 4  ;;  %1041 = vst.msk [vmem:[%s1635_s26 + $0x54] sm:$0xe] %vm940_vm4, %v875_v29  ;;  %v1881_v44 = vpop.permute.xlu2 %1189  ;;  %v656_v34 = vmax.f32 %v1476_v2, %v1146_v50  ;;  %v1177_v9 = vunpack.i.h.bf16 %v1863_v23  ;;  %v670_v10 = vmax.f32 %v1577_v6, %v1176_v3 }
  0xb2   : > { %v872_v54 = vrot.slane %v871_v35, 4  ;;  %1039 = vst.msk [vmem:[%s1635_s26 + $0x48] sm:$0xe] %vm940_vm4, %v871_v35  ;;  %v697_v32 = vmax.f32 %v653_v31, %v655_v11  ;;  %v696_v30 = vmax.f32 %v652_v53, %v654_v41  ;;  %v1192_v7 = vunpack.i.h.bf16 %v1881_v44 }
  0xb3   : > { %v878_v33 = vsel %vm1791_vm5, %v876_v28, %v877_v42  ;;  %v1191_v3 = vunpack.i.l.bf16 %v1881_v44 }
  0xb4   : > { %1042 = vst.msk [vmem:[%s1635_s26 + $0x58] sm:$0xf] %vm768_vm0, %v878_v33  ;;  %v874_v26 = vsel %vm1791_vm5, %v872_v54, %v873_v49  ;;  %v725_v24 = vmax.f32 %v697_v32, 0.0  ;;  %v724_v56 = vmax.f32 %v696_v30, 0.0  ;;  %v1155_v22 = vpop.permute.xlu1 %1154  ;;  %v667_v35 = vmax.f32 %v1613_v52, %v1192_v7 }
  0xb5   : > { %1040 = vst.msk [vmem:[%s1635_s26 + $0x4c] sm:$0xf] %vm768_vm0, %v874_v26  ;;  %v1157_v2 = vunpack.i.h.bf16 %v1155_v22  ;;  %v1156_v1 = vunpack.i.l.bf16 %v1155_v22  ;;  %v1150_v12 = vpop.permute.xlu0 %1149  ;;  %v672_v7 = vmax.f32 %v1580_v61, %v1177_v9 }
  0xb6   : > { %v753_v43 = vpack.c.bf16 %v725_v24, %v725_v24  ;;  %v752_v14 = vpack.c.bf16 %v724_v56, %v724_v56  ;;  %v1152_v48 = vunpack.i.h.bf16 %v1150_v12  ;;  %v1151_v60 = vunpack.i.l.bf16 %v1150_v12  ;;  %v2006_v56 = vld [vmem:[#allocation9_spill] sm:$0xff] }
  0xb7   : > { %v661_v51 = vmax.f32 %v2002_v47, %v1157_v2  ;;  %v660_v50 = vmax.f32 %v2003_v18, %v1156_v1  ;;  %v2007_v1 = vld [vmem:[#allocation11_spill] sm:$0xff] }
  0xb8   : > { %v879_v25 = vrot.slane %v752_v14, 7  ;;  %v659_v15 = vmax.f32 %v2004_v27, %v1152_v48  ;;  %v658_v55 = vmax.f32 %v2005_v36, %v1151_v60  ;;  %v881_v0 = vrot.slane %v753_v43, 7 }
  0xb9   : > { %v701_v20 = vmax.f32 %v661_v51, %v663_v13  ;;  %v700_v19 = vmax.f32 %v660_v50, %v662_v21  ;;  %v1205_v29 = vpop.permute.xlu2 %1204 }
  0xba   : > { %v880_v58 = vrot.slane %v879_v25, 4  ;;  %1043 = vst.msk [vmem:[%s1635_s26 + $0x60] sm:$0xe] %vm940_vm4, %v879_v25  ;;  %v699_v45 = vmax.f32 %v657_v37, %v659_v15  ;;  %v698_v42 = vmax.f32 %v656_v34, %v658_v55  ;;  %v1207_v39 = vunpack.i.h.bf16 %v1205_v29 }
  0xbb   : > { %v729_v11 = vmax.f32 %v701_v20, 0.0  ;;  %v728_v41 = vmax.f32 %v700_v19, 0.0  ;;  %v1206_v28 = vunpack.i.l.bf16 %v1205_v29  ;;  %v682_v15 = vmax.f32 %v1616_v62, %v1191_v3  ;;  %v2009_v3 = vld [vmem:[#allocation8_spill] sm:$0xff] }
  0xbc   : > { %v882_v23 = vsel %vm1791_vm5, %v880_v58, %v881_v0  ;;  %v727_v31 = vmax.f32 %v699_v45, 0.0  ;;  %v726_v6 = vmax.f32 %v698_v42, 0.0  ;;  %v1170_v53 = vpop.permute.xlu1 %1169  ;;  %v679_v48 = vmax.f32 %v1587_v8, %v1207_v39 }
  0xbd   : > { %1044 = vst.msk [vmem:[%s1635_s26 + $0x64] sm:$0xf] %vm768_vm0, %v882_v23  ;;  %v757_v38 = vpack.c.bf16 %v729_v11, %v729_v11  ;;  %v756_v49 = vpack.c.bf16 %v728_v41, %v728_v41  ;;  %v1172_v54 = vunpack.i.h.bf16 %v1170_v53  ;;  %v1171_v32 = vunpack.i.l.bf16 %v1170_v53  ;;  %v1165_v30 = vpop.permute.xlu0 %1164 }
  0xbe   : > { %v755_v37 = vpack.c.bf16 %v727_v31, %v727_v31  ;;  %v754_v34 = vpack.c.bf16 %v726_v6, %v726_v6  ;;  %v1167_v33 = vunpack.i.h.bf16 %v1165_v30  ;;  %v1166_v52 = vunpack.i.l.bf16 %v1165_v30 }
  0xbf   : > { %v889_v26 = vrot.slane %v757_v38, 7  ;;  %v887_v13 = vrot.slane %v756_v49, 7  ;;  %v668_v24 = vmax.f32 %v1542_v59, %v1172_v54  ;;  %v666_v22 = vmax.f32 %v2006_v56, %v1171_v32 }
  0xc0   : > { %v883_v21 = vrot.slane %v754_v34, 7  ;;  %v665_v2 = vmax.f32 %v1552_v57, %v1167_v33  ;;  %v664_v12 = vmax.f32 %v2007_v1, %v1166_v52  ;;  %v677_v60 = vmax.f32 %v1584_v4, %v1206_v28  ;;  %v2010_v1 = vld [vmem:[#allocation7_spill] sm:$0xff] }
  0xc1   : > { %v888_v43 = vrot.slane %v887_v13, 4  ;;  %1047 = vst.msk [vmem:[%s1635_s26 + $0x78] sm:$0xe] %vm940_vm4, %v887_v13  ;;  %v704_v14 = vmax.f32 %v668_v24, %v670_v10  ;;  %v885_v59 = vrot.slane %v755_v37, 7  ;;  %v2008_v24 = vld [vmem:[#allocation6_spill] sm:$0xff] }
  0xc2   : > { %v884_v47 = vrot.slane %v883_v21, 4  ;;  %1045 = vst.msk [vmem:[%s1635_s26 + $0x6c] sm:$0xe] %vm940_vm4, %v883_v21  ;;  %v703_v51 = vmax.f32 %v665_v2, %v667_v35  ;;  %v702_v44 = vmax.f32 %v664_v12, %v666_v22  ;;  %v709_v50 = vmax.f32 %v677_v60, %v679_v48 }
  0xc3   : > { %v890_v57 = vsel %vm1791_vm5, %v888_v43, %v889_v26  ;;  %v732_v18 = vmax.f32 %v704_v14, 0.0 }
  0xc4   : > { %1048 = vst.msk [vmem:[%s1635_s26 + $0x7c] sm:$0xf] %vm768_vm0, %v890_v57  ;;  %v886_v8 = vsel %vm1791_vm5, %v884_v47, %v885_v59  ;;  %v731_v25 = vmax.f32 %v703_v51, 0.0  ;;  %v730_v4 = vmax.f32 %v702_v44, 0.0  ;;  %v1185_v27 = vpop.permute.xlu1 %1184  ;;  %v737_v29 = vmax.f32 %v709_v50, 0.0 }
  0xc5   : > { %1046 = vst.msk [vmem:[%s1635_s26 + $0x70] sm:$0xf] %vm768_vm0, %v886_v8  ;;  %v760_v36 = vpack.c.bf16 %v732_v18, %v732_v18  ;;  %v1187_v55 = vunpack.i.h.bf16 %v1185_v27  ;;  %v1186_v10 = vunpack.i.l.bf16 %v1185_v27  ;;  %v1180_v20 = vpop.permute.xlu0 %1179 }
  0xc6   : > { %v759_v19 = vpack.c.bf16 %v731_v25, %v731_v25  ;;  %v758_v61 = vpack.c.bf16 %v730_v4, %v730_v4  ;;  %v1182_v9 = vunpack.i.h.bf16 %v1180_v20  ;;  %v1181_v0 = vunpack.i.l.bf16 %v1180_v20  ;;  %v2011_v4 = vld [vmem:[#allocation12_spill] sm:$0xff] }
  0xc7   : > { %v895_v58 = vrot.slane %v760_v36, 7  ;;  %v680_v45 = vmax.f32 %v1594_v40, %v1187_v55  ;;  %v678_v42 = vmax.f32 %v1591_v17, %v1186_v10  ;;  %v765_v40 = vpack.c.bf16 %v737_v29, %v737_v29 }
  0xc8   : > { %v891_v11 = vrot.slane %v758_v61, 7  ;;  %v676_v62 = vmax.f32 %v1601_v46, %v1182_v9  ;;  %v674_v41 = vmax.f32 %v1598_v5, %v1181_v0  ;;  %v893_v39 = vrot.slane %v759_v19, 7 }
  0xc9   : > { %1051 = vst.msk [vmem:[%s1635_s26 + $0x90] sm:$0xe] %vm940_vm4, %v895_v58  ;;  %v710_v35 = vmax.f32 %v680_v45, %v682_v15  ;;  %v905_v26 = vrot.slane %v765_v40, 7  ;;  %v896_v8 = vrot.slane %v895_v58, 4  ;;  %v2012_v15 = vld [vmem:[#allocation10_spill] sm:$0xff] }
  0xca   : > { %v892_v23 = vrot.slane %v891_v11, 4  ;;  %1049 = vst.msk [vmem:[%s1635_s26 + $0x84] sm:$0xe] %vm940_vm4, %v891_v11  ;;  %v708_v31 = vmax.f32 %v676_v62, %v678_v42  ;;  %v706_v6 = vmax.f32 %v672_v7, %v674_v41 }
  0xcb   : > { %v738_v53 = vmax.f32 %v710_v35, 0.0 }
  0xcc   : > { %v894_v17 = vsel %vm1791_vm5, %v892_v23, %v893_v39  ;;  %v736_v28 = vmax.f32 %v708_v31, 0.0  ;;  %v734_v38 = vmax.f32 %v706_v6, 0.0  ;;  %v1200_v49 = vpop.permute.xlu1 %1199 }
  0xcd   : > { %1050 = vst.msk [vmem:[%s1635_s26 + $0x88] sm:$0xf] %vm768_vm0, %v894_v17  ;;  %v766_v5 = vpack.c.bf16 %v738_v53, %v738_v53  ;;  %v1202_v46 = vunpack.i.h.bf16 %v1200_v49  ;;  %v1201_v54 = vunpack.i.l.bf16 %v1200_v49  ;;  %v1195_v32 = vpop.permute.xlu0 %1194 }
  0xce   : > { %v764_v30 = vpack.c.bf16 %v736_v28, %v736_v28  ;;  %v762_v37 = vpack.c.bf16 %v734_v38, %v734_v38  ;;  %v1197_v34 = vunpack.i.h.bf16 %v1195_v32  ;;  %v1196_v33 = vunpack.i.l.bf16 %v1195_v32 }
  0xcf   : > { %v907_v52 = vrot.slane %v766_v5, 7  ;;  %v675_v13 = vmax.f32 %v1514_v63, %v1202_v46  ;;  %v673_v56 = vmax.f32 %v2008_v24, %v1201_v54 }
  0xd0   : > { %v903_v22 = vrot.slane %v764_v30, 7  ;;  %v899_v21 = vrot.slane %v762_v37, 7  ;;  %v671_v2 = vmax.f32 %v2009_v3, %v1197_v34  ;;  %v669_v12 = vmax.f32 %v2010_v1, %v1196_v33 }
  0xd1   : > { %1057 = vst.msk [vmem:[%s1635_s26 + $0xb4] sm:$0xe] %vm940_vm4, %v907_v52  ;;  %v707_v43 = vmax.f32 %v673_v56, %v675_v13  ;;  %v908_v9 = vrot.slane %v907_v52, 4 }
  0xd2   : > { %v904_v14 = vrot.slane %v903_v22, 4  ;;  %1055 = vst.msk [vmem:[%s1635_s26 + $0xa8] sm:$0xe] %vm940_vm4, %v903_v22  ;;  %v705_v48 = vmax.f32 %v669_v12, %v671_v2  ;;  %v900_v50 = vrot.slane %v899_v21, 4 }
  0xd3   : > { %1053 = vst.msk [vmem:[%s1635_s26 + $0x9c] sm:$0xe] %vm940_vm4, %v899_v21  ;;  %v735_v60 = vmax.f32 %v707_v43, 0.0 }
  0xd4   : > { %v906_v63 = vsel %vm1791_vm5, %v904_v14, %v905_v26  ;;  %v733_v59 = vmax.f32 %v705_v48, 0.0 }
  0xd5   : > { %1056 = vst.msk [vmem:[%s1635_s26 + $0xac] sm:$0xf] %vm768_vm0, %v906_v63  ;;  %v763_v47 = vpack.c.bf16 %v735_v60, %v735_v60  ;;  %v1210_v51 = vpop.permute.xlu0 %1209 }
  0xd6   : > { %v761_v44 = vpack.c.bf16 %v733_v59, %v733_v59  ;;  %v1212_v57 = vunpack.i.h.bf16 %v1210_v51  ;;  %v1211_v18 = vunpack.i.l.bf16 %v1210_v51 }
  0xd7   : > { %v901_v7 = vrot.slane %v763_v47, 7 }
  0xd8   : > { %v897_v25 = vrot.slane %v761_v44, 7  ;;  %v683_v27 = vmax.f32 %v2011_v4, %v1212_v57  ;;  %v681_v36 = vmax.f32 %v2012_v15, %v1211_v18 }
  0xd9   : > { %v902_v55 = vsel %vm1791_vm5, %v900_v50, %v901_v7 }
  0xda   : > { %1054 = vst.msk [vmem:[%s1635_s26 + $0xa0] sm:$0xf] %vm768_vm0, %v902_v55  ;;  %v898_v10 = vsel %vm1791_vm5, %v896_v8, %v897_v25  ;;  %v711_v20 = vmax.f32 %v681_v36, %v683_v27 }
  0xdb   : > { %1052 = vst.msk [vmem:[%s1635_s26 + $0x94] sm:$0xf] %vm768_vm0, %v898_v10 }
  0xdc   : > { %v739_v19 = vmax.f32 %v711_v20, 0.0 }
  0xde   : > { %v767_v61 = vpack.c.bf16 %v739_v19, %v739_v19 }
  0xe0   : > { %v909_v0 = vrot.slane %v767_v61, 7 }
  0xe2   : > { %v910_v58 = vsel %vm1791_vm5, %v908_v9, %v909_v0 }
  0xe3   : > { %1058 = vst.msk [vmem:[%s1635_s26 + $0xb8] sm:$0xf] %vm768_vm0, %v910_v58 }
  0xe4 PF: > { %s13_s12 = sadd.s32 1, %s1221_s12  }
  0xe5   : > { %p10_p4 = scmp.ge.s32.totalorder %s13_s12, 4  }
  0xe7   :  { %12 = sbr.rel (!%p10_p4) target bundleno = 1 (0x1), region = 63 }

// kernel: convnet_forward.8
= control target key start
LH: loop header
LB: loop body
LE: loop exit
PB: predicated region body
PF: predicated region fallthrough
CT: control target
= control target key end

     0   :  { %s525_s12 = smov 0   ;;  %s626_s0 = inlined_call_operand.vmem [shape: bf16[2,14,7,128], index: 0, kind: input, shape index: {}]   ;;  %s627_s1 = inlined_call_operand.vmem [shape: f32[1,128], index: 1, kind: input, shape index: {}]   ;;  %s628_s2 = inlined_call_operand.vmem [shape: f32[1,128], index: 2, kind: input, shape index: {}]   ;;  %s629_s3 = inlined_call_operand.vmem [shape: bf16[2,7,7,64], index: 3, kind: output, shape index: {}]  }
   0x1 LB: > { %s405_s13 = sadd.s32 4294967295, %s502_s12   ;;  %p409_p0 = scmp.ge.s32.totalorder %s502_s12, 1  ;;  %s502_s12 = sphi %s525_s12, %s13_s12  }
   0x2   : > { %p137_p1 = scmp.lt.s32.totalorder %s502_s12, 3 }
   0x4   : > { %p138_p2 = pnand %p409_p0, %p137_p1 }
   0x5   : > { %p161_p3 = scmp.lt.s32.totalorder (!%p138_p2), %s405_s13, 1  ;;  %s504_s22 = smov (!%p138_p2), 64  }
   0x6   : > { %141 = sbr.rel (%p138_p2) target bundleno = 167 (0xa7), region = 32 }
   0xb   : > { %s633_s13 = smov (!%p161_p3, %s405_s13), 1  ;;  %v494_v0 = vld [vmem:[%s627_s1] ss:$0 sm:$0xff]  ;;  %vm326_vm0 = vcmask 519168   ;;  %vm327_vm1 = vsmask.f32 3328 }
   0xc   : > { %s448_s14 = smul.u32 56, %s633_s13  ;;  %v495_v6 = vld [vmem:[%s628_s2] ss:$0 sm:$0xff]  ;;  %vm582_vm2 = vmand %vm326_vm0, %vm327_vm1 }
   0xd   : > { %s449_s23 = smul.u32 28, %s633_s13 }
   0xe   : > { %s165_s17 = scalar_lea.vmem %s626_s0, %s448_s14 }
   0xf   : > { %v415_v1 = vld [vmem:[%s165_s17] sm:$0xff]   ;;  %v443_v2 = vld [vmem:[%s165_s17 + $0x10] sm:$0xff]   ;;  %v442_v3 = vld [vmem:[%s165_s17 + $0x8] sm:$0xff]   ;;  %s579_s26 = scalar_lea.vmem %s629_s3, %s449_s23 }
  0x10   : > { %v416_v4 = vunpack.c.l.bf16 %v415_v1  ;;  %v417_v5 = vunpack.c.h.bf16 %v415_v1  ;;  %v424_v7 = vunpack.c.l.bf16 %v443_v2  ;;  %v425_v8 = vunpack.c.h.bf16 %v443_v2  ;;  %v444_v9 = vld [vmem:[%s165_s17 + $0x18] sm:$0xff]   ;;  %v445_v26 = vld [vmem:[%s165_s17 + $0x20] sm:$0xff]   ;;  %v447_v27 = vld [vmem:[%s165_s17 + $0x30] sm:$0xff]  }
  0x11   : > { %v420_v10 = vunpack.c.l.bf16 %v442_v3  ;;  %v421_v11 = vunpack.c.h.bf16 %v442_v3  ;;  %v428_v12 = vunpack.c.l.bf16 %v444_v9  ;;  %v429_v13 = vunpack.c.h.bf16 %v444_v9  ;;  %v446_v28 = vld [vmem:[%s165_s17 + $0x28] sm:$0xff]   ;;  %v341_v1 = vld [vmem:[%s579_s26 + $0x10] sm:$0xf] }
  0x12   : > { %v203_v14 = vmul.f32 %v494_v0, %v416_v4  ;;  %v204_v15 = vmul.f32 %v494_v0, %v417_v5  ;;  %v207_v16 = vmul.f32 %v494_v0, %v424_v7  ;;  %v208_v17 = vmul.f32 %v494_v0, %v425_v8 }
  0x13   : > { %v205_v18 = vmul.f32 %v494_v0, %v420_v10  ;;  %v206_v19 = vmul.f32 %v494_v0, %v421_v11  ;;  %v209_v20 = vmul.f32 %v494_v0, %v428_v12  ;;  %v210_v21 = vmul.f32 %v494_v0, %v429_v13  ;;  %v344_v12 = vld [vmem:[%s579_s26 + $0x14] sm:$0xf] }
  0x14   : > { %v545_v22 = vadd.f32 %v495_v6, %v203_v14  ;;  %v547_v23 = vadd.f32 %v495_v6, %v204_v15  ;;  %v549_v24 = vadd.f32 %v495_v6, %v207_v16  ;;  %v551_v25 = vadd.f32 %v495_v6, %v208_v17 }
  0x15   : > { %v557_v31 = vadd.f32 %v495_v6, %v205_v18  ;;  %v559_v32 = vadd.f32 %v495_v6, %v206_v19  ;;  %v561_v33 = vadd.f32 %v495_v6, %v209_v20  ;;  %v563_v34 = vadd.f32 %v495_v6, %v210_v21 }
  0x16   : > { %v459_v29 = vpack.i.bf16 %v547_v23, %v545_v22  ;;  %v469_v30 = vpack.i.bf16 %v551_v25, %v549_v24  ;;  %v432_v35 = vunpack.c.l.bf16 %v445_v26  ;;  %v433_v36 = vunpack.c.h.bf16 %v445_v26 }
  0x17   : > { %v440_v37 = vunpack.c.l.bf16 %v447_v27  ;;  %v441_v38 = vunpack.c.h.bf16 %v447_v27  ;;  %v436_v39 = vunpack.c.l.bf16 %v446_v28  ;;  %v437_v40 = vunpack.c.h.bf16 %v446_v28 }
  0x18   : > { %460 = vrot.lane.b32.xlu0 %v459_v29, %s504_s22  ;;  %470 = vrot.lane.b32.xlu1 %v469_v30, %s504_s22  ;;  %v211_v41 = vmul.f32 %v494_v0, %v432_v35  ;;  %v212_v42 = vmul.f32 %v494_v0, %v433_v36  ;;  %v464_v47 = vpack.i.bf16 %v559_v32, %v557_v31 }
  0x19   : > { %v213_v45 = vmul.f32 %v494_v0, %v436_v39  ;;  %v214_v46 = vmul.f32 %v494_v0, %v437_v40  ;;  %v474_v48 = vpack.i.bf16 %v563_v34, %v561_v33  ;;  %v215_v49 = vmul.f32 %v494_v0, %v440_v37  ;;  %v329_v37 = vld [vmem:[%s579_s26] sm:$0xf] }
  0x1a   : > { %v229_v43 = vadd.f32 %v495_v6, %v211_v41  ;;  %v230_v44 = vadd.f32 %v495_v6, %v212_v42  ;;  %v216_v50 = vmul.f32 %v494_v0, %v441_v38  ;;  %v335_v38 = vld [vmem:[%s579_s26 + $0x8] sm:$0xf] }
  0x1b   : > { %v231_v52 = vadd.f32 %v495_v6, %v213_v45  ;;  %v232_v53 = vadd.f32 %v495_v6, %v214_v46  ;;  %v569_v54 = vadd.f32 %v495_v6, %v215_v49 }
  0x1c   : > { %v479_v51 = vpack.i.bf16 %v230_v44, %v229_v43  ;;  %v571_v55 = vadd.f32 %v495_v6, %v216_v50 }
  0x1d   : > { %v484_v56 = vpack.i.bf16 %v232_v53, %v231_v52 }
  0x1e   : > { %480 = vrot.lane.b32.xlu2 %v479_v51, %s504_s22  ;;  %v489_v57 = vpack.i.bf16 %v571_v55, %v569_v54 }
  0x20   : > { %465 = vrot.lane.b32.xlu0 %v464_v47, %s504_s22  ;;  %475 = vrot.lane.b32.xlu1 %v474_v48, %s504_s22 }
  0x26   : > { %485 = vrot.lane.b32.xlu2 %v484_v56, %s504_s22 }
  0x28   : > { %490 = vrot.lane.b32.xlu0 %v489_v57, %s504_s22 }
  0x78   : > { %v481_v58 = vpop.permute.xlu2 %480 }
  0x79   : > { %v483_v59 = vunpack.i.h.bf16 %v481_v58  ;;  %v482_v60 = vunpack.i.l.bf16 %v481_v58 }
  0x7b   : > { %v300_v61 = vmax.f32 %v230_v44, %v483_v59  ;;  %v299_v62 = vmax.f32 %v229_v43, %v482_v60 }
  0x7d   : > { %v309_v63 = vmax.f32 %v299_v62, %v300_v61 }
  0x7f   : > { %v316_v0 = vmax.f32 %v309_v63, 0.0 }
  0x80   : > { %v486_v2 = vpop.permute.xlu2 %485 }
  0x81   : > { %v323_v3 = vpack.c.bf16 %v316_v0, %v316_v0  ;;  %v488_v4 = vunpack.i.h.bf16 %v486_v2  ;;  %v487_v5 = vunpack.i.l.bf16 %v486_v2  ;;  %v347_v0 = vld [vmem:[%s579_s26 + $0x18] sm:$0xf] }
  0x83   : > { %v342_v7 = vsel %vm582_vm2, %v323_v3, %v341_v1  ;;  %v302_v8 = vmax.f32 %v232_v53, %v488_v4  ;;  %v301_v9 = vmax.f32 %v231_v52, %v487_v5  ;;  %v332_v52 = vld [vmem:[%s579_s26 + $0x4] sm:$0xf] }
  0x84   : > { %343 = vst [vmem:[%s579_s26 + $0x10] sm:$0xf] %v342_v7 }
  0x85   : > { %v310_v10 = vmax.f32 %v301_v9, %v302_v8 }
  0x87   : > { %v317_v11 = vmax.f32 %v310_v10, 0.0 }
  0x89   : > { %v324_v15 = vpack.c.bf16 %v317_v11, %v317_v11 }
  0x8a   : > { %v461_v13 = vpop.permute.xlu0 %460  ;;  %v471_v14 = vpop.permute.xlu1 %470 }
  0x8b   : > { %v463_v16 = vunpack.i.h.bf16 %v461_v13  ;;  %v462_v17 = vunpack.i.l.bf16 %v461_v13  ;;  %v473_v18 = vunpack.i.h.bf16 %v471_v14  ;;  %v472_v19 = vunpack.i.l.bf16 %v471_v14 }
  0x8c   : > { %v345_v20 = vsel %vm582_vm2, %v324_v15, %v344_v12 }
  0x8d   : > { %v292_v21 = vmax.f32 %v547_v23, %v463_v16  ;;  %v291_v26 = vmax.f32 %v545_v22, %v462_v17  ;;  %v296_v27 = vmax.f32 %v551_v25, %v473_v18  ;;  %v295_v28 = vmax.f32 %v549_v24, %v472_v19  ;;  %346 = vst [vmem:[%s579_s26 + $0x14] sm:$0xf] %v345_v20 }
  0x8f   : > { %v305_v29 = vmax.f32 %v291_v26, %v292_v21  ;;  %v307_v30 = vmax.f32 %v295_v28, %v296_v27 }
  0x91   : > { %v312_v35 = vmax.f32 %v305_v29, 0.0  ;;  %v314_v36 = vmax.f32 %v307_v30, 0.0 }
  0x92   : > { %v466_v39 = vpop.permute.xlu0 %465  ;;  %v476_v40 = vpop.permute.xlu1 %475 }
  0x93   : > { %v319_v41 = vpack.c.bf16 %v312_v35, %v312_v35  ;;  %v321_v42 = vpack.c.bf16 %v314_v36, %v314_v36  ;;  %v468_v23 = vunpack.i.h.bf16 %v466_v39  ;;  %v467_v22 = vunpack.i.l.bf16 %v466_v39 }
  0x94   : > { %v478_v43 = vunpack.i.h.bf16 %v476_v40  ;;  %v477_v25 = vunpack.i.l.bf16 %v476_v40 }
  0x95   : > { %v330_v24 = vsel %vm582_vm2, %v319_v41, %v329_v37  ;;  %v336_v44 = vsel %vm582_vm2, %v321_v42, %v335_v38  ;;  %v294_v45 = vmax.f32 %v559_v32, %v468_v23  ;;  %v293_v46 = vmax.f32 %v557_v31, %v467_v22  ;;  %v338_v32 = vld [vmem:[%s579_s26 + $0xc] sm:$0xf] }
  0x96   : > { %331 = vst [vmem:[%s579_s26] sm:$0xf] %v330_v24  ;;  %v298_v47 = vmax.f32 %v563_v34, %v478_v43  ;;  %v297_v48 = vmax.f32 %v561_v33, %v477_v25 }
  0x97   : > { %337 = vst [vmem:[%s579_s26 + $0x8] sm:$0xf] %v336_v44  ;;  %v306_v49 = vmax.f32 %v293_v46, %v294_v45 }
  0x98   : > { %v308_v50 = vmax.f32 %v297_v48, %v298_v47 }
  0x99   : > { %v313_v51 = vmax.f32 %v306_v49, 0.0 }
  0x9a   : > { %v315_v53 = vmax.f32 %v308_v50, 0.0  ;;  %v491_v56 = vpop.permute.xlu0 %490 }
  0x9b   : > { %v320_v57 = vpack.c.bf16 %v313_v51, %v313_v51  ;;  %v493_v58 = vunpack.i.h.bf16 %v491_v56  ;;  %v492_v31 = vunpack.i.l.bf16 %v491_v56 }
  0x9c   : > { %v322_v59 = vpack.c.bf16 %v315_v53, %v315_v53 }
  0x9d   : > { %v333_v34 = vsel %vm582_vm2, %v320_v57, %v332_v52  ;;  %v304_v33 = vmax.f32 %v571_v55, %v493_v58  ;;  %v303_v60 = vmax.f32 %v569_v54, %v492_v31 }
  0x9e   : > { %334 = vst [vmem:[%s579_s26 + $0x4] sm:$0xf] %v333_v34  ;;  %v339_v61 = vsel %vm582_vm2, %v322_v59, %v338_v32 }
  0x9f   : > { %340 = vst [vmem:[%s579_s26 + $0xc] sm:$0xf] %v339_v61  ;;  %v311_v62 = vmax.f32 %v303_v60, %v304_v33 }
  0xa1   : > { %v318_v63 = vmax.f32 %v311_v62, 0.0 }
  0xa3   : > { %v325_v1 = vpack.c.bf16 %v318_v63, %v318_v63 }
  0xa5   : > { %v348_v2 = vsel %vm582_vm2, %v325_v1, %v347_v0 }
  0xa6   : > { %349 = vst [vmem:[%s579_s26 + $0x18] sm:$0xf] %v348_v2 }
  0xa7 PF: > { %s13_s12 = sadd.s32 1, %s502_s12  }
  0xa8   : > { %p10_p4 = scmp.ge.s32.totalorder %s13_s12, 4  }
  0xaa   :  { %12 = sbr.rel (!%p10_p4) target bundleno = 1 (0x1), region = 62 }

// kernel: convnet_forward.7
= control target key start
LH: loop header
LB: loop body
LE: loop exit
PB: predicated region body
PF: predicated region fallthrough
CT: control target
= control target key end

     0   :  { %s2631_s12 = smov 0   ;;  %s3220_s0 = inlined_call_operand.vmem [shape: bf16[2,18,18,32], index: 0, kind: input, shape index: {}]   ;;  %s3221_s1 = inlined_call_operand.vmem [shape: bf16[5,160,64], index: 1, kind: input, shape index: {}]   ;;  %s3222_s2 = inlined_call_operand.vmem [shape: bf16[2,14,14,64], index: 2, kind: output, shape index: {0}]   ;;  %s3223_s3 = inlined_call_operand.vmem [shape: f32[2,2,64], index: 3, kind: output, shape index: {1}]  }
   0x1 LB: > { %s2061_s13 = sadd.s32 4294967295, %s2594_s12   ;;  %p2065_p0 = scmp.ge.s32.totalorder %s2594_s12, 1  ;;  %s2594_s12 = sphi %s2631_s12, %s14_s12  }
   0x2   : > { %p140_p1 = scmp.lt.s32.totalorder %s2594_s12, 3 }
   0x4   : > { %p141_p2 = pnand %p2065_p0, %p140_p1 }
   0x5   : > { %p168_p3 = scmp.lt.s32.totalorder (!%p141_p2), %s2061_s13, 1  ;;  %s2658_s26 = smov (!%p141_p2), 0  }
   0x6   : > { %144 = sbr.rel (%p141_p2) target bundleno = 460 (0x1cc), region = 28 }
   0xb   : > { %s3227_s13 = smov (!%p168_p3, %s2061_s13), 1  ;;  %v2654_v0 = vmov 0.0   ;;  %v2656_v1 = vmov 0.0  }
   0xc   : > { %s2524_s14 = smul.u32 216, %s3227_s13  ;;  %s2068_s15 = sshll.u32 %s3227_s13, 1 }
   0xd   : > { %s2525_s16 = smul.u32 112, %s3227_s13  ;;  %s2642_s19 = scalar_lea.vmem %s3223_s3, %s2068_s15 }
   0xe   : > { %s2647_s22 = scalar_lea.vmem %s3220_s0, %s2524_s14 }
   0xf   : > { %s2652_s25 = scalar_lea.vmem %s3222_s2, %s2525_s16 }
  0x10 LB: >> { %s2422_s27 = smul.u32 24, %s2606_s26  ;;  %vm296_vm0 = vcmask 1045504   ;;  %s2608_s29 = smov 32   ;;  %vm259_vm1 = vsmask.f32 6400  ;;  %vm303_vm2 = vcmask 261120   ;;  %s2606_s26 = sphi %s2658_s26, %s188_s26   ;;  %v2602_v1 = vphi %v2656_v1, %v3225_v1   ;;  %v2598_v0 = vphi %v2654_v0, %v3224_v0  }
  0x11   : >> { %s2609_s30 = smov 96   ;;  %s2610_s4 = smov 64   ;;  %vm310_vm3 = vcmask 523264   ;;  %vm315_vm4 = vcmask 785408   ;;  %vm322_vm5 = vcmask 1040384   ;;  %vm325_vm6 = vcmask 1041409  }
  0x12   : >> { %s2671_s28 = scalar_lea.vmem %s2647_s22, %s2422_s27  ;;  %vm329_vm7 = vcmask 1042434   ;;  %vm333_vm8 = vcmask 1043459   ;;  %vm337_vm9 = vcmask 1044484   ;;  %vm341_vm10 = vcmask 1045509   ;;  %s2474_s23 = sshll.u32 %s2606_s26, 4 }
  0x13   : >> { %v2495_v2 = vld [vmem:[%s2671_s28 + $0x18] sm:$0xff]   ;;  %v2074_v3 = vld [vmem:[%s2671_s28 + $0xc] sm:$0xff]   ;;  %v2082_v10 = vld [vmem:[%s2671_s28 + $0x14] sm:$0x1]  ;;  %vm345_vm11 = vcmask 1046534   ;;  %s3184_s24 = scalar_lea.vmem %s2652_s25, %s2474_s23  ;;  %vm1903_vm12 = vcmask 519168  }
  0x14   : >> { %v2676_v4 = vld [vmem:[%s2671_s28 + $0xc] sm:$0xf]   ;;  %v429_v6 = vshrl.u32 %v2495_v2, 16  ;;  %v431_v7 = vshll.u32 %v2495_v2, 16  ;;  %v417_v8 = vunpack.c.h.b16 %v2074_v3  ;;  %v453_v13 = vunpack.c.l.b16 %v2082_v10  ;;  %v205_v14 = vld [vmem:[%s2671_s28] sm:$0xc] }
  0x15   : >> { %v2084_v5 = vld [vmem:[%s2671_s28 + $0xc] sm:$0xc]  ;;  %v2685_v19 = vld [vmem:[%s2671_s28] sm:$0xff]   ;;  %v422_v22 = vshrl.u32 %v2074_v3, 16  ;;  %v424_v23 = vshll.u32 %v2074_v3, 16  ;;  %v292_v24 = vunpack.c.l.b16 %v205_v14  ;;  %v2696_v37 = vunpack.c.h.b16 %v2495_v2  ;;  %s188_s26 = sadd.s32 1, %s2606_s26  }
  0x16   : >> { %v2080_v9 = vld [vmem:[%s2671_s28 + $0xc] sm:$0xe]  ;;  %v489_v11 = vunpack.c.l.b16 %v2084_v5  ;;  %v433_v15 = vrot.slane %v431_v7, 1  ;;  %v455_v18 = vpack.c.b16 %v453_v13, %v453_v13  ;;  %v201_v20 = vld [vmem:[%s2671_s28] sm:$0xe]  ;;  %v2478_v31 = vunpack.c.h.b16 %v2685_v19  ;;  %p185_p4 = scmp.ge.s32.totalorder %s188_s26, 7  }
  0x17   : >> { %v441_v12 = vunpack.c.l.b16 %v2080_v9  ;;  %v426_v29 = vrot.slane %v424_v23, 1  ;;  %v243_v32 = vunpack.c.l.b16 %v201_v20  ;;  %v2081_v33 = vld [vmem:[%s2671_s28 + $0x18] sm:$0xe]  ;;  %v203_v41 = vld [vmem:[%s2671_s28 + $0x8] sm:$0x1]  ;;  %v226_v48 = vshll.u32 %v2685_v19, 16 }
  0x18   : >> { %v491_v16 = vpack.c.b16 %v417_v8, %v489_v11  ;;  %v2688_v21 = vor.u32 %v433_v15, %v429_v6  ;;  %v466_v28 = vshll.u32 %v455_v18, 16  ;;  %v494_v30 = vrot.slane %v455_v18, 2  ;;  %v2085_v38 = vld [vmem:[%s2671_s28 + $0x18] sm:$0xc]  ;;  %v2083_v51 = vld [vmem:[%s2671_s28 + $0x20] sm:$0x1] }
  0x19   : >> { %v2682_v17 = vpack.c.b16 %v417_v8, %v441_v12  ;;  %v427_v39 = vor.u32 %v426_v29, %v422_v22  ;;  %v294_v43 = vpack.c.b16 %v2478_v31, %v292_v24  ;;  %v442_v44 = vunpack.c.l.b16 %v2081_v33  ;;  %v2709_v52 = vld [vmem:[%s2671_s28 + $0xc] sm:$0xff]   ;;  %v2202_v63 = vld [vmem:[%s2671_s28 + $0x18] sm:$0xc] }
  0x1a   : >> { %v493_v25 = vrot.slane %v491_v16, 2  ;;  %437 = vrot.lane.b32.xlu1 %v2688_v21, %s2608_s29  ;;  %v468_v36 = vrot.slane %v466_v28, 2  ;;  %v245_v45 = vpack.c.b16 %v2478_v31, %v243_v32  ;;  %v490_v46 = vunpack.c.l.b16 %v2085_v38  ;;  %v2712_v53 = vld [vmem:[%s2671_s28 + $0xc] sm:$0xf]   ;;  %v2200_v16 = vld [vmem:[%s2671_s28 + $0x20] sm:$0x1] }
  0x1b   : >> { %v458_v26 = vshrl.u32 %v2682_v17, 16  ;;  %v461_v27 = vshll.u32 %v2682_v17, 16  ;;  %435 = vrot.lane.b32.xlu0 %v427_v39, %s2608_s29  ;;  %v444_v49 = vpack.c.b16 %v2696_v37, %v442_v44  ;;  %v255_v50 = vunpack.c.l.b16 %v203_v41  ;;  %v202_v54 = vld [vmem:[%s2671_s28 + $0xc] sm:$0xe]  ;;  %v2198_v28 = vld [vmem:[%s2671_s28 + $0x18] sm:$0xe] }
  0x1c   : >> { %v2700_v40 = vsel %vm296_vm0, %v493_v25, %v494_v30  ;;  %v297_v55 = vrot.slane %v294_v43, 2  ;;  %v492_v57 = vpack.c.b16 %v2696_v37, %v490_v46  ;;  %v445_v59 = vrot.slane %v2682_v17, 1  ;;  %v206_v3 = vld [vmem:[%s2671_s28 + $0xc] sm:$0xc]  ;;  %v204_v38 = vld [vmem:[%s2671_s28 + $0x14] sm:$0x1] }
  0x1d   : >> { %v460_v34 = vrot.slane %v458_v26, 1  ;;  %v463_v35 = vrot.slane %v461_v27, 2  ;;  %v446_v56 = vrot.slane %v444_v49, 1  ;;  %v257_v58 = vpack.c.b16 %v255_v50, %v255_v50 }
  0x1e   : >> { %v247_v60 = vrot.slane %v245_v45, 1  ;;  %v224_v61 = vshrl.u32 %v2685_v19, 16  ;;  %v454_v62 = vunpack.c.l.b16 %v2083_v51  ;;  %v228_v2 = vrot.slane %v226_v48, 1 }
  0x1f   : >> { %v464_v42 = vor.u32 %v463_v35, %v460_v34  ;;  %449 = vrot.lane.b32.xlu2 %v446_v56, %s2610_s4  ;;  %v220_v5 = vunpack.c.h.b16 %v2709_v52  ;;  %v244_v6 = vunpack.c.l.b16 %v202_v54  ;;  %v298_v7 = vrot.slane %v257_v58, 2  ;;  %v2747_v54 = vld [vmem:[%s2671_s28 + $0x24] sm:$0xff]  }
  0x20   : >> { %v261_v8 = vshrl.u32 %v245_v45, 16  ;;  %v456_v9 = vpack.c.b16 %v454_v62, %v454_v62  ;;  %v471_v10 = vshrl.u32 %v444_v49, 16  ;;  %v474_v11 = vshll.u32 %v444_v49, 16  ;;  %v2751_v56 = vld [vmem:[%s2671_s28 + $0x24] sm:$0xff]  }
  0x21   : >> { %v469_v47 = vsel %vm259_vm1, %v464_v42, %v468_v36  ;;  %v496_v12 = vrot.slane %v492_v57, 2  ;;  %v264_v13 = vshll.u32 %v245_v45, 16  ;;  %v2724_v14 = vsel %vm296_vm0, %v297_v55, %v298_v7  ;;  %v2278_v57 = vld [vmem:[%s2671_s28 + $0x24] sm:$0xc] }
  0x22   : >> { %483 = vrot.lane.b32.xlu1 %v469_v47, %s2609_s30  ;;  %v958_v15 = vunpack.c.l.b16 %v2202_v63  ;;  %v293_v17 = vunpack.c.l.b16 %v206_v3  ;;  %v473_v18 = vrot.slane %v471_v10, 1  ;;  %v476_v19 = vrot.slane %v474_v11, 2  ;;  %v2276_v63 = vld [vmem:[%s2671_s28 + $0x2c] sm:$0x1] }
  0x23   : >> { %447 = vrot.lane.b32.xlu0 %v445_v59, %s2610_s4  ;;  %v479_v20 = vshll.u32 %v456_v9, 16  ;;  %v229_v22 = vor.u32 %v228_v2, %v224_v61  ;;  %v246_v23 = vpack.c.b16 %v220_v5, %v244_v6  ;;  %v497_v24 = vrot.slane %v456_v9, 2  ;;  %v2199_v59 = vld [vmem:[%s2671_s28 + $0x24] sm:$0xe] }
  0x24   : >> { %v960_v25 = vpack.c.b16 %v2696_v37, %v958_v15  ;;  %v477_v26 = vor.u32 %v476_v19, %v473_v18  ;;  %v922_v29 = vunpack.c.l.b16 %v2200_v16  ;;  %v263_v30 = vrot.slane %v261_v8, 1  ;;  %v2203_v6 = vld [vmem:[%s2671_s28 + $0x24] sm:$0xc] }
  0x25   : >> { %v481_v27 = vrot.slane %v479_v20, 2  ;;  %v266_v31 = vrot.slane %v264_v13, 2  ;;  %v269_v32 = vshll.u32 %v257_v58, 16  ;;  %v2731_v33 = vsel %vm296_vm0, %v496_v12, %v497_v24 }
  0x26   : >> { %v962_v35 = vrot.slane %v960_v25, 2  ;;  %v2735_v36 = vpack.c.b16 %v922_v29, %v922_v29  ;;  %v295_v39 = vpack.c.b16 %v220_v5, %v293_v17  ;;  %v910_v41 = vunpack.c.l.b16 %v2198_v28 }
  0x27   : >> { %v482_v34 = vsel %vm259_vm1, %v477_v26, %v481_v27  ;;  %v231_v42 = vshrl.u32 %v2709_v52, 16  ;;  %v233_v43 = vshll.u32 %v2709_v52, 16  ;;  %v267_v45 = vor.u32 %v266_v31, %v263_v30 }
  0x28   : >> { %485 = vrot.lane.b32.xlu2 %v482_v34, %s2609_s30  ;;  %v963_v44 = vrot.slane %v2735_v36, 2  ;;  %v271_v46 = vrot.slane %v269_v32, 2  ;;  %v256_v47 = vunpack.c.l.b16 %v204_v38  ;;  %v248_v48 = vrot.slane %v246_v23, 1  ;;  %v2201_v34 = vld [vmem:[%s2671_s28 + $0x2c] sm:$0x1] }
  0x29   : >> { %v235_v49 = vrot.slane %v233_v43, 1  ;;  %v274_v51 = vshrl.u32 %v246_v23, 16  ;;  %v300_v55 = vrot.slane %v295_v39, 2  ;;  %v912_v52 = vpack.c.b16 %v2696_v37, %v910_v41  ;;  %v2274_v38 = vld [vmem:[%s2671_s28 + $0x24] sm:$0xe]  ;;  %v2789_v39 = vld [vmem:[%s2671_s28 + $0x30] sm:$0xff]  }
  0x2a   : >> { %249 = vrot.lane.b32.xlu1 %v247_v60, %s2610_s4  ;;  %v2744_v50 = vsel %vm296_vm0, %v962_v35, %v963_v44  ;;  %v258_v60 = vpack.c.b16 %v256_v47, %v256_v47  ;;  %v277_v62 = vshll.u32 %v246_v23, 16  ;;  %v272_v2 = vsel %vm259_vm1, %v267_v45, %v271_v46  ;;  %v2279_v45 = vld [vmem:[%s2671_s28 + $0x30] sm:$0xc] }
  0x2b   : >> { %237 = vrot.lane.b32.xlu0 %v229_v22, %s2608_s29  ;;  %v236_v58 = vor.u32 %v235_v49, %v231_v42  ;;  %v276_v61 = vrot.slane %v274_v51, 1  ;;  %v927_v3 = vshrl.u32 %v912_v52, 16  ;;  %v2758_v5 = vunpack.c.h.b16 %v2747_v54 }
  0x2c   : >> { %v279_v7 = vrot.slane %v277_v62, 2  ;;  %v282_v37 = vshll.u32 %v258_v60, 16  ;;  %v301_v8 = vrot.slane %v258_v60, 2  ;;  %v1290_v9 = vunpack.c.l.b16 %v2278_v57 }
  0x2d   : >> { %v930_v10 = vshll.u32 %v912_v52, 16  ;;  %v887_v11 = vunpack.c.h.b16 %v2751_v56  ;;  %v911_v12 = vunpack.c.l.b16 %v2199_v59  ;;  %v1254_v13 = vunpack.c.l.b16 %v2276_v63 }
  0x2e   : >> { %v280_v15 = vor.u32 %v279_v7, %v276_v61  ;;  %v284_v16 = vrot.slane %v282_v37, 2  ;;  %v2765_v17 = vsel %vm296_vm0, %v300_v55, %v301_v8  ;;  %v1292_v18 = vpack.c.b16 %v2758_v5, %v1290_v9  ;;  %v2352_v55 = vld [vmem:[%s2671_s28 + $0x38] sm:$0x1] }
  0x2f   : >> { %v959_v19 = vunpack.c.l.b16 %v2203_v6  ;;  %v914_v20 = vrot.slane %v912_v52, 1  ;;  %v2769_v23 = vpack.c.b16 %v1254_v13, %v1254_v13  ;;  %v929_v24 = vrot.slane %v927_v3, 1  ;;  %v2275_v13 = vld [vmem:[%s2671_s28 + $0x30] sm:$0xe] }
  0x30   : >> { %239 = vrot.lane.b32.xlu2 %v236_v58, %s2608_s29  ;;  %v1294_v22 = vrot.slane %v1292_v18, 2  ;;  %v935_v25 = vshll.u32 %v2735_v36, 16  ;;  %v1210_v26 = vunpack.c.l.b16 %v2751_v56  ;;  %v932_v27 = vrot.slane %v930_v10, 2  ;;  %v2354_v58 = vld [vmem:[%s2671_s28 + $0x30] sm:$0xc]  ;;  %v2467_v56 = vld [vmem:[%s3221_s1 + $0x160] sm:$0xff] }
  0x31   : >> { %v913_v28 = vpack.c.b16 %v887_v11, %v911_v12  ;;  %v285_v29 = vsel %vm259_vm1, %v280_v15, %v284_v16  ;;  %v1295_v30 = vrot.slane %v2769_v23, 2  ;;  %v961_v31 = vpack.c.b16 %v887_v11, %v959_v19 }
  0x32   : >> { %251 = vrot.lane.b32.xlu1 %v248_v48, %s2610_s4  ;;  %v880_v32 = vunpack.c.l.b16 %v2747_v54  ;;  %v2785_v36 = vpack.c.b16 %v2758_v5, %v1210_v26  ;;  %v933_v42 = vor.u32 %v932_v27, %v929_v24  ;;  %v937_v43 = vrot.slane %v935_v25, 2  ;;  %v2818_v24 = vld [vmem:[%s2671_s28 + $0x3c] sm:$0xf]  }
  0x33   : >> { %286 = vrot.lane.b32.xlu0 %v272_v2, %s2609_s30  ;;  %v2779_v35 = vsel %vm296_vm0, %v1294_v22, %v1295_v30  ;;  %v915_v44 = vrot.slane %v913_v28, 1  ;;  %v923_v46 = vunpack.c.l.b16 %v2201_v34  ;;  %v965_v47 = vrot.slane %v961_v31, 2  ;;  %v2815_v22 = vld [vmem:[%s2671_s28 + $0x3c] sm:$0xff]  }
  0x34   : >> { %v889_v41 = vpack.c.b16 %v887_v11, %v880_v32  ;;  %v940_v51 = vshrl.u32 %v913_v28, 16  ;;  %v1242_v52 = vunpack.c.l.b16 %v2274_v38  ;;  %v2798_v57 = vunpack.c.h.b16 %v2789_v39  ;;  %v2355_v34 = vld [vmem:[%s2671_s28 + $0x3c] sm:$0xc]  ;;  %v2277_v38 = vld [vmem:[%s2671_s28 + $0x38] sm:$0x1] }
  0x35   : >> { %v925_v59 = vpack.c.b16 %v923_v46, %v923_v46  ;;  %v943_v60 = vshll.u32 %v913_v28, 16  ;;  %v1225_v61 = vshll.u32 %v2785_v36, 16  ;;  %v1622_v63 = vunpack.c.l.b16 %v2354_v58 }
  0x36   : >> { %v898_v48 = vshrl.u32 %v889_v41, 16  ;;  %v900_v49 = vshll.u32 %v889_v41, 16  ;;  %v1586_v2 = vunpack.c.l.b16 %v2352_v55  ;;  %v1291_v3 = vunpack.c.l.b16 %v2279_v45 }
  0x37   : >> { %v942_v6 = vrot.slane %v940_v51, 1  ;;  %v945_v7 = vrot.slane %v943_v60, 2  ;;  %v948_v37 = vshll.u32 %v925_v59, 16  ;;  %v1624_v8 = vpack.c.b16 %v2798_v57, %v1622_v63 }
  0x38   : >> { %288 = vrot.lane.b32.xlu2 %v285_v29, %s2609_s30  ;;  %v902_v62 = vrot.slane %v900_v49, 1  ;;  %v966_v9 = vrot.slane %v925_v59, 2  ;;  %v2803_v10 = vpack.c.b16 %v1586_v2, %v1586_v2  ;;  %v1244_v11 = vpack.c.b16 %v2758_v5, %v1242_v52 }
  0x39   : >> { %v938_v12 = vsel %vm259_vm1, %v933_v42, %v937_v43  ;;  %v1626_v15 = vrot.slane %v1624_v8, 2  ;;  %v946_v19 = vor.u32 %v945_v7, %v942_v6  ;;  %v1223_v5 = vshrl.u32 %v2785_v36, 16  ;;  %v2353_v36 = vld [vmem:[%s2671_s28 + $0x44] sm:$0x1] }
  0x3a   : >> { %916 = vrot.lane.b32.xlu1 %v914_v20, %s2610_s4  ;;  %v2811_v16 = vsel %vm296_vm0, %v965_v47, %v966_v9  ;;  %v1627_v18 = vrot.slane %v2803_v10, 2  ;;  %v950_v20 = vrot.slane %v948_v37, 2  ;;  %v1227_v25 = vrot.slane %v1225_v61, 1  ;;  %v2350_v61 = vld [vmem:[%s2671_s28 + $0x30] sm:$0xe]  ;;  %v2439_v9 = vld [vmem:[%s3221_s1 + $0x80] sm:$0xff] }
  0x3b   : >> { %904 = vrot.lane.b32.xlu0 %v2688_v21, %s2608_s29  ;;  %v903_v21 = vor.u32 %v902_v62, %v898_v48  ;;  %v1293_v27 = vpack.c.b16 %v2798_v57, %v1291_v3  ;;  %v1246_v29 = vrot.slane %v1244_v11, 1  ;;  %v1259_v30 = vshrl.u32 %v1244_v11, 16  ;;  %v2440_v3 = vld [vmem:[%s3221_s1 + $0x88] sm:$0xff] }
  0x3c   : >> { %v2823_v28 = vsel %vm296_vm0, %v1626_v15, %v1627_v18  ;;  %v1243_v31 = vunpack.c.l.b16 %v2275_v13  ;;  %v1262_v41 = vshll.u32 %v1244_v11, 16  ;;  %v1551_v42 = vunpack.c.h.b16 %v2815_v22  ;;  %679 = vmatpush.bf16.msra.mxu0 %v2440_v3 }
  0x3d   : >> { %v1623_v43 = vunpack.c.l.b16 %v2355_v34  ;;  %v951_v45 = vsel %vm259_vm1, %v946_v19, %v950_v20  ;;  %v1587_v46 = vunpack.c.l.b16 %v2353_v36  ;;  %v1297_v47 = vrot.slane %v1293_v27, 2 }
  0x3e   : >> { %v1557_v48 = vshll.u32 %v2789_v39, 16  ;;  %v1228_v55 = vor.u32 %v1227_v25, %v1223_v5  ;;  %v1261_v52 = vrot.slane %v1259_v30, 1  ;;  %v1267_v58 = vshll.u32 %v2769_v23, 16 }
  0x3f   : >> { %v1625_v49 = vpack.c.b16 %v1551_v42, %v1623_v43  ;;  %v1245_v59 = vpack.c.b16 %v2798_v57, %v1243_v31  ;;  %v1264_v60 = vrot.slane %v1262_v41, 2  ;;  %v1589_v2 = vpack.c.b16 %v1587_v46, %v1587_v46 }
  0x40   : >> { %906 = vrot.lane.b32.xlu2 %v903_v21, %s2608_s29  ;;  %v1555_v37 = vshrl.u32 %v2789_v39, 16  ;;  %v1559_v21 = vrot.slane %v1557_v48, 1  ;;  %v1269_v15 = vrot.slane %v1267_v58, 2  ;;  %680 = vmatpush.bf16.msra.mxu0 %v2439_v9  ;;  %v1562_v48 = vshrl.u32 %v2815_v22, 16  ;;  %v2429_v9 = vld [vmem:[%s3221_s1 + $0x30] sm:$0xff] }
  0x41   : >> { %v1629_v62 = vrot.slane %v1625_v49, 2  ;;  %v1272_v6 = vshrl.u32 %v1245_v59, 16  ;;  %v1275_v7 = vshll.u32 %v1245_v59, 16  ;;  %v1630_v8 = vrot.slane %v1589_v2, 2 }
  0x42   : >> { %918 = vrot.lane.b32.xlu1 %v915_v44, %s2610_s4  ;;  %v1255_v44 = vunpack.c.l.b16 %v2277_v38  ;;  %v1247_v11 = vrot.slane %v1245_v59, 1  ;;  %v1265_v13 = vor.u32 %v1264_v60, %v1261_v52  ;;  %v1560_v5 = vor.u32 %v1559_v21, %v1555_v37  ;;  %v2430_v37 = vld [vmem:[%s3221_s1 + $0x38] sm:$0xff] }
  0x43   : >> { %952 = vrot.lane.b32.xlu0 %v938_v12, %s2609_s30  ;;  %v1574_v12 = vunpack.c.l.b16 %v2350_v61  ;;  %v2849_v18 = vsel %vm296_vm0, %v1629_v62, %v1630_v8  ;;  %v1274_v39 = vrot.slane %v1272_v6, 1  ;;  %v1277_v19 = vrot.slane %v1275_v7, 2  ;;  %v2437_v6 = vld [vmem:[%s3221_s1 + $0x70] sm:$0xff]  ;;  %v2436_v7 = vld [vmem:[%s3221_s1 + $0x68] sm:$0xff]  ;;  %820 = vmatpush.bf16.msra.mxu2 %v2430_v37  ;;  %v2435_v8 = vld [vmem:[%s3221_s1 + $0x60] sm:$0xff] }
  0x44   : >> { %v1257_v51 = vpack.c.b16 %v1255_v44, %v1255_v44  ;;  %v1270_v27 = vsel %vm259_vm1, %v1265_v13, %v1269_v15  ;;  %v1564_v44 = vshll.u32 %v2815_v22, 16  ;;  %v2434_v13 = vld [vmem:[%s3221_s1 + $0x58] sm:$0xff]  ;;  %v2424_v37 = vld [vmem:[%s3221_s1 + $0x8] sm:$0xff]  ;;  %vm1905_vm13 = vcmask 518144  }
  0x45   : >> { %v1576_v25 = vpack.c.b16 %v2798_v57, %v1574_v12  ;;  %v1278_v30 = vor.u32 %v1277_v19, %v1274_v39  ;;  %v1599_v57 = vshll.u32 %v2803_v10, 16  ;;  %v2520_v12 = vld [vmem:[%s2671_s28 + $0x18] sm:$0x70]  ;;  %v2428_v39 = vld [vmem:[%s3221_s1 + $0x28] sm:$0xff]  ;;  %vm1941_vm14 = vcmask (%p185_p4), 516096  }
  0x46   : >> { %v1298_v63 = vrot.slane %v1257_v51, 2  ;;  %v1280_v20 = vshll.u32 %v1257_v51, 16  ;;  %v1566_v49 = vrot.slane %v1564_v44, 1  ;;  %v2442_v15 = vld [vmem:[%s3221_s1 + $0x98] sm:$0xff] }
  0x47   : >> { %v1578_v34 = vrot.slane %v1576_v25, 1  ;;  %v1591_v41 = vshrl.u32 %v1576_v25, 16  ;;  %v1594_v43 = vshll.u32 %v1576_v25, 16  ;;  %v1601_v59 = vrot.slane %v1599_v57, 2  ;;  %821 = vmatpush.bf16.msra.mxu2 %v2429_v9  ;;  %704 = vmatpush.bf16.msra.mxu1 %v2442_v15  ;;  %v2427_v25 = vld [vmem:[%s3221_s1 + $0x20] sm:$0xff] }
  0x48   : >> { %954 = vrot.lane.b32.xlu2 %v951_v45, %s2609_s30  ;;  %v2842_v23 = vsel %vm296_vm0, %v1297_v47, %v1298_v63  ;;  %v1282_v31 = vrot.slane %v1280_v20, 2  ;;  %v1567_v60 = vor.u32 %v1566_v49, %v1562_v48  ;;  %v1612_v63 = vshll.u32 %v1589_v2, 16  ;;  %v2438_v2 = vld [vmem:[%s3221_s1 + $0x78] sm:$0xff]  ;;  %v2433_v20 = vld [vmem:[%s3221_s1 + $0x50] sm:$0xff] }
  0x49   : >> { %v1593_v46 = vrot.slane %v1591_v41, 1  ;;  %v1596_v47 = vrot.slane %v1594_v43, 2  ;;  %681 = vmatpush.bf16.msra.mxu0 %v2438_v2  ;;  %v2450_v43 = vld [vmem:[%s3221_s1 + $0xd8] sm:$0xff]  ;;  %v2449_v2 = vld [vmem:[%s3221_s1 + $0xd0] sm:$0xff] }
  0x4a   : >> { %1248 = vrot.lane.b32.xlu1 %v1246_v29, %s2610_s4  ;;  %v2351_v29 = vld [vmem:[%s2671_s28 + $0x3c] sm:$0xe]  ;;  %v1283_v36 = vsel %vm259_vm1, %v1278_v30, %v1282_v31  ;;  %v1614_v22 = vrot.slane %v1612_v63, 2 }
  0x4b   : >> { %1236 = vrot.lane.b32.xlu0 %v1228_v55, %s2608_s29  ;;  %v1575_v38 = vunpack.c.l.b16 %v2351_v29  ;;  %v1597_v58 = vor.u32 %v1596_v47, %v1593_v46  ;;  %822 = vmatpush.bf16.msra.mxu2 %v2428_v39 }
  0x4d   : >> { %v1577_v45 = vpack.c.b16 %v1551_v42, %v1575_v38  ;;  %v1602_v10 = vsel %vm259_vm1, %v1597_v58, %v1601_v59  ;;  %682 = vmatpush.bf16.msra.mxu0 %v2437_v6  ;;  %v2590_v6 = vld [vmem:[%s2671_s28 + $0xc] sm:$0x70] }
  0x4f   : >> { %v1604_v51 = vshrl.u32 %v1577_v45, 16  ;;  %v1607_v55 = vshll.u32 %v1577_v45, 16  ;;  %v1579_v52 = vrot.slane %v1577_v45, 1  ;;  %823 = vmatpush.bf16.msra.mxu2 %v2427_v25  ;;  %v513_v45 = vrot.slane %v2700_v40, 7 }
  0x50   : >> { %1238 = vrot.lane.b32.xlu2 %v1560_v5, %s2608_s29 }
  0x51   : >> { %v1606_v61 = vrot.slane %v1604_v51, 1  ;;  %v1609_v62 = vrot.slane %v1607_v55, 2  ;;  %683 = vmatpush.bf16.msra.mxu0 %v2436_v7 }
  0x52   : >> { %1250 = vrot.lane.b32.xlu1 %v1247_v11, %s2610_s4  ;;  %v2505_v11 = vld [vmem:[%s2671_s28 + $0x18] sm:$0xf]  }
  0x53   : >> { %1284 = vrot.lane.b32.xlu0 %v1270_v27, %s2609_s30  ;;  %v1610_v42 = vor.u32 %v1609_v62, %v1606_v61  ;;  %v2506_v19 = vor.u32 %v2520_v12, %v2505_v11  ;;  %v2909_v27 = vrot.slane %v2731_v33, 7  ;;  %v2426_v33 = vld [vmem:[%s3221_s1 + $0x18] sm:$0xff]  ;;  %v2501_v11 = vld [vmem:[%s2671_s28] sm:$0xf]   ;;  %v2519_v12 = vld [vmem:[%s2671_s28] sm:$0x70] }
  0x54   : >> { %824 = vmatpush.bf16.msra.mxu2 %v2426_v33 }
  0x55   : >> { %v1615_v3 = vsel %vm259_vm1, %v1610_v42, %v1614_v22  ;;  %684 = vmatpush.bf16.msra.mxu0 %v2435_v8  ;;  %v2448_v8 = vld [vmem:[%s3221_s1 + $0xc8] sm:$0xff] }
  0x58   : >> { %1286 = vrot.lane.b32.xlu2 %v1283_v36, %s2609_s30 }
  0x59   : >> { %685 = vmatpush.bf16.msra.mxu0 %v2434_v13 }
  0x5a   : >> { %1580 = vrot.lane.b32.xlu1 %v1578_v34, %s2610_s4  ;;  %v2589_v34 = vld [vmem:[%s2671_s28 + $0xc] sm:$0x70] }
  0x5b   : >> { %1568 = vrot.lane.b32.xlu0 %v1560_v5, %s2608_s29  ;;  %v2441_v5 = vld [vmem:[%s3221_s1 + $0x90] sm:$0xff]  ;;  %v2564_v57 = vor.u32 %v2589_v34, %v2676_v4 }
  0x5c   : >> { %705 = vmatpush.bf16.msra.mxu1 %v2441_v5  ;;  %v2447_v5 = vld [vmem:[%s3221_s1 + $0xc0] sm:$0xff] }
  0x5d   : >> { %686 = vmatpush.bf16.msra.mxu0 %v2433_v20  ;;  %v2431_v20 = vld [vmem:[%s3221_s1 + $0x40] sm:$0xff] }
  0x60   : >> { %1570 = vrot.lane.b32.xlu2 %v1567_v60, %s2608_s29  ;;  %1148 = vmatpush.bf16.msrb.mxu1 %v2450_v43 }
  0x62   : >> { %1582 = vrot.lane.b32.xlu1 %v1579_v52, %s2610_s4 }
  0x63   : >> { %1616 = vrot.lane.b32.xlu0 %v1602_v10, %s2609_s30 }
  0x64   : >> { %1149 = vmatpush.bf16.msrb.mxu1 %v2449_v2 }
  0x68   : >> { %1618 = vrot.lane.b32.xlu2 %v1615_v3, %s2609_s30  ;;  %v2425_v3 = vld [vmem:[%s3221_s1 + $0x10] sm:$0xff]  ;;  %1150 = vmatpush.bf16.msrb.mxu1 %v2448_v8 }
  0x69   : >> { %825 = vmatpush.bf16.msra.mxu2 %v2425_v3 }
  0x6c   : >> { %1151 = vmatpush.bf16.msrb.mxu1 %v2447_v5  ;;  %v2458_v5 = vld [vmem:[%s3221_s1 + $0x118] sm:$0xff] }
  0x6d   : >> { %826 = vmatpush.bf16.msra.mxu2 %v2424_v37 }
  0x79   : >> { %v450_v21 = vpop.permute.xlu2 %449 }
  0x82   : >> { %v486_v30 = vpop.permute.xlu2 %485 }
  0x8a   : >> { %v240_v39 = vpop.permute.xlu2 %239 }
  0x8c   : >> { %v438_v29 = vpop.permute.xlu1 %437 }
  0x8d   : >> { %v504_v31 = vsel %vm303_vm2, %v2506_v19, %v438_v29  ;;  %v436_v44 = vpop.permute.xlu0 %435  ;;  %v2423_v19 = vld [vmem:[%s3221_s1] sm:$0xff]  ;;  %v2502_v29 = vor.u32 %v2519_v12, %v2501_v11 }
  0x8e   : >> { %v508_v38 = vsel %vm310_vm3, %v504_v31, %v450_v21  ;;  %v501_v46 = vsel %vm303_vm2, %v2564_v57, %v436_v44  ;;  %v2432_v21 = vld [vmem:[%s3221_s1 + $0x48] sm:$0xff]  ;;  %827 = vmatpush.bf16.msra.mxu2 %v2423_v19  ;;  %v2568_v44 = vor.u32 %v2590_v6, %v2712_v53 }
  0x8f   : >> { %v2915_v41 = vsel %vm315_vm4, %v508_v38, %v486_v30  ;;  %845 = vmatpush.bf16.msra.mxu3 %v2432_v21 }
  0x90   : >> { %v536_v36 = vsel %vm322_vm5, %v2915_v41, %v2909_v27  ;;  %v537_v13 = vsel %vm325_vm6, %v2915_v41, %v2909_v27  ;;  %v540_v15 = vsel %vm329_vm7, %v2915_v41, %v2909_v27  ;;  %v543_v25 = vsel %vm333_vm8, %v2915_v41, %v2909_v27 }
  0x91   : >> { %596 = vst [vmem:[#allocation1 + $0x7] ss:$9 sm:$0xff] %v536_v36  ;;  %v539_v30 = vrot.slane %v537_v13, 1  ;;  %v546_v31 = vsel %vm337_vm9, %v2915_v41, %v2909_v27  ;;  %v542_v34 = vrot.slane %v540_v15, 2  ;;  %v549_v38 = vsel %vm341_vm10, %v2915_v41, %v2909_v27  ;;  %v2509_v15 = vld [vmem:[%s2671_s28 + $0x18] sm:$0xf]  }
  0x92   : >> { %v545_v36 = vrot.slane %v543_v25, 3  ;;  %v552_v57 = vsel %vm345_vm11, %v2915_v41, %v2909_v27  ;;  %v2460_v41 = vld [vmem:[%s3221_s1 + $0x128] sm:$0xff] }
  0x93   : >> { %846 = vmatpush.bf16.msra.mxu3 %v2431_v20  ;;  %1480 = vmatpush.bf16.msrb.mxu0 %v2460_v41  ;;  %v2444_v20 = vld [vmem:[%s3221_s1 + $0xa8] sm:$0xff]  ;;  %v2470_v41 = vld [vmem:[%s3221_s1 + $0x178] sm:$0xff] }
  0x94   : >> { %v484_v48 = vpop.permute.xlu1 %483 }
  0x95   : >> { %v448_v47 = vpop.permute.xlu0 %447 }
  0x96   : >> { %v506_v49 = vsel %vm310_vm3, %v501_v46, %v448_v47  ;;  %v548_v46 = vrot.slane %v546_v31, 4  ;;  %v2443_v31 = vld [vmem:[%s3221_s1 + $0xa0] sm:$0xff] }
  0x97   : >> { %v510_v51 = vsel %vm315_vm4, %v506_v49, %v484_v48  ;;  %v551_v48 = vrot.slane %v549_v38, 5  ;;  %v554_v49 = vrot.slane %v552_v57, 6 }
  0x98   : >> { %v516_v55 = vsel %vm322_vm5, %v510_v51, %v513_v45  ;;  %v517_v4 = vsel %vm325_vm6, %v510_v51, %v513_v45  ;;  %v520_v40 = vsel %vm329_vm7, %v510_v51, %v513_v45  ;;  %v523_v52 = vsel %vm333_vm8, %v510_v51, %v513_v45 }
  0x99   : >> { %v519_v58 = vrot.slane %v517_v4, 1  ;;  %v522_v59 = vrot.slane %v520_v40, 2  ;;  %v525_v60 = vrot.slane %v523_v52, 3  ;;  %v526_v61 = vsel %vm337_vm9, %v510_v51, %v513_v45  ;;  %576 = vst [vmem:[#allocation1] ss:$9 sm:$0xff] %v516_v55 }
  0x9a   : >> { %v528_v62 = vrot.slane %v526_v61, 4  ;;  %v529_v63 = vsel %vm341_vm10, %v510_v51, %v513_v45  ;;  %v532_v10 = vsel %vm345_vm11, %v510_v51, %v513_v45  ;;  %v2446_v45 = vld [vmem:[%s3221_s1 + $0xb8] sm:$0xff]  ;;  %v309_v51 = vsel %vm303_vm2, %v2568_v44, %v240_v39  ;;  %v2452_v61 = vld [vmem:[%s3221_s1 + $0xe8] sm:$0xff] }
  0x9b   : >> { %v531_v42 = vrot.slane %v529_v63, 5  ;;  %579 = vst [vmem:[#allocation1 + $0x1] ss:$9 sm:$0xff] %v519_v58  ;;  %v534_v22 = vrot.slane %v532_v10, 6  ;;  %1152 = vmatpush.bf16.msrb.mxu1 %v2446_v45  ;;  %v320_v55 = vrot.slane %v2724_v14, 7  ;;  %v289_v58 = vpop.permute.xlu2 %288  ;;  %1173 = vmatpush.bf16.msrb.mxu3 %v2452_v61  ;;  %v2445_v10 = vld [vmem:[%s3221_s1 + $0xb0] sm:$0xff] }
  0x9c   : >> { %582 = vst [vmem:[#allocation1 + $0x2] ss:$9 sm:$0xff] %v522_v59  ;;  %v250_v9 = vpop.permute.xlu1 %249  ;;  %v321_v59 = vrot.slane %v2765_v17, 7  ;;  %v2459_v17 = vld [vmem:[%s3221_s1 + $0x120] sm:$0xff]  ;;  %v2521_v39 = vld [vmem:[%s2671_s28 + $0x18] sm:$0x70] }
  0x9d   : >> { %585 = vst [vmem:[#allocation1 + $0x3] ss:$9 sm:$0xff] %v525_v60  ;;  %v238_v7 = vpop.permute.xlu0 %237  ;;  %1481 = vmatpush.bf16.msrb.mxu0 %v2459_v17  ;;  %v2510_v25 = vor.u32 %v2521_v39, %v2509_v15 }
  0x9e   : >> { %588 = vst [vmem:[#allocation1 + $0x4] ss:$9 sm:$0xff] %v528_v62  ;;  %v306_v47 = vsel %vm303_vm2, %v2502_v29, %v238_v7 }
  0x9f   : >> { %591 = vst [vmem:[#allocation1 + $0x5] ss:$9 sm:$0xff] %v531_v42  ;;  %v312_v4 = vsel %vm310_vm3, %v306_v47, %v250_v9  ;;  %1153 = vmatpush.bf16.msrb.mxu1 %v2445_v10 }
  0xa0   : >> { %594 = vst [vmem:[#allocation1 + $0x6] ss:$9 sm:$0xff] %v534_v22 }
  0xa1   : >> { %1482 = vmatpush.bf16.msrb.mxu0 %v2458_v5  ;;  %v2269_v5 = vld [vmem:[%s2671_s28 + $0x28] sm:$0x7] }
  0xa3   : >> { %1154 = vmatpush.bf16.msrb.mxu1 %v2444_v20 }
  0xa4   : >> { %v252_v27 = vpop.permute.xlu1 %251 }
  0xa5   : >> { %v287_v53 = vpop.permute.xlu0 %286  ;;  %v314_v52 = vsel %vm310_vm3, %v309_v51, %v252_v27  ;;  %v2456_v27 = vld [vmem:[%s3221_s1 + $0x108] sm:$0xff] }
  0xa6   : >> { %v317_v40 = vsel %vm315_vm4, %v312_v4, %v287_v53  ;;  %v319_v14 = vsel %vm315_vm4, %v314_v52, %v289_v58 }
  0xa7   : >> { %v597_v33 = vld [vmem:[#allocation1] sm:$0xff]  ;;  %v598_v43 = vld [vmem:[#allocation1 + $0x9] sm:$0xff]  ;;  %v326_v60 = vsel %vm325_vm6, %v317_v40, %v320_v55  ;;  %v330_v62 = vsel %vm329_vm7, %v317_v40, %v320_v55  ;;  %v334_v63 = vsel %vm333_vm8, %v317_v40, %v320_v55  ;;  %v338_v22 = vsel %vm337_vm9, %v317_v40, %v320_v55  ;;  %1155 = vmatpush.bf16.msrb.mxu1 %v2443_v31  ;;  %v2462_v31 = vld [vmem:[%s3221_s1 + $0x138] sm:$0xff] }
  0xa8   : >> { %600 = vst [vmem:[#allocation1] ss:$9 sm:$0xff] %v539_v30  ;;  %687 = vmatmul.bf16.vlgmr.msra.gmra.mxu0 %v597_v33  ;;  %2146 = vmatmul.msk.bf16.vlgmr.msra.gmra.mxu1 %vm303_vm2, %v598_v43  ;;  %v328_v42 = vrot.slane %v326_v60, 1  ;;  %v350_v6 = vsel %vm322_vm5, %v319_v14, %v321_v59  ;;  %v332_v7 = vrot.slane %v330_v62, 2  ;;  %v342_v37 = vsel %vm341_vm10, %v317_v40, %v320_v55  ;;  %v2195_v33 = vld [vmem:[%s2671_s28 + $0x28] sm:$0x7] }
  0xa9   : >> { %602 = vst [vmem:[#allocation1 + $0x1] ss:$9 sm:$0xff] %v542_v34  ;;  %v324_v21 = vsel %vm322_vm5, %v317_v40, %v320_v55  ;;  %v336_v8 = vrot.slane %v334_v63, 3  ;;  %v346_v9 = vsel %vm345_vm11, %v317_v40, %v320_v55  ;;  %v340_v11 = vrot.slane %v338_v22, 4  ;;  %v2457_v34 = vld [vmem:[%s3221_s1 + $0x110] sm:$0xff]  ;;  %v907_v40 = vpop.permute.xlu2 %906  ;;  %1505 = vmatpush.bf16.msrb.mxu2 %v2462_v31 }
  0xaa   : >> { %604 = vst [vmem:[#allocation1 + $0x2] ss:$9 sm:$0xff] %v545_v36  ;;  %v344_v12 = vrot.slane %v342_v37, 5  ;;  %v348_v13 = vrot.slane %v346_v9, 6  ;;  %v351_v29 = vsel %vm325_vm6, %v319_v14, %v321_v59  ;;  %v354_v30 = vsel %vm329_vm7, %v319_v14, %v321_v59  ;;  %1483 = vmatpush.bf16.msrb.mxu0 %v2457_v34  ;;  %v2468_v34 = vld [vmem:[%s3221_s1 + $0x168] sm:$0xff] }
  0xab   : >> { %606 = vst [vmem:[#allocation1 + $0x3] ss:$9 sm:$0xff] %v548_v46  ;;  %v357_v38 = vsel %vm333_vm8, %v319_v14, %v321_v59  ;;  %v353_v43 = vrot.slane %v351_v29, 1  ;;  %v360_v44 = vsel %vm337_vm9, %v319_v14, %v321_v59  ;;  %v356_v45 = vrot.slane %v354_v30, 2  ;;  %1812 = vmatpush.bf16.msra.mxu1 %v2470_v41  ;;  %v2454_v30 = vld [vmem:[%s3221_s1 + $0xf8] sm:$0xff] }
  0xac   : >> { %608 = vst [vmem:[#allocation1 + $0x4] ss:$9 sm:$0xff] %v551_v48  ;;  %v917_v57 = vpop.permute.xlu1 %916  ;;  %v363_v46 = vsel %vm341_vm10, %v319_v14, %v321_v59  ;;  %v359_v53 = vrot.slane %v357_v38, 3  ;;  %v881_v51 = vunpack.c.l.b16 %v2195_v33  ;;  %v362_v55 = vrot.slane %v360_v44, 4 }
  0xad   : >> { %610 = vst [vmem:[#allocation1 + $0x5] ss:$9 sm:$0xff] %v554_v49  ;;  %v905_v19 = vpop.permute.xlu0 %904  ;;  %v366_v49 = vsel %vm345_vm11, %v319_v14, %v321_v59  ;;  %v365_v58 = vrot.slane %v363_v46, 5  ;;  %v982_v59 = vrot.slane %v2744_v50, 7  ;;  %v2451_v50 = vld [vmem:[%s3221_s1 + $0xe0] sm:$0xff]  ;;  %v1211_v29 = vunpack.c.l.b16 %v2269_v5  ;;  %v2461_v46 = vld [vmem:[%s3221_s1 + $0x130] sm:$0xff] }
  0xae   : >> { %v970_v36 = vsel %vm303_vm2, %v2510_v25, %v905_v19  ;;  %v368_v60 = vrot.slane %v366_v49, 6  ;;  %1484 = vmatpush.bf16.msrb.mxu0 %v2456_v27  ;;  %v883_v61 = vpack.c.b16 %v881_v51, %v880_v32  ;;  %1174 = vmatpush.bf16.msrb.mxu3 %v2451_v50 }
  0xaf   : >> { %v975_v4 = vsel %vm310_vm3, %v970_v36, %v917_v57  ;;  %1506 = vmatpush.bf16.msrb.mxu2 %v2461_v46  ;;  %v2591_v46 = vld [vmem:[%s2671_s28 + $0x3c] sm:$0x70] }
  0xb0   : >> { %v973_v63 = vsel %vm303_vm2, %v883_v61, %v907_v40  ;;  %v2513_v40 = vld [vmem:[%s2671_s28 + $0x30] sm:$0xf]  }
  0xb4   : >> { %v611_v3 = vld [vmem:[#allocation1] sm:$0xff]  ;;  %v612_v2 = vld [vmem:[#allocation1 + $0x9] sm:$0xff]  ;;  %v919_v17 = vpop.permute.xlu1 %918 }
  0xb5   : >> { %737 = vst [vmem:[#allocation1 + $0x7] ss:$9 sm:$0xff] %v350_v6  ;;  %v953_v52 = vpop.permute.xlu0 %952  ;;  %v977_v37 = vsel %vm310_vm3, %v973_v63, %v919_v17 }
  0xb6   : >> { %717 = vst [vmem:[#allocation1] ss:$9 sm:$0xff] %v324_v21  ;;  %v979_v14 = vsel %vm315_vm4, %v975_v4, %v953_v52  ;;  %v955_v21 = vpop.permute.xlu2 %954 }
  0xb7   : >> { %720 = vst [vmem:[#allocation1 + $0x1] ss:$9 sm:$0xff] %v328_v42  ;;  %v986_v62 = vsel %vm325_vm6, %v979_v14, %v982_v59  ;;  %v989_v10 = vsel %vm329_vm7, %v979_v14, %v982_v59  ;;  %v992_v42 = vsel %vm333_vm8, %v979_v14, %v982_v59  ;;  %v985_v22 = vsel %vm322_vm5, %v979_v14, %v982_v59 }
  0xb8   : >> { %723 = vst [vmem:[#allocation1 + $0x2] ss:$9 sm:$0xff] %v332_v7  ;;  %692 = vmatmul.bf16.gmra.mxu0 %v611_v3  ;;  %2147 = vmatmul.msk.bf16.gmra.mxu1 %vm303_vm2, %v612_v2  ;;  %v988_v54 = vrot.slane %v986_v62, 1  ;;  %v995_v32 = vsel %vm337_vm9, %v979_v14, %v982_v59  ;;  %v2455_v3 = vld [vmem:[%s3221_s1 + $0x100] sm:$0xff]  ;;  %v2469_v2 = vld [vmem:[%s3221_s1 + $0x170] sm:$0xff]  ;;  %v991_v6 = vrot.slane %v989_v10, 2  ;;  %v998_v7 = vsel %vm341_vm10, %v979_v14, %v982_v59 }
  0xb9   : >> { %726 = vst [vmem:[#allocation1 + $0x3] ss:$9 sm:$0xff] %v336_v8  ;;  %1485 = vmatpush.bf16.msrb.mxu0 %v2455_v3  ;;  %1813 = vmatpush.bf16.msra.mxu1 %v2469_v2  ;;  %v997_v15 = vrot.slane %v995_v32, 4  ;;  %v1000_v39 = vrot.slane %v998_v7, 5  ;;  %v981_v19 = vsel %vm315_vm4, %v977_v37, %v955_v21  ;;  %v1314_v62 = vrot.slane %v2779_v35, 7  ;;  %v2472_v35 = vld [vmem:[%s3221_s1 + $0x188] sm:$0xff] }
  0xba   : >> { %729 = vst [vmem:[#allocation1 + $0x4] ss:$9 sm:$0xff] %v340_v11  ;;  %v994_v11 = vrot.slane %v992_v42, 3 }
  0xbb   : >> { %732 = vst [vmem:[#allocation1 + $0x5] ss:$9 sm:$0xff] %v344_v12  ;;  %v1001_v12 = vsel %vm345_vm11, %v979_v14, %v982_v59  ;;  %v2522_v59 = vld [vmem:[%s2671_s28 + $0x30] sm:$0x70]  ;;  %v2466_v14 = vld [vmem:[%s3221_s1 + $0x158] sm:$0xff] }
  0xbc   : >> { %735 = vst [vmem:[#allocation1 + $0x6] ss:$9 sm:$0xff] %v348_v13  ;;  %v983_v13 = vrot.slane %v2811_v16, 7  ;;  %v1003_v20 = vrot.slane %v1001_v12, 6  ;;  %v1249_v51 = vpop.permute.xlu1 %1248  ;;  %v2514_v63 = vor.u32 %v2522_v59, %v2513_v40  ;;  %v2572_v59 = vor.u32 %v2591_v46, %v2818_v24 }
  0xbd   : >> { %v1237_v16 = vpop.permute.xlu0 %1236  ;;  %1486 = vmatpush.bf16.msrb.mxu0 %v2454_v30  ;;  %1814 = vmatpush.bf16.msra.mxu1 %v2468_v34  ;;  %v2523_v30 = vld [vmem:[%s2671_s28 + $0x30] sm:$0x70] }
  0xbe   : >> { %v1005_v25 = vsel %vm322_vm5, %v981_v19, %v983_v13  ;;  %v1006_v38 = vsel %vm325_vm6, %v981_v19, %v983_v13  ;;  %v1009_v33 = vsel %vm329_vm7, %v981_v19, %v983_v13  ;;  %v1012_v44 = vsel %vm333_vm8, %v981_v19, %v983_v13 }
  0xbf   : >> { %v1008_v36 = vrot.slane %v1006_v38, 1  ;;  %v1015_v57 = vsel %vm337_vm9, %v981_v19, %v983_v13 }
  0xc0   : >> { %v1017_v27 = vrot.slane %v1015_v57, 4 }
  0xc1   : >> { %1815 = vmatpush.bf16.msra.mxu1 %v2467_v56 }
  0xc3   : >> { %v738_v47 = vld [vmem:[#allocation1] sm:$0xff]  ;;  %v739_v48 = vld [vmem:[#allocation1 + $0x9] sm:$0xff] }
  0xc4   : >> { %741 = vst [vmem:[#allocation1] ss:$9 sm:$0xff] %v353_v43  ;;  %828 = vmatmul.bf16.vlgmr.msra.gmra.mxu2 %v738_v47  ;;  %2188 = vmatmul.msk.bf16.vlgmr.msra.gmra.mxu3 %vm303_vm2, %v739_v48  ;;  %v1214_v43 = vpack.c.b16 %v1211_v29, %v1210_v26  ;;  %v1011_v26 = vrot.slane %v1009_v33, 2  ;;  %v1018_v47 = vsel %vm341_vm10, %v981_v19, %v983_v13  ;;  %v1014_v48 = vrot.slane %v1012_v44, 3 }
  0xc5   : >> { %743 = vst [vmem:[#allocation1 + $0x1] ss:$9 sm:$0xff] %v356_v45  ;;  %v2453_v45 = vld [vmem:[%s3221_s1 + $0xf0] sm:$0xff]  ;;  %v1020_v4 = vrot.slane %v1018_v47, 5  ;;  %v1285_v61 = vpop.permute.xlu0 %1284  ;;  %1816 = vmatpush.bf16.msra.mxu1 %v2466_v14  ;;  %1837 = vmatpush.bf16.msra.mxu3 %v2472_v35 }
  0xc6   : >> { %745 = vst [vmem:[#allocation1 + $0x2] ss:$9 sm:$0xff] %v359_v53  ;;  %v1021_v53 = vsel %vm345_vm11, %v981_v19, %v983_v13  ;;  %v1302_v49 = vsel %vm303_vm2, %v1214_v43, %v1237_v16  ;;  %1487 = vmatpush.bf16.msrb.mxu0 %v2453_v45  ;;  %v2517_v16 = vld [vmem:[%s2671_s28 + $0x30] sm:$0xf]  }
  0xc7   : >> { %747 = vst [vmem:[#allocation1 + $0x3] ss:$9 sm:$0xff] %v362_v55  ;;  %v1023_v52 = vrot.slane %v1021_v53, 6  ;;  %v2518_v33 = vor.u32 %v2523_v30, %v2517_v16 }
  0xc8   : >> { %749 = vst [vmem:[#allocation1 + $0x4] ss:$9 sm:$0xff] %v365_v58  ;;  %v1307_v58 = vsel %vm310_vm3, %v1302_v49, %v1249_v51 }
  0xc9   : >> { %751 = vst [vmem:[#allocation1 + $0x5] ss:$9 sm:$0xff] %v368_v60  ;;  %v1239_v60 = vpop.permute.xlu2 %1238  ;;  %v1311_v10 = vsel %vm315_vm4, %v1307_v58, %v1285_v61  ;;  %v1646_v58 = vrot.slane %v2823_v28, 7 }
  0xca   : >> { %v1318_v17 = vsel %vm325_vm6, %v1311_v10, %v1314_v62  ;;  %v1305_v50 = vsel %vm303_vm2, %v2514_v63, %v1239_v60  ;;  %v1321_v42 = vsel %vm329_vm7, %v1311_v10, %v1314_v62  ;;  %v1317_v32 = vsel %vm322_vm5, %v1311_v10, %v1314_v62 }
  0xcb   : >> { %v1320_v3 = vrot.slane %v1318_v17, 1  ;;  %v1327_v2 = vsel %vm337_vm9, %v1311_v10, %v1314_v62  ;;  %v1323_v7 = vrot.slane %v1321_v42, 2  ;;  %v1330_v37 = vsel %vm341_vm10, %v1311_v10, %v1314_v62 }
  0xcc   : >> { %v1333_v13 = vsel %vm345_vm11, %v1311_v10, %v1314_v62  ;;  %v1332_v19 = vrot.slane %v1330_v37, 5 }
  0xcd   : >> { %v1335_v5 = vrot.slane %v1333_v13, 6  ;;  %v1569_v31 = vpop.permute.xlu0 %1568 }
  0xce   : >> { %v1634_v47 = vsel %vm303_vm2, %v2518_v33, %v1569_v31 }
  0xd0   : >> { %v752_v8 = vld [vmem:[#allocation1] sm:$0xff]  ;;  %v753_v9 = vld [vmem:[#allocation1 + $0x9] sm:$0xff] }
  0xd1   : >> { %1045 = vst [vmem:[#allocation1] ss:$9 sm:$0xff] %v985_v22  ;;  %v1251_v22 = vpop.permute.xlu1 %1250 }
  0xd2   : >> { %1048 = vst [vmem:[#allocation1 + $0x1] ss:$9 sm:$0xff] %v988_v54  ;;  %v1324_v54 = vsel %vm333_vm8, %v1311_v10, %v1314_v62  ;;  %v1309_v21 = vsel %vm310_vm3, %v1305_v50, %v1251_v22 }
  0xd3   : >> { %1051 = vst [vmem:[#allocation1 + $0x2] ss:$9 sm:$0xff] %v991_v6  ;;  %v2465_v6 = vld [vmem:[%s3221_s1 + $0x150] sm:$0xff]  ;;  %v1326_v12 = vrot.slane %v1324_v54, 3 }
  0xd4   : >> { %1054 = vst [vmem:[#allocation1 + $0x3] ss:$9 sm:$0xff] %v994_v11  ;;  %833 = vmatmul.bf16.gmra.mxu2 %v752_v8  ;;  %2189 = vmatmul.msk.bf16.gmra.mxu3 %vm303_vm2, %v753_v9  ;;  %v1287_v8 = vpop.permute.xlu2 %1286 }
  0xd5   : >> { %1057 = vst [vmem:[#allocation1 + $0x4] ss:$9 sm:$0xff] %v997_v15  ;;  %1817 = vmatpush.bf16.msra.mxu1 %v2465_v6  ;;  %v1315_v15 = vrot.slane %v2842_v23, 7  ;;  %v2463_v23 = vld [vmem:[%s3221_s1 + $0x140] sm:$0xff]  ;;  %v1617_v40 = vpop.permute.xlu0 %1616  ;;  %v1647_v6 = vrot.slane %v2849_v18, 7 }
  0xd6   : >> { %1060 = vst [vmem:[#allocation1 + $0x5] ss:$9 sm:$0xff] %v1000_v39  ;;  %v1329_v39 = vrot.slane %v1327_v2, 4 }
  0xd7   : >> { %1063 = vst [vmem:[#allocation1 + $0x6] ss:$9 sm:$0xff] %v1003_v20  ;;  %v1313_v20 = vsel %vm315_vm4, %v1309_v21, %v1287_v8 }
  0xd8   : >> { %1065 = vst [vmem:[#allocation1 + $0x7] ss:$9 sm:$0xff] %v1005_v25  ;;  %v2464_v25 = vld [vmem:[%s3221_s1 + $0x148] sm:$0xff]  ;;  %v1337_v29 = vsel %vm322_vm5, %v1313_v20, %v1315_v15  ;;  %v1338_v34 = vsel %vm325_vm6, %v1313_v20, %v1315_v15  ;;  %v1341_v38 = vsel %vm329_vm7, %v1313_v20, %v1315_v15  ;;  %v1344_v43 = vsel %vm333_vm8, %v1313_v20, %v1315_v15 }
  0xd9   : >> { %1818 = vmatpush.bf16.msra.mxu1 %v2464_v25  ;;  %v1340_v44 = vrot.slane %v1338_v34, 1  ;;  %v1343_v57 = vrot.slane %v1341_v38, 2  ;;  %v1350_v45 = vsel %vm341_vm10, %v1313_v20, %v1315_v15  ;;  %v1346_v56 = vrot.slane %v1344_v43, 3 }
  0xdd   : >> { %1819 = vmatpush.bf16.msra.mxu1 %v2463_v23 }
  0xdf   : >> { %v1066_v41 = vld [vmem:[#allocation1] sm:$0xff]  ;;  %v1067_v55 = vld [vmem:[#allocation1 + $0x9] sm:$0xff] }
  0xe0   : >> { %1069 = vst [vmem:[#allocation1] ss:$9 sm:$0xff] %v1008_v36  ;;  %1156 = vmatmul.bf16.vlgmr.msrb.gmra.mxu1 %v1066_v41  ;;  %v1347_v36 = vsel %vm337_vm9, %v1313_v20, %v1315_v15 }
  0xe1   : >> { %1071 = vst [vmem:[#allocation1 + $0x1] ss:$9 sm:$0xff] %v1011_v26  ;;  %v1353_v26 = vsel %vm345_vm11, %v1313_v20, %v1315_v15  ;;  %v1349_v53 = vrot.slane %v1347_v36, 4 }
  0xe2   : >> { %1073 = vst [vmem:[#allocation1 + $0x2] ss:$9 sm:$0xff] %v1014_v48  ;;  %v1581_v48 = vpop.permute.xlu1 %1580  ;;  %v1355_v41 = vrot.slane %v1353_v26, 6 }
  0xe3   : >> { %1075 = vst [vmem:[#allocation1 + $0x3] ss:$9 sm:$0xff] %v1017_v27  ;;  %v1352_v27 = vrot.slane %v1350_v45, 5 }
  0xe4   : >> { %1077 = vst [vmem:[#allocation1 + $0x4] ss:$9 sm:$0xff] %v1020_v4  ;;  %2264 = vmatmul.msk.bf16.vlgmr.msrb.gmra.mxu3 %vm303_vm2, %v1067_v55  ;;  %v1639_v55 = vsel %vm310_vm3, %v1634_v47, %v1581_v48  ;;  %v1571_v4 = vpop.permute.xlu2 %1570 }
  0xe5   : >> { %1079 = vst [vmem:[#allocation1 + $0x5] ss:$9 sm:$0xff] %v1023_v52  ;;  %v2471_v52 = vld [vmem:[%s3221_s1 + $0x180] sm:$0xff]  ;;  %v1643_v60 = vsel %vm315_vm4, %v1639_v55, %v1617_v40  ;;  %v1637_v14 = vsel %vm303_vm2, %v2572_v59, %v1571_v4 }
  0xe6   : >> { %1838 = vmatpush.bf16.msra.mxu3 %v2471_v52  ;;  %v1650_v61 = vsel %vm325_vm6, %v1643_v60, %v1646_v58  ;;  %v1653_v62 = vsel %vm329_vm7, %v1643_v60, %v1646_v58  ;;  %v1656_v10 = vsel %vm333_vm8, %v1643_v60, %v1646_v58  ;;  %v1649_v17 = vsel %vm322_vm5, %v1643_v60, %v1646_v58 }
  0xe7   : >> { %v1652_v28 = vrot.slane %v1650_v61, 1  ;;  %v1659_v50 = vsel %vm337_vm9, %v1643_v60, %v1646_v58  ;;  %v1655_v42 = vrot.slane %v1653_v62, 2  ;;  %v1662_v24 = vsel %vm341_vm10, %v1643_v60, %v1646_v58 }
  0xe8   : >> { %v1665_v2 = vsel %vm345_vm11, %v1643_v60, %v1646_v58  ;;  %v1664_v37 = vrot.slane %v1662_v24, 5 }
  0xe9   : >> { %v1667_v8 = vrot.slane %v1665_v2, 6 }
  0xea   : >> { %v1583_v63 = vpop.permute.xlu1 %1582 }
  0xeb   : >> { %v1641_v22 = vsel %vm310_vm3, %v1637_v14, %v1583_v63 }
  0xec   : >> { %v1080_v9 = vld [vmem:[#allocation1] sm:$0xff]  ;;  %v1081_v11 = vld [vmem:[#allocation1 + $0x9] sm:$0xff]  ;;  %v1619_v35 = vpop.permute.xlu2 %1618 }
  0xed   : >> { %1377 = vst [vmem:[#allocation1] ss:$9 sm:$0xff] %v1317_v32  ;;  %v1645_v21 = vsel %vm315_vm4, %v1641_v22, %v1619_v35 }
  0xee   : >> { %1380 = vst [vmem:[#allocation1 + $0x1] ss:$9 sm:$0xff] %v1320_v3  ;;  %v1658_v3 = vrot.slane %v1656_v10, 3  ;;  %v1670_v18 = vsel %vm325_vm6, %v1645_v21, %v1647_v6  ;;  %v1679_v15 = vsel %vm337_vm9, %v1645_v21, %v1647_v6 }
  0xef   : >> { %1383 = vst [vmem:[#allocation1 + $0x2] ss:$9 sm:$0xff] %v1323_v7  ;;  %v1661_v7 = vrot.slane %v1659_v50, 4  ;;  %v1672_v13 = vrot.slane %v1670_v18, 1  ;;  %v1681_v25 = vrot.slane %v1679_v15, 4 }
  0xf0   : >> { %1386 = vst [vmem:[#allocation1 + $0x3] ss:$9 sm:$0xff] %v1326_v12  ;;  %1161 = vmatmul.bf16.gmra.mxu1 %v1080_v9  ;;  %v1669_v9 = vsel %vm322_vm5, %v1645_v21, %v1647_v6  ;;  %v1676_v12 = vsel %vm333_vm8, %v1645_v21, %v1647_v6 }
  0xf1   : >> { %1389 = vst [vmem:[#allocation1 + $0x4] ss:$9 sm:$0xff] %v1329_v39  ;;  %v1678_v20 = vrot.slane %v1676_v12, 3 }
  0xf2   : >> { %1392 = vst [vmem:[#allocation1 + $0x5] ss:$9 sm:$0xff] %v1332_v19  ;;  %v1682_v19 = vsel %vm341_vm10, %v1645_v21, %v1647_v6 }
  0xf3   : >> { %1395 = vst [vmem:[#allocation1 + $0x6] ss:$9 sm:$0xff] %v1335_v5  ;;  %v1685_v5 = vsel %vm345_vm11, %v1645_v21, %v1647_v6  ;;  %v1684_v16 = vrot.slane %v1682_v19, 5 }
  0xf4   : >> { %1397 = vst [vmem:[#allocation1 + $0x7] ss:$9 sm:$0xff] %v1337_v29  ;;  %2265 = vmatmul.msk.bf16.gmra.mxu3 %vm303_vm2, %v1081_v11  ;;  %v1673_v11 = vsel %vm329_vm7, %v1645_v21, %v1647_v6  ;;  %v1687_v30 = vrot.slane %v1685_v5, 6 }
  0xf5   : >> { %v1675_v39 = vrot.slane %v1673_v11, 2 }
  0xfb   : >> { %v1398_v49 = vld [vmem:[#allocation1] sm:$0xff]  ;;  %v1399_v51 = vld [vmem:[#allocation1 + $0x9] sm:$0xff] }
  0xfc   : >> { %1401 = vst [vmem:[#allocation1] ss:$9 sm:$0xff] %v1340_v44  ;;  %1488 = vmatmul.bf16.vlgmr.msrb.gmra.mxu0 %v1398_v49  ;;  %2340 = vmatmul.msk.bf16.vlgmr.msrb.gmra.mxu2 %vm303_vm2, %v1399_v51 }
  0xfd   : >> { %1403 = vst [vmem:[#allocation1 + $0x1] ss:$9 sm:$0xff] %v1343_v57 }
  0xfe   : >> { %1405 = vst [vmem:[#allocation1 + $0x2] ss:$9 sm:$0xff] %v1346_v56 }
  0xff   : >> { %1407 = vst [vmem:[#allocation1 + $0x3] ss:$9 sm:$0xff] %v1349_v53 }
 0x100   : >> { %1409 = vst [vmem:[#allocation1 + $0x4] ss:$9 sm:$0xff] %v1352_v27 }
 0x101   : >> { %1411 = vst [vmem:[#allocation1 + $0x5] ss:$9 sm:$0xff] %v1355_v41 }
 0x108   : >> { %v1412_v54 = vld [vmem:[#allocation1] sm:$0xff]  ;;  %v1413_v32 = vld [vmem:[#allocation1 + $0x9] sm:$0xff] }
 0x109   : >> { %1709 = vst [vmem:[#allocation1] ss:$9 sm:$0xff] %v1649_v17 }
 0x10a   : >> { %1712 = vst [vmem:[#allocation1 + $0x1] ss:$9 sm:$0xff] %v1652_v28 }
 0x10b   : >> { %1715 = vst [vmem:[#allocation1 + $0x2] ss:$9 sm:$0xff] %v1655_v42 }
 0x10c   : >> { %1718 = vst [vmem:[#allocation1 + $0x3] ss:$9 sm:$0xff] %v1658_v3  ;;  %1493 = vmatmul.bf16.gmra.mxu0 %v1412_v54  ;;  %2341 = vmatmul.msk.bf16.gmra.mxu2 %vm303_vm2, %v1413_v32 }
 0x10d   : >> { %1721 = vst [vmem:[#allocation1 + $0x4] ss:$9 sm:$0xff] %v1661_v7 }
 0x10e   : >> { %1724 = vst [vmem:[#allocation1 + $0x5] ss:$9 sm:$0xff] %v1664_v37 }
 0x10f   : >> { %1727 = vst [vmem:[#allocation1 + $0x6] ss:$9 sm:$0xff] %v1667_v8 }
 0x110   : >> { %1729 = vst [vmem:[#allocation1 + $0x7] ss:$9 sm:$0xff] %v1669_v9 }
 0x117   : >> { %v1730_v29 = vld [vmem:[#allocation1] sm:$0xff]  ;;  %v1731_v23 = vld [vmem:[#allocation1 + $0x9] sm:$0xff] }
 0x118   : >> { %1820 = vmatmul.bf16.vlgmr.msra.gmra.mxu1 %v1730_v29  ;;  %1733 = vst [vmem:[#allocation1] ss:$9 sm:$0xff] %v1672_v13  ;;  %2416 = vmatmul.msk.bf16.vlgmr.msra.gmra.mxu3 %vm303_vm2, %v1731_v23 }
 0x119   : >> { %1735 = vst [vmem:[#allocation1 + $0x1] ss:$9 sm:$0xff] %v1675_v39 }
 0x11a   : >> { %1737 = vst [vmem:[#allocation1 + $0x2] ss:$9 sm:$0xff] %v1678_v20 }
 0x11b   : >> { %1739 = vst [vmem:[#allocation1 + $0x3] ss:$9 sm:$0xff] %v1681_v25 }
 0x11c   : >> { %1741 = vst [vmem:[#allocation1 + $0x4] ss:$9 sm:$0xff] %v1684_v16 }
 0x11d   : >> { %1743 = vst [vmem:[#allocation1 + $0x5] ss:$9 sm:$0xff] %v1687_v30 }
 0x124   : >> { %v1744_v31 = vld [vmem:[#allocation1] sm:$0xff]  ;;  %v1745_v34 = vld [vmem:[#allocation1 + $0x9] sm:$0xff] }
 0x125   : >> { %v707_v38 = vpop.f32.mrf.mxu1  ;;  %v688_v26 = vpop.f32.mrf.mxu0 }
 0x126   : >> { %v708_v60 = vadd.f32 %v707_v38, %v688_v26 }
 0x128   : >> { %1825 = vmatmul.bf16.gmra.mxu1 %v1744_v31  ;;  %2417 = vmatmul.msk.bf16.gmra.mxu3 %vm303_vm2, %v1745_v34 }
 0x12d   : >> { %v709_v43 = vpop.f32.mrf.mxu1  ;;  %v690_v49 = vpop.f32.mrf.mxu0 }
 0x12e   : >> { %v710_v50 = vadd.f32 %v709_v43, %v690_v49 }
 0x135   : >> { %v712_v36 = vpop.f32.mrf.mxu1  ;;  %v693_v55 = vpop.f32.mrf.mxu0 }
 0x136   : >> { %v713_v21 = vadd.f32 %v712_v36, %v693_v55 }
 0x13d   : >> { %v714_v45 = vpop.f32.mrf.mxu1  ;;  %v695_v58 = vpop.f32.mrf.mxu0 }
 0x13e   : >> { %v715_v30 = vadd.f32 %v714_v45, %v695_v58 }
 0x147   : >> { %v848_v33 = vpop.f32.mrf.mxu3  ;;  %v829_v46 = vpop.f32.mrf.mxu2 }
 0x148   : >> { %v830_v62 = vadd.f32 %v829_v46, %v708_v60 }
 0x14a   : >> { %v849_v28 = vadd.f32 %v848_v33, %v830_v62 }
 0x14f   : >> { %v850_v44 = vpop.f32.mrf.mxu3  ;;  %v831_v48 = vpop.f32.mrf.mxu2 }
 0x150   : >> { %v832_v22 = vadd.f32 %v831_v48, %v710_v50 }
 0x152   : >> { %v851_v7 = vadd.f32 %v850_v44, %v832_v22 }
 0x157   : >> { %v853_v57 = vpop.f32.mrf.mxu3  ;;  %v834_v27 = vpop.f32.mrf.mxu2 }
 0x158   : >> { %v835_v13 = vadd.f32 %v834_v27, %v713_v21 }
 0x15a   : >> { %v854_v29 = vadd.f32 %v853_v57, %v835_v13 }
 0x15d   : >> { %v1157_v47 = vpop.f32.mrf.mxu1 }
 0x15f   : >> { %v3174_v56 = vpop.f32.mrf.mxu3  ;;  %v836_v40 = vpop.f32.mrf.mxu2 }
 0x160   : >> { %v837_v43 = vadd.f32 %v836_v40, %v715_v30 }
 0x165   : >> { %v1159_v51 = vpop.f32.mrf.mxu1 }
 0x167   : >> { %v1176_v53 = vpop.f32.mrf.mxu3 }
 0x168   : >> { %v1177_v10 = vadd.f32 %v1176_v53, %v1157_v47  ;;  %v856_v53 = vadd.f32 %v3174_v56, %v837_v43 }
 0x16a   : >> { %v1186_v42 = vadd.f32 %v1177_v10, %v849_v28 }
 0x16d   : >> { %v1162_v4 = vpop.f32.mrf.mxu1 }
 0x16f   : >> { %v1178_v41 = vpop.f32.mrf.mxu3 }
 0x170   : >> { %v1179_v2 = vadd.f32 %v1178_v41, %v1159_v51 }
 0x172   : >> { %v1187_v9 = vadd.f32 %v1179_v2, %v851_v7 }
 0x175   : >> { %v1164_v59 = vpop.f32.mrf.mxu1 }
 0x177   : >> { %v1181_v52 = vpop.f32.mrf.mxu3 }
 0x178   : >> { %v1182_v20 = vadd.f32 %v1181_v52, %v1162_v4 }
 0x179   : >> { %v1489_v63 = vpop.f32.mrf.mxu0 }
 0x17a   : >> { %v1188_v31 = vadd.f32 %v1182_v20, %v854_v29 }
 0x17f   : >> { %v1508_v61 = vpop.f32.mrf.mxu2  ;;  %v1183_v14 = vpop.f32.mrf.mxu3 }
 0x180   : >> { %v1509_v24 = vadd.f32 %v1508_v61, %v1489_v63  ;;  %v1184_v46 = vadd.f32 %v1183_v14, %v1164_v59 }
 0x181   : >> { %v1491_v3 = vpop.f32.mrf.mxu0 }
 0x182   : >> { %v1518_v32 = vadd.f32 %v1509_v24, %v1186_v42  ;;  %v1189_v27 = vadd.f32 %v1184_v46, %v856_v53 }
 0x187   : >> { %v1510_v35 = vpop.f32.mrf.mxu2 }
 0x188   : >> { %v1511_v15 = vadd.f32 %v1510_v35, %v1491_v3 }
 0x189   : >> { %v1494_v23 = vpop.f32.mrf.mxu0 }
 0x18a   : >> { %v1519_v19 = vadd.f32 %v1511_v15, %v1187_v9 }
 0x18f   : >> { %v1513_v5 = vpop.f32.mrf.mxu2 }
 0x190   : >> { %v1514_v36 = vadd.f32 %v1513_v5, %v1494_v23 }
 0x191   : >> { %v1496_v41 = vpop.f32.mrf.mxu0 }
 0x192   : >> { %v1520_v57 = vadd.f32 %v1514_v36, %v1188_v31 }
 0x195   : >> { %v1821_v17 = vpop.f32.mrf.mxu1 }
 0x197   : >> { %v1515_v49 = vpop.f32.mrf.mxu2 }
 0x198   : >> { %v1516_v58 = vadd.f32 %v1515_v49, %v1496_v41 }
 0x19a   : >> { %v1521_v14 = vadd.f32 %v1516_v58, %v1189_v27 }
 0x19b   : >> { %v1840_v54 = vpop.f32.mrf.mxu3 }
 0x19c   : >> { %v1841_v6 = vadd.f32 %v1840_v54, %v1821_v17 }
 0x19d   : >> { %v1823_v8 = vpop.f32.mrf.mxu1 }
 0x19e   : >> { %v3176_v37 = vadd.f32 %v1841_v6, %v1518_v32 }
 0x1a0   : >> { %v1858_v18 = vrot.slane %v3176_v37, 2  ;;  %v1859_v11 = vrot.slane %v3176_v37, 4  ;;  %v1860_v12 = vrot.slane %v3176_v37, 6  ;;  %1868 = vst [vmem:[#allocation1] ss:$4 sm:$0xff] %v3176_v37  ;;  %v1923_v56 = vmul.f32 %v3176_v37, %v3176_v37 }
 0x1a1   : >> { %v1909_v28 = vsel %vm310_vm3, %v3176_v37, 0.0 }
 0x1a2   : >> { %1870 = vst [vmem:[#allocation1 + $0x1] ss:$4 sm:$0xff] %v1858_v18  ;;  %v1927_v35 = vsel %vm310_vm3, %v1923_v56, 0.0 }
 0x1a3   : >> { %1872 = vst [vmem:[#allocation1 + $0x2] ss:$4 sm:$0xff] %v1859_v11  ;;  %v1842_v39 = vpop.f32.mrf.mxu3 }
 0x1a4   : >> { %1874 = vst [vmem:[#allocation1 + $0x3] ss:$4 sm:$0xff] %v1860_v12  ;;  %v1843_v25 = vadd.f32 %v1842_v39, %v1823_v8 }
 0x1a5   : >> { %v1826_v44 = vpop.f32.mrf.mxu1 }
 0x1a6   : >> { %v1851_v16 = vadd.f32 %v1843_v25, %v1519_v19 }
 0x1a8   : >> { %v1861_v34 = vrot.slane %v1851_v16, 2  ;;  %v1862_v38 = vrot.slane %v1851_v16, 4  ;;  %v1863_v33 = vrot.slane %v1851_v16, 6  ;;  %1876 = vst [vmem:[#allocation1 + $0x20] ss:$4 sm:$0xff] %v1851_v16  ;;  %v1924_v52 = vmul.f32 %v1851_v16, %v1851_v16 }
 0x1a9   : >> { %v1910_v60 = vsel %vm310_vm3, %v1851_v16, 0.0 }
 0x1aa   : >> { %1878 = vst [vmem:[#allocation1 + $0x21] ss:$4 sm:$0xff] %v1861_v34  ;;  %v1928_v42 = vsel %vm310_vm3, %v1924_v52, 0.0  ;;  %v1911_v24 = vadd.f32 %v1910_v60, %v1909_v28 }
 0x1ab   : >> { %1880 = vst [vmem:[#allocation1 + $0x22] ss:$4 sm:$0xff] %v1862_v38  ;;  %v1845_v26 = vpop.f32.mrf.mxu3  ;;  %v1881_v47 = vld.sshfl [vmem:[#allocation1] sm:$0xff pattern:$0x73625140]  ;;  %v1929_v3 = vadd.f32 %v1928_v42, %v1927_v35 }
 0x1ac   : >> { %v1846_v45 = vadd.f32 %v1845_v26, %v1826_v44  ;;  %1883 = vst [vmem:[#allocation1] ss:$4 sm:$0xff] %v1863_v33  ;;  %v1896_v48 = vpack.c.bf16 %v1881_v47, %v1881_v47 }
 0x1ad   : >> { %v1828_v62 = vpop.f32.mrf.mxu1 }
 0x1ae   : >> { %v1852_v51 = vadd.f32 %v1846_v45, %v1520_v57  ;;  %1904 = vst.msk [vmem:[%s3184_s24] sm:$0xf] %vm1903_vm12, %v1896_v48 }
 0x1b0   : >> { %v1864_v55 = vrot.slane %v1852_v51, 2  ;;  %v1865_v4 = vrot.slane %v1852_v51, 4  ;;  %v1866_v40 = vrot.slane %v1852_v51, 6  ;;  %1884 = vst [vmem:[#allocation1 + $0x1] ss:$4 sm:$0xff] %v1852_v51  ;;  %v1925_v61 = vmul.f32 %v1852_v51, %v1852_v51 }
 0x1b1   : >> { %v1912_v50 = vsel %vm310_vm3, %v1852_v51, 0.0 }
 0x1b2   : >> { %v1882_v59 = vld.sshfl [vmem:[#allocation1 + $0x20] sm:$0xff pattern:$0x73625140]  ;;  %1885 = vst [vmem:[#allocation1 + $0x2] ss:$4 sm:$0xff] %v1864_v55  ;;  %v1930_v54 = vsel %vm310_vm3, %v1925_v61, 0.0  ;;  %v1913_v32 = vadd.f32 %v1912_v50, %v1911_v24 }
 0x1b3   : >> { %v1847_v63 = vpop.f32.mrf.mxu3  ;;  %1886 = vst [vmem:[#allocation1 + $0x3] ss:$4 sm:$0xff] %v1865_v4  ;;  %v1897_v10 = vpack.c.bf16 %v1882_v59, %v1882_v59  ;;  %v1931_v21 = vadd.f32 %v1930_v54, %v1929_v3 }
 0x1b4   : >> { %v1848_v17 = vadd.f32 %v1847_v63, %v1828_v62  ;;  %1887 = vst [vmem:[#allocation1 + $0x20] ss:$4 sm:$0xff] %v1866_v40 }
 0x1b5   : >> { %1906 = vst.msk [vmem:[%s3184_s24 + $0x4] sm:$0x7] %vm1905_vm13, %v1897_v10 }
 0x1b6   : >> { %v1853_v22 = vadd.f32 %v1848_v17, %v1521_v14 }
 0x1b8   : >> { %v1867_v2 = vrot.slane %v1853_v22, 2  ;;  %1888 = vst [vmem:[#allocation1 + $0x21] ss:$4 sm:$0xff] %v1853_v22  ;;  %v1914_v6 = vsel %vm1903_vm12, %v1853_v22, 0.0  ;;  %v1926_v7 = vmul.f32 %v1853_v22, %v1853_v22 }
 0x1b9   : >> { %v1915_v37 = vadd.f32 %v1914_v6, %v1913_v32 }
 0x1ba   : >> { %1889 = vst [vmem:[#allocation1 + $0x22] ss:$4 sm:$0xff] %v1867_v2  ;;  %v1890_v8 = vld.sshfl [vmem:[#allocation1] sm:$0xff pattern:$0x73625140]  ;;  %v1932_v9 = vsel %vm1903_vm12, %v1926_v7, 0.0 }
 0x1bb   : >> { %v1898_v18 = vpack.c.bf16 %v1890_v8, %v1890_v8  ;;  %v1916_v11 = vrot.slane %v1915_v37, 4  ;;  %v1933_v12 = vadd.f32 %v1932_v9, %v1931_v21 }
 0x1bd   : >> { %1907 = vst.msk [vmem:[%s3184_s24 + $0x8] sm:$0xf] %vm1903_vm12, %v1898_v18  ;;  %v1917_v13 = vadd.f32 %v1916_v11, %v1915_v37  ;;  %v1934_v15 = vrot.slane %v1933_v12, 4 }
 0x1bf   : >> { %v1918_v39 = vrot.slane %v1917_v13, 2  ;;  %v1935_v19 = vadd.f32 %v1934_v15, %v1933_v12 }
 0x1c1   : >> { %v1891_v20 = vld.sshfl [vmem:[#allocation1 + $0x20] sm:$0xff pattern:$0x73625140]  ;;  %v1919_v5 = vadd.f32 %v1918_v39, %v1917_v13  ;;  %v1936_v25 = vrot.slane %v1935_v19, 2 }
 0x1c2   : >> { %v1899_v29 = vpack.c.bf16 %v1891_v20, %v1891_v20 }
 0x1c3   : >> { %v1920_v23 = vrot.slane %v1919_v5, 1  ;;  %v1937_v16 = vadd.f32 %v1936_v25, %v1935_v19 }
 0x1c4   : >> { %1908 = vst.msk [vmem:[%s3184_s24 + $0xc] sm:$0x7] %vm1905_vm13, %v1899_v29 }
 0x1c5   : >> { %v1921_v30 = vadd.f32 %v1920_v23, %v1919_v5  ;;  %v1938_v31 = vrot.slane %v1937_v16, 1 }
 0x1c7   : >> { %v1922_v34 = vadd.f32 %v2602_v1, %v1921_v30   ;;  %v1939_v38 = vadd.f32 %v1938_v31, %v1937_v16  ;;  %187 = sbr.rel (!%p185_p4) target bundleno = 16 (0x10), region = 128 }
 0x1c9   : >> { %v1940_v33 = vadd.f32 %v2598_v0, %v1939_v38   ;;  %v3225_v1 = vmov %v1922_v34  ;;  %1942 = vst.msk [vmem:[%s2642_s19] sm:$0x1] (%p185_p4), %vm1941_vm14, %v1922_v34 }
 0x1cb   : >> { %v3224_v0 = vmov %v1940_v33  ;;  %1943 = vst.msk [vmem:[%s2642_s19 + $0x1] sm:$0x1] (%p185_p4), %vm1941_vm14, %v1940_v33 }
 0x1cc PF: > { %s14_s12 = sadd.s32 1, %s2594_s12  }
 0x1cd   : > { %p11_p5 = scmp.ge.s32.totalorder %s14_s12, 4  }
 0x1cf   :  { %13 = sbr.rel (!%p11_p5) target bundleno = 1 (0x1), region = 139 }

// kernel: convnet_forward.9
= control target key start
LH: loop header
LB: loop body
LE: loop exit
PB: predicated region body
PF: predicated region fallthrough
CT: control target
= control target key end

     0   :  { %s3655_s0 = inlined_call_operand.vmem [shape: bf16[2,3136], index: 0, kind: input, shape index: {}]   ;;  %s3656_s1 = inlined_call_operand.vmem [shape: bf16[3136,10], index: 1, kind: input, shape index: {}]   ;;  %s3657_s2 = inlined_call_operand.vmem [shape: f32[1,10], index: 2, kind: input, shape index: {}]   ;;  %s3658_s3 = inlined_call_operand.hbm [shape: f32[2,10], index: 3, kind: output, shape index: {}]  }
   0x1   :  { %v2787_v0 = vld [vmem:[%s3656_s1 + $0x38] sm:$0xff]  ;;  %v2786_v4 = vld [vmem:[%s3656_s1 + $0x30] sm:$0xff]  ;;  %v2785_v8 = vld [vmem:[%s3656_s1 + $0x28] sm:$0xff] }
   0x2   :  { %v2803_v1 = vld [vmem:[%s3656_s1 + $0xb8] sm:$0xff]  ;;  %1652 = vmatpush.bf16.msra.mxu0 %v2787_v0  ;;  %v2802_v5 = vld [vmem:[%s3656_s1 + $0xb0] sm:$0xff]  ;;  %v2801_v9 = vld [vmem:[%s3656_s1 + $0xa8] sm:$0xff] }
   0x3   :  { %v2795_v2 = vld [vmem:[%s3656_s1 + $0x78] sm:$0xff]  ;;  %1678 = vmatpush.bf16.msra.mxu2 %v2803_v1  ;;  %v2794_v6 = vld [vmem:[%s3656_s1 + $0x70] sm:$0xff]  ;;  %v2793_v10 = vld [vmem:[%s3656_s1 + $0x68] sm:$0xff] }
   0x4   :  { %v2811_v3 = vld [vmem:[%s3656_s1 + $0xf8] sm:$0xff]  ;;  %1665 = vmatpush.bf16.msra.mxu1 %v2795_v2  ;;  %v2810_v7 = vld [vmem:[%s3656_s1 + $0xf0] sm:$0xff]  ;;  %v2809_v11 = vld [vmem:[%s3656_s1 + $0xe8] sm:$0xff] }
   0x5   :  { %1691 = vmatpush.bf16.msra.mxu3 %v2811_v3  ;;  %v2784_v12 = vld [vmem:[%s3656_s1 + $0x20] sm:$0xff]  ;;  %v2783_v16 = vld [vmem:[%s3656_s1 + $0x18] sm:$0xff]  ;;  %v2782_v21 = vld [vmem:[%s3656_s1 + $0x10] sm:$0xff] }
   0x6   :  { %1653 = vmatpush.bf16.msra.mxu0 %v2786_v4  ;;  %v2800_v13 = vld [vmem:[%s3656_s1 + $0xa0] sm:$0xff]  ;;  %v2799_v17 = vld [vmem:[%s3656_s1 + $0x98] sm:$0xff]  ;;  %v2798_v22 = vld [vmem:[%s3656_s1 + $0x90] sm:$0xff] }
   0x7   :  { %1679 = vmatpush.bf16.msra.mxu2 %v2802_v5  ;;  %v2792_v14 = vld [vmem:[%s3656_s1 + $0x60] sm:$0xff]  ;;  %v2791_v18 = vld [vmem:[%s3656_s1 + $0x58] sm:$0xff]  ;;  %v2790_v23 = vld [vmem:[%s3656_s1 + $0x50] sm:$0xff] }
   0x8   :  { %1666 = vmatpush.bf16.msra.mxu1 %v2794_v6  ;;  %v2808_v15 = vld [vmem:[%s3656_s1 + $0xe0] sm:$0xff]  ;;  %v2807_v19 = vld [vmem:[%s3656_s1 + $0xd8] sm:$0xff]  ;;  %v2806_v24 = vld [vmem:[%s3656_s1 + $0xd0] sm:$0xff] }
   0x9   :  { %1692 = vmatpush.bf16.msra.mxu3 %v2810_v7  ;;  %v16_v20 = vld [vmem:[%s3655_s0] sm:$0xff] }
   0xa   :  { %1654 = vmatpush.bf16.msra.mxu0 %v2785_v8  ;;  %417 = vst [vmem:[#allocation1] ss:$9 sm:$0xff] %v16_v20 }
   0xb   :  { %1680 = vmatpush.bf16.msra.mxu2 %v2801_v9 }
   0xc   :  { %1667 = vmatpush.bf16.msra.mxu1 %v2793_v10 }
   0xd   :  { %1693 = vmatpush.bf16.msra.mxu3 %v2809_v11 }
   0xe   :  { %1655 = vmatpush.bf16.msra.mxu0 %v2784_v12 }
   0xf   :  { %1681 = vmatpush.bf16.msra.mxu2 %v2800_v13 }
  0x10   :  { %1668 = vmatpush.bf16.msra.mxu1 %v2792_v14 }
  0x11   :  { %1694 = vmatpush.bf16.msra.mxu3 %v2808_v15 }
  0x12   :  { %1656 = vmatpush.bf16.msra.mxu0 %v2783_v16 }
  0x13   :  { %1682 = vmatpush.bf16.msra.mxu2 %v2799_v17 }
  0x14   :  { %1669 = vmatpush.bf16.msra.mxu1 %v2791_v18 }
  0x15   :  { %1695 = vmatpush.bf16.msra.mxu3 %v2807_v19 }
  0x16   :  { %8 = vsyncpa [#allocation3], 0  ;;  %1657 = vmatpush.bf16.msra.mxu0 %v2782_v21  ;;  %v2781_v25 = vld [vmem:[%s3656_s1 + $0x8] sm:$0xff]  ;;  %v2780_v29 = vld [vmem:[%s3656_s1] sm:$0xff]  ;;  %vm1649_vm0 = vcmask 523264   ;;  %s1986_s8 = sshll.u32 %s3658_s3, 4  ;;  %s1987_s8 = int_to_ptr.hbm [resolvable:$true] %s1986_s8 }
  0x17   :  { %1683 = vmatpush.bf16.msra.mxu2 %v2798_v22  ;;  %v2797_v26 = vld [vmem:[%s3656_s1 + $0x88] sm:$0xff]  ;;  %v2796_v30 = vld [vmem:[%s3656_s1 + $0x80] sm:$0xff]  ;;  %v2819_v31 = vld [vmem:[%s3656_s1 + $0x138] sm:$0xff]  ;;  %vm1977_vm1 = vcmask 74752  }
  0x18   :  { %1670 = vmatpush.bf16.msra.mxu1 %v2790_v23  ;;  %v2789_v27 = vld [vmem:[%s3656_s1 + $0x48] sm:$0xff]  ;;  %v2835_v32 = vld [vmem:[%s3656_s1 + $0x1b8] sm:$0xff]  ;;  %v2788_v33 = vld [vmem:[%s3656_s1 + $0x40] sm:$0xff] }
  0x19   :  { %1696 = vmatpush.bf16.msra.mxu3 %v2806_v24  ;;  %v2805_v28 = vld [vmem:[%s3656_s1 + $0xc8] sm:$0xff]  ;;  %v2804_v34 = vld [vmem:[%s3656_s1 + $0xc0] sm:$0xff]  ;;  %v2827_v35 = vld [vmem:[%s3656_s1 + $0x178] sm:$0xff] }
  0x1a   :  { %1658 = vmatpush.bf16.msra.mxu0 %v2781_v25  ;;  %v2843_v36 = vld [vmem:[%s3656_s1 + $0x1f8] sm:$0xff]  ;;  %v2818_v37 = vld [vmem:[%s3656_s1 + $0x130] sm:$0xff]  ;;  %v418_v40 = vld [vmem:[#allocation1] sm:$0xff] }
  0x1b   :  { %1684 = vmatpush.bf16.msra.mxu2 %v2797_v26  ;;  %v2834_v38 = vld [vmem:[%s3656_s1 + $0x1b0] sm:$0xff]  ;;  %v421_v43 = vld [vmem:[#allocation1 + $0x1b] sm:$0xff]  ;;  %v2817_v45 = vld [vmem:[%s3656_s1 + $0x128] sm:$0xff] }
  0x1c   :  { %1671 = vmatpush.bf16.msra.mxu1 %v2789_v27  ;;  %v420_v39 = vld [vmem:[#allocation1 + $0x12] sm:$0xff]  ;;  %v419_v44 = vld [vmem:[#allocation1 + $0x9] sm:$0xff]  ;;  %v3158_v49 = vld [vmem:[#allocation1 + $0x3f] sm:$0xff] }
  0x1d   :  { %1697 = vmatpush.bf16.msra.mxu3 %v2805_v28  ;;  %v2826_v41 = vld [vmem:[%s3656_s1 + $0x170] sm:$0xff]  ;;  %v2833_v46 = vld [vmem:[%s3656_s1 + $0x1a8] sm:$0xff]  ;;  %v2816_v54 = vld [vmem:[%s3656_s1 + $0x120] sm:$0xff] }
  0x1e   :  { %1659 = vmatpush.bf16.msra.mxu0 %v2780_v29  ;;  %v2842_v42 = vld [vmem:[%s3656_s1 + $0x1f0] sm:$0xff]  ;;  %v3156_v48 = vld [vmem:[#allocation1 + $0x24] sm:$0xff]  ;;  %v2815_v58 = vld [vmem:[%s3656_s1 + $0x118] sm:$0xff] }
  0x1f   :  { %1685 = vmatpush.bf16.msra.mxu2 %v2796_v30  ;;  %v3154_v47 = vld [vmem:[#allocation1 + $0x36] sm:$0xff]  ;;  %v17_v50 = vld [vmem:[%s3655_s0 + $0x8] sm:$0xff]  ;;  %v2832_v55 = vld [vmem:[%s3656_s1 + $0x1a0] sm:$0xff] }
  0x20   :  { %1672 = vmatpush.bf16.msra.mxu1 %v2788_v33  ;;  %v3163_v51 = vld [vmem:[#allocation1 + $0x2d] sm:$0xff]  ;;  %v2824_v56 = vld [vmem:[%s3656_s1 + $0x160] sm:$0xff]  ;;  %v2831_v59 = vld [vmem:[%s3656_s1 + $0x198] sm:$0xff] }
  0x21   :  { %1698 = vmatpush.bf16.msra.mxu3 %v2804_v34  ;;  %1660 = vmatmul.bf16.vlgmr.msra.gmra.mxu0 %v418_v40  ;;  %v2825_v52 = vld [vmem:[%s3656_s1 + $0x168] sm:$0xff]  ;;  %427 = vst [vmem:[#allocation1] ss:$9 sm:$0xff] %v17_v50  ;;  %v2840_v57 = vld [vmem:[%s3656_s1 + $0x1e0] sm:$0xff]  ;;  %v2823_v60 = vld [vmem:[%s3656_s1 + $0x158] sm:$0xff] }
  0x22   :  { %1704 = vmatpush.bf16.msrb.mxu0 %v2819_v31  ;;  %1686 = vmatmul.bf16.vlgmr.msra.gmra.mxu2 %v420_v39  ;;  %v2841_v53 = vld [vmem:[%s3656_s1 + $0x1e8] sm:$0xff]  ;;  %v2839_v61 = vld [vmem:[%s3656_s1 + $0x1d8] sm:$0xff]  ;;  %v2814_v62 = vld [vmem:[%s3656_s1 + $0x110] sm:$0xff] }
  0x23   :  { %1730 = vmatpush.bf16.msrb.mxu2 %v2835_v32  ;;  %1673 = vmatmul.bf16.vlgmr.msra.gmra.mxu1 %v419_v44  ;;  %v2830_v63 = vld [vmem:[%s3656_s1 + $0x190] sm:$0xff]  ;;  %v2813_v2 = vld [vmem:[%s3656_s1 + $0x108] sm:$0xff]  ;;  %v2812_v6 = vld [vmem:[%s3656_s1 + $0x100] sm:$0xff] }
  0x24   :  { %1717 = vmatpush.bf16.msrb.mxu1 %v2827_v35  ;;  %1699 = vmatmul.bf16.vlgmr.msra.gmra.mxu3 %v421_v43  ;;  %v2822_v0 = vld [vmem:[%s3656_s1 + $0x150] sm:$0xff]  ;;  %v2829_v3 = vld [vmem:[%s3656_s1 + $0x188] sm:$0xff]  ;;  %v2828_v7 = vld [vmem:[%s3656_s1 + $0x180] sm:$0xff] }
  0x25   :  { %1743 = vmatpush.bf16.msrb.mxu3 %v2843_v36  ;;  %v2838_v1 = vld [vmem:[%s3656_s1 + $0x1d0] sm:$0xff]  ;;  %v2821_v4 = vld [vmem:[%s3656_s1 + $0x148] sm:$0xff]  ;;  %v2851_v8 = vld [vmem:[%s3656_s1 + $0x238] sm:$0xff] }
  0x26   :  { %1705 = vmatpush.bf16.msrb.mxu0 %v2818_v37  ;;  %v2837_v5 = vld [vmem:[%s3656_s1 + $0x1c8] sm:$0xff]  ;;  %v2867_v9 = vld [vmem:[%s3656_s1 + $0x2b8] sm:$0xff]  ;;  %v2820_v10 = vld [vmem:[%s3656_s1 + $0x140] sm:$0xff] }
  0x27   :  { %1731 = vmatpush.bf16.msrb.mxu2 %v2834_v38  ;;  %v2836_v11 = vld [vmem:[%s3656_s1 + $0x1c0] sm:$0xff]  ;;  %v2859_v12 = vld [vmem:[%s3656_s1 + $0x278] sm:$0xff]  ;;  %v2850_v14 = vld [vmem:[%s3656_s1 + $0x230] sm:$0xff] }
  0x28   :  { %1718 = vmatpush.bf16.msrb.mxu1 %v2826_v41  ;;  %v2875_v13 = vld [vmem:[%s3656_s1 + $0x2f8] sm:$0xff]  ;;  %v2866_v15 = vld [vmem:[%s3656_s1 + $0x2b0] sm:$0xff]  ;;  %v2849_v18 = vld [vmem:[%s3656_s1 + $0x228] sm:$0xff] }
  0x29   :  { %1744 = vmatpush.bf16.msrb.mxu3 %v2842_v42  ;;  %v2858_v16 = vld [vmem:[%s3656_s1 + $0x270] sm:$0xff]  ;;  %v2865_v19 = vld [vmem:[%s3656_s1 + $0x2a8] sm:$0xff]  ;;  %v2848_v22 = vld [vmem:[%s3656_s1 + $0x220] sm:$0xff] }
  0x2a   :  { %1706 = vmatpush.bf16.msrb.mxu0 %v2817_v45  ;;  %v2874_v17 = vld [vmem:[%s3656_s1 + $0x2f0] sm:$0xff]  ;;  %v2857_v20 = vld [vmem:[%s3656_s1 + $0x268] sm:$0xff]  ;;  %v2864_v23 = vld [vmem:[%s3656_s1 + $0x2a0] sm:$0xff] }
  0x2b   :  { %1732 = vmatpush.bf16.msrb.mxu2 %v2833_v46  ;;  %v2873_v21 = vld [vmem:[%s3656_s1 + $0x2e8] sm:$0xff]  ;;  %v2856_v24 = vld [vmem:[%s3656_s1 + $0x260] sm:$0xff]  ;;  %v2847_v26 = vld [vmem:[%s3656_s1 + $0x218] sm:$0xff] }
  0x2c   :  { %1719 = vmatpush.bf16.msrb.mxu1 %v2825_v52  ;;  %v2872_v25 = vld [vmem:[%s3656_s1 + $0x2e0] sm:$0xff]  ;;  %v2863_v27 = vld [vmem:[%s3656_s1 + $0x298] sm:$0xff]  ;;  %v2846_v30 = vld [vmem:[%s3656_s1 + $0x210] sm:$0xff] }
  0x2d   :  { %1745 = vmatpush.bf16.msrb.mxu3 %v2841_v53  ;;  %v2855_v28 = vld [vmem:[%s3656_s1 + $0x258] sm:$0xff]  ;;  %v2862_v31 = vld [vmem:[%s3656_s1 + $0x290] sm:$0xff]  ;;  %v2845_v34 = vld [vmem:[%s3656_s1 + $0x208] sm:$0xff] }
  0x2e   :  { %1707 = vmatpush.bf16.msrb.mxu0 %v2816_v54  ;;  %v2871_v29 = vld [vmem:[%s3656_s1 + $0x2d8] sm:$0xff]  ;;  %v2854_v32 = vld [vmem:[%s3656_s1 + $0x250] sm:$0xff]  ;;  %v2861_v35 = vld [vmem:[%s3656_s1 + $0x288] sm:$0xff] }
  0x2f   :  { %1733 = vmatpush.bf16.msrb.mxu2 %v2832_v55  ;;  %v2870_v33 = vld [vmem:[%s3656_s1 + $0x2d0] sm:$0xff]  ;;  %v2853_v36 = vld [vmem:[%s3656_s1 + $0x248] sm:$0xff]  ;;  %v2844_v38 = vld [vmem:[%s3656_s1 + $0x200] sm:$0xff] }
  0x30   :  { %1720 = vmatpush.bf16.msrb.mxu1 %v2824_v56  ;;  %v2869_v37 = vld [vmem:[%s3656_s1 + $0x2c8] sm:$0xff]  ;;  %v2860_v39 = vld [vmem:[%s3656_s1 + $0x280] sm:$0xff]  ;;  %v2883_v40 = vld [vmem:[%s3656_s1 + $0x338] sm:$0xff] }
  0x31   :  { %1746 = vmatpush.bf16.msrb.mxu3 %v2840_v57  ;;  %v2899_v41 = vld [vmem:[%s3656_s1 + $0x3b8] sm:$0xff]  ;;  %v2852_v42 = vld [vmem:[%s3656_s1 + $0x240] sm:$0xff]  ;;  %v2882_v50 = vld [vmem:[%s3656_s1 + $0x330] sm:$0xff] }
  0x32   :  { %1708 = vmatpush.bf16.msrb.mxu0 %v2815_v58  ;;  %v2868_v43 = vld [vmem:[%s3656_s1 + $0x2c0] sm:$0xff]  ;;  %v2891_v44 = vld [vmem:[%s3656_s1 + $0x378] sm:$0xff]  ;;  %v2890_v52 = vld [vmem:[%s3656_s1 + $0x370] sm:$0xff] }
  0x33   :  { %1734 = vmatpush.bf16.msrb.mxu2 %v2831_v59  ;;  %v428_v45 = vld [vmem:[#allocation1] sm:$0xff]  ;;  %v430_v46 = vld [vmem:[#allocation1 + $0x12] sm:$0xff]  ;;  %v2881_v54 = vld [vmem:[%s3656_s1 + $0x328] sm:$0xff] }
  0x34   :  { %1721 = vmatpush.bf16.msrb.mxu1 %v2823_v60  ;;  %v2906_v53 = vld [vmem:[%s3656_s1 + $0x3f0] sm:$0xff]  ;;  %v2897_v55 = vld [vmem:[%s3656_s1 + $0x3a8] sm:$0xff]  ;;  %v2880_v58 = vld [vmem:[%s3656_s1 + $0x320] sm:$0xff] }
  0x35   :  { %1747 = vmatpush.bf16.msrb.mxu3 %v2839_v61  ;;  %v2889_v56 = vld [vmem:[%s3656_s1 + $0x368] sm:$0xff]  ;;  %v2896_v59 = vld [vmem:[%s3656_s1 + $0x3a0] sm:$0xff] }
  0x36   :  { %1709 = vmatpush.bf16.msrb.mxu0 %v2814_v62  ;;  %v2905_v57 = vld [vmem:[%s3656_s1 + $0x3e8] sm:$0xff]  ;;  %v2888_v60 = vld [vmem:[%s3656_s1 + $0x360] sm:$0xff]  ;;  %v2879_v62 = vld [vmem:[%s3656_s1 + $0x318] sm:$0xff] }
  0x37   :  { %1735 = vmatpush.bf16.msrb.mxu2 %v2830_v63  ;;  %v2904_v61 = vld [vmem:[%s3656_s1 + $0x3e0] sm:$0xff]  ;;  %v2895_v63 = vld [vmem:[%s3656_s1 + $0x398] sm:$0xff] }
  0x38   :  { %1722 = vmatpush.bf16.msrb.mxu1 %v2822_v0  ;;  %v2887_v0 = vld [vmem:[%s3656_s1 + $0x358] sm:$0xff] }
  0x39   :  { %1748 = vmatpush.bf16.msrb.mxu3 %v2838_v1  ;;  %v2903_v1 = vld [vmem:[%s3656_s1 + $0x3d8] sm:$0xff] }
  0x3a   :  { %1710 = vmatpush.bf16.msrb.mxu0 %v2813_v2  ;;  %v2878_v2 = vld [vmem:[%s3656_s1 + $0x310] sm:$0xff] }
  0x3b   :  { %1736 = vmatpush.bf16.msrb.mxu2 %v2829_v3  ;;  %v2894_v3 = vld [vmem:[%s3656_s1 + $0x390] sm:$0xff] }
  0x3c   :  { %1723 = vmatpush.bf16.msrb.mxu1 %v2821_v4  ;;  %v2886_v4 = vld [vmem:[%s3656_s1 + $0x350] sm:$0xff] }
  0x3d   :  { %1749 = vmatpush.bf16.msrb.mxu3 %v2837_v5  ;;  %v2902_v5 = vld [vmem:[%s3656_s1 + $0x3d0] sm:$0xff] }
  0x3e   :  { %1711 = vmatpush.bf16.msrb.mxu0 %v2812_v6  ;;  %v2877_v6 = vld [vmem:[%s3656_s1 + $0x308] sm:$0xff] }
  0x3f   :  { %1737 = vmatpush.bf16.msrb.mxu2 %v2828_v7  ;;  %v2893_v7 = vld [vmem:[%s3656_s1 + $0x388] sm:$0xff] }
  0x40   :  { %1724 = vmatpush.bf16.msrb.mxu1 %v2820_v10  ;;  %v433_v10 = vld [vmem:[#allocation1 + $0x2d] sm:$0xff] }
  0x41   :  { %1750 = vmatpush.bf16.msrb.mxu3 %v2836_v11  ;;  %1712 = vmatmul.bf16.vlgmr.msrb.gmra.mxu0 %v3156_v48  ;;  %v429_v48 = vld [vmem:[#allocation1 + $0x9] sm:$0xff]  ;;  %v435_v11 = vld [vmem:[#allocation1 + $0x3f] sm:$0xff] }
  0x42   :  { %1756 = vmatpush.bf16.msra.mxu0 %v2851_v8  ;;  %1738 = vmatmul.bf16.vlgmr.msrb.gmra.mxu2 %v3154_v47  ;;  %v2907_v47 = vld [vmem:[%s3656_s1 + $0x3f8] sm:$0xff]  ;;  %v432_v8 = vld [vmem:[#allocation1 + $0x24] sm:$0xff] }
  0x43   :  { %1782 = vmatpush.bf16.msra.mxu2 %v2867_v9  ;;  %1725 = vmatmul.bf16.vlgmr.msrb.gmra.mxu1 %v3163_v51  ;;  %v2898_v51 = vld [vmem:[%s3656_s1 + $0x3b0] sm:$0xff] }
  0x44   :  { %1769 = vmatpush.bf16.msra.mxu1 %v2859_v12  ;;  %1751 = vmatmul.bf16.vlgmr.msrb.gmra.mxu3 %v3158_v49  ;;  %v431_v49 = vld [vmem:[#allocation1 + $0x1b] sm:$0xff]  ;;  %v18_v12 = vld [vmem:[%s3655_s0 + $0x10] sm:$0xff] }
  0x45   :  { %1795 = vmatpush.bf16.msra.mxu3 %v2875_v13  ;;  %v434_v9 = vld [vmem:[#allocation1 + $0x36] sm:$0xff]  ;;  %v2885_v13 = vld [vmem:[%s3656_s1 + $0x348] sm:$0xff] }
  0x46   :  { %1757 = vmatpush.bf16.msra.mxu0 %v2850_v14  ;;  %437 = vst [vmem:[#allocation1] ss:$9 sm:$0xff] %v18_v12  ;;  %v2901_v14 = vld [vmem:[%s3656_s1 + $0x3c8] sm:$0xff]  ;;  %v2952_v12 = vld [vmem:[%s3656_s1 + $0x560] sm:$0xff] }
  0x47   :  { %1783 = vmatpush.bf16.msra.mxu2 %v2866_v15  ;;  %v2876_v15 = vld [vmem:[%s3656_s1 + $0x300] sm:$0xff] }
  0x48   :  { %1770 = vmatpush.bf16.msra.mxu1 %v2858_v16  ;;  %v2892_v16 = vld [vmem:[%s3656_s1 + $0x380] sm:$0xff] }
  0x49   :  { %1796 = vmatpush.bf16.msra.mxu3 %v2874_v17  ;;  %v2915_v17 = vld [vmem:[%s3656_s1 + $0x438] sm:$0xff] }
  0x4a   :  { %1758 = vmatpush.bf16.msra.mxu0 %v2849_v18  ;;  %v2931_v18 = vld [vmem:[%s3656_s1 + $0x4b8] sm:$0xff] }
  0x4b   :  { %1784 = vmatpush.bf16.msra.mxu2 %v2865_v19  ;;  %v2884_v19 = vld [vmem:[%s3656_s1 + $0x340] sm:$0xff] }
  0x4c   :  { %1771 = vmatpush.bf16.msra.mxu1 %v2857_v20  ;;  %v2900_v20 = vld [vmem:[%s3656_s1 + $0x3c0] sm:$0xff] }
  0x4d   :  { %1797 = vmatpush.bf16.msra.mxu3 %v2873_v21  ;;  %v2923_v21 = vld [vmem:[%s3656_s1 + $0x478] sm:$0xff] }
  0x4e   :  { %1759 = vmatpush.bf16.msra.mxu0 %v2848_v22  ;;  %v2939_v22 = vld [vmem:[%s3656_s1 + $0x4f8] sm:$0xff] }
  0x4f   :  { %1785 = vmatpush.bf16.msra.mxu2 %v2864_v23  ;;  %v2914_v23 = vld [vmem:[%s3656_s1 + $0x430] sm:$0xff] }
  0x50   :  { %1772 = vmatpush.bf16.msra.mxu1 %v2856_v24  ;;  %v2930_v24 = vld [vmem:[%s3656_s1 + $0x4b0] sm:$0xff] }
  0x51   :  { %1798 = vmatpush.bf16.msra.mxu3 %v2872_v25  ;;  %v2922_v25 = vld [vmem:[%s3656_s1 + $0x470] sm:$0xff] }
  0x52   :  { %1760 = vmatpush.bf16.msra.mxu0 %v2847_v26  ;;  %v2938_v26 = vld [vmem:[%s3656_s1 + $0x4f0] sm:$0xff] }
  0x53   :  { %1786 = vmatpush.bf16.msra.mxu2 %v2863_v27  ;;  %v2913_v27 = vld [vmem:[%s3656_s1 + $0x428] sm:$0xff] }
  0x54   :  { %1773 = vmatpush.bf16.msra.mxu1 %v2855_v28  ;;  %v2929_v28 = vld [vmem:[%s3656_s1 + $0x4a8] sm:$0xff] }
  0x55   :  { %1799 = vmatpush.bf16.msra.mxu3 %v2871_v29  ;;  %v2921_v29 = vld [vmem:[%s3656_s1 + $0x468] sm:$0xff] }
  0x56   :  { %1761 = vmatpush.bf16.msra.mxu0 %v2846_v30  ;;  %v2937_v30 = vld [vmem:[%s3656_s1 + $0x4e8] sm:$0xff] }
  0x57   :  { %1787 = vmatpush.bf16.msra.mxu2 %v2862_v31  ;;  %v2912_v31 = vld [vmem:[%s3656_s1 + $0x420] sm:$0xff] }
  0x58   :  { %1774 = vmatpush.bf16.msra.mxu1 %v2854_v32  ;;  %v2928_v32 = vld [vmem:[%s3656_s1 + $0x4a0] sm:$0xff] }
  0x59   :  { %1800 = vmatpush.bf16.msra.mxu3 %v2870_v33  ;;  %v2920_v33 = vld [vmem:[%s3656_s1 + $0x460] sm:$0xff] }
  0x5a   :  { %1762 = vmatpush.bf16.msra.mxu0 %v2845_v34  ;;  %v2936_v34 = vld [vmem:[%s3656_s1 + $0x4e0] sm:$0xff] }
  0x5b   :  { %1788 = vmatpush.bf16.msra.mxu2 %v2861_v35  ;;  %v2911_v35 = vld [vmem:[%s3656_s1 + $0x418] sm:$0xff] }
  0x5c   :  { %1775 = vmatpush.bf16.msra.mxu1 %v2853_v36  ;;  %v2927_v36 = vld [vmem:[%s3656_s1 + $0x498] sm:$0xff] }
  0x5d   :  { %1801 = vmatpush.bf16.msra.mxu3 %v2869_v37  ;;  %v2919_v37 = vld [vmem:[%s3656_s1 + $0x458] sm:$0xff] }
  0x5e   :  { %1763 = vmatpush.bf16.msra.mxu0 %v2844_v38  ;;  %v2935_v38 = vld [vmem:[%s3656_s1 + $0x4d8] sm:$0xff] }
  0x5f   :  { %1789 = vmatpush.bf16.msra.mxu2 %v2860_v39  ;;  %v2910_v39 = vld [vmem:[%s3656_s1 + $0x410] sm:$0xff] }
  0x60   :  { %1776 = vmatpush.bf16.msra.mxu1 %v2852_v42  ;;  %v2934_v42 = vld [vmem:[%s3656_s1 + $0x4d0] sm:$0xff] }
  0x61   :  { %1802 = vmatpush.bf16.msra.mxu3 %v2868_v43  ;;  %1764 = vmatmul.bf16.vlgmr.msra.gmra.mxu0 %v428_v45  ;;  %v2909_v43 = vld [vmem:[%s3656_s1 + $0x408] sm:$0xff] }
  0x62   :  { %1808 = vmatpush.bf16.msrb.mxu0 %v2883_v40  ;;  %1790 = vmatmul.bf16.vlgmr.msra.gmra.mxu2 %v430_v46  ;;  %v2926_v40 = vld [vmem:[%s3656_s1 + $0x490] sm:$0xff]  ;;  %v2917_v45 = vld [vmem:[%s3656_s1 + $0x448] sm:$0xff] }
  0x63   :  { %1834 = vmatpush.bf16.msrb.mxu2 %v2899_v41  ;;  %1777 = vmatmul.bf16.vlgmr.msra.gmra.mxu1 %v429_v48  ;;  %v2918_v41 = vld [vmem:[%s3656_s1 + $0x450] sm:$0xff]  ;;  %v2933_v46 = vld [vmem:[%s3656_s1 + $0x4c8] sm:$0xff]  ;;  %v2924_v48 = vld [vmem:[%s3656_s1 + $0x480] sm:$0xff] }
  0x64   :  { %1821 = vmatpush.bf16.msrb.mxu1 %v2891_v44  ;;  %1803 = vmatmul.bf16.vlgmr.msra.gmra.mxu3 %v431_v49  ;;  %v2925_v44 = vld [vmem:[%s3656_s1 + $0x488] sm:$0xff]  ;;  %v2947_v49 = vld [vmem:[%s3656_s1 + $0x538] sm:$0xff] }
  0x65   :  { %1847 = vmatpush.bf16.msrb.mxu3 %v2907_v47  ;;  %v2908_v47 = vld [vmem:[%s3656_s1 + $0x400] sm:$0xff] }
  0x66   :  { %1809 = vmatpush.bf16.msrb.mxu0 %v2882_v50  ;;  %v2963_v50 = vld [vmem:[%s3656_s1 + $0x5b8] sm:$0xff] }
  0x67   :  { %1835 = vmatpush.bf16.msrb.mxu2 %v2898_v51  ;;  %v2916_v51 = vld [vmem:[%s3656_s1 + $0x440] sm:$0xff] }
  0x68   :  { %1822 = vmatpush.bf16.msrb.mxu1 %v2890_v52  ;;  %v2932_v52 = vld [vmem:[%s3656_s1 + $0x4c0] sm:$0xff] }
  0x69   :  { %1848 = vmatpush.bf16.msrb.mxu3 %v2906_v53  ;;  %v2955_v53 = vld [vmem:[%s3656_s1 + $0x578] sm:$0xff] }
  0x6a   :  { %1810 = vmatpush.bf16.msrb.mxu0 %v2881_v54  ;;  %v438_v54 = vld [vmem:[#allocation1] sm:$0xff] }
  0x6b   :  { %1836 = vmatpush.bf16.msrb.mxu2 %v2897_v55  ;;  %v440_v55 = vld [vmem:[#allocation1 + $0x12] sm:$0xff] }
  0x6c   :  { %1823 = vmatpush.bf16.msrb.mxu1 %v2889_v56  ;;  %v2971_v56 = vld [vmem:[%s3656_s1 + $0x5f8] sm:$0xff] }
  0x6d   :  { %1849 = vmatpush.bf16.msrb.mxu3 %v2905_v57  ;;  %v439_v57 = vld [vmem:[#allocation1 + $0x9] sm:$0xff] }
  0x6e   :  { %1811 = vmatpush.bf16.msrb.mxu0 %v2880_v58  ;;  %v441_v58 = vld [vmem:[#allocation1 + $0x1b] sm:$0xff] }
  0x6f   :  { %1837 = vmatpush.bf16.msrb.mxu2 %v2896_v59  ;;  %v2946_v59 = vld [vmem:[%s3656_s1 + $0x530] sm:$0xff] }
  0x70   :  { %1824 = vmatpush.bf16.msrb.mxu1 %v2888_v60  ;;  %v2962_v60 = vld [vmem:[%s3656_s1 + $0x5b0] sm:$0xff] }
  0x71   :  { %1850 = vmatpush.bf16.msrb.mxu3 %v2904_v61  ;;  %v2954_v61 = vld [vmem:[%s3656_s1 + $0x570] sm:$0xff] }
  0x72   :  { %1812 = vmatpush.bf16.msrb.mxu0 %v2879_v62  ;;  %v2970_v62 = vld [vmem:[%s3656_s1 + $0x5f0] sm:$0xff] }
  0x73   :  { %1838 = vmatpush.bf16.msrb.mxu2 %v2895_v63  ;;  %v2945_v63 = vld [vmem:[%s3656_s1 + $0x528] sm:$0xff] }
  0x74   :  { %1825 = vmatpush.bf16.msrb.mxu1 %v2887_v0  ;;  %v2961_v0 = vld [vmem:[%s3656_s1 + $0x5a8] sm:$0xff] }
  0x75   :  { %1851 = vmatpush.bf16.msrb.mxu3 %v2903_v1  ;;  %v2953_v1 = vld [vmem:[%s3656_s1 + $0x568] sm:$0xff] }
  0x76   :  { %1813 = vmatpush.bf16.msrb.mxu0 %v2878_v2  ;;  %v2969_v2 = vld [vmem:[%s3656_s1 + $0x5e8] sm:$0xff] }
  0x77   :  { %1839 = vmatpush.bf16.msrb.mxu2 %v2894_v3  ;;  %v2977_v3 = vld [vmem:[%s3657_s2] ss:$0 sm:$0xff] }
  0x78   :  { %1826 = vmatpush.bf16.msrb.mxu1 %v2886_v4  ;;  %v3565_v4 = vld [vmem:[#allocation1 + $0x24] sm:$0xff] }
  0x79   :  { %1852 = vmatpush.bf16.msrb.mxu3 %v2902_v5  ;;  %v3567_v5 = vld [vmem:[#allocation1 + $0x36] sm:$0xff] }
  0x7a   :  { %1814 = vmatpush.bf16.msrb.mxu0 %v2877_v6  ;;  %v3569_v6 = vld [vmem:[#allocation1 + $0x2d] sm:$0xff] }
  0x7b   :  { %1840 = vmatpush.bf16.msrb.mxu2 %v2893_v7  ;;  %v3571_v7 = vld [vmem:[#allocation1 + $0x3f] sm:$0xff] }
  0x7c   :  { %1827 = vmatpush.bf16.msrb.mxu1 %v2885_v13  ;;  %v2968_v13 = vld [vmem:[%s3656_s1 + $0x5e0] sm:$0xff] }
  0x7d   :  { %1853 = vmatpush.bf16.msrb.mxu3 %v2901_v14 }
  0x7e   :  { %1815 = vmatpush.bf16.msrb.mxu0 %v2876_v15 }
  0x7f   :  { %1841 = vmatpush.bf16.msrb.mxu2 %v2892_v16  ;;  %v2943_v16 = vld [vmem:[%s3656_s1 + $0x518] sm:$0xff] }
  0x80   :  { %1828 = vmatpush.bf16.msrb.mxu1 %v2884_v19  ;;  %v2951_v19 = vld [vmem:[%s3656_s1 + $0x558] sm:$0xff] }
  0x81   :  { %1854 = vmatpush.bf16.msrb.mxu3 %v2900_v20  ;;  %1816 = vmatmul.bf16.vlgmr.msrb.gmra.mxu0 %v432_v8  ;;  %v19_v8 = vld [vmem:[%s3655_s0 + $0x18] sm:$0x1] }
  0x82   :  { %1860 = vmatpush.bf16.msra.mxu0 %v2915_v17  ;;  %1842 = vmatmul.bf16.vlgmr.msrb.gmra.mxu2 %v434_v9  ;;  %447 = vst [vmem:[#allocation1] ss:$9 sm:$0xff] %v19_v8  ;;  %v2944_v9 = vld [vmem:[%s3656_s1 + $0x520] sm:$0xff]  ;;  %v2959_v17 = vld [vmem:[%s3656_s1 + $0x598] sm:$0xff] }
  0x83   :  { %1886 = vmatpush.bf16.msra.mxu2 %v2931_v18  ;;  %1829 = vmatmul.bf16.vlgmr.msrb.gmra.mxu1 %v433_v10  ;;  %v2960_v10 = vld [vmem:[%s3656_s1 + $0x5a0] sm:$0xff]  ;;  %v2967_v20 = vld [vmem:[%s3656_s1 + $0x5d8] sm:$0xff] }
  0x84   :  { %1873 = vmatpush.bf16.msra.mxu1 %v2923_v21  ;;  %1855 = vmatmul.bf16.vlgmr.msrb.gmra.mxu3 %v435_v11 }
  0x85   :  { %1899 = vmatpush.bf16.msra.mxu3 %v2939_v22  ;;  %v2942_v22 = vld [vmem:[%s3656_s1 + $0x510] sm:$0xff] }
  0x86   :  { %1861 = vmatpush.bf16.msra.mxu0 %v2914_v23  ;;  %v2958_v23 = vld [vmem:[%s3656_s1 + $0x590] sm:$0xff] }
  0x87   :  { %1887 = vmatpush.bf16.msra.mxu2 %v2930_v24 }
  0x88   :  { %1874 = vmatpush.bf16.msra.mxu1 %v2922_v25 }
  0x89   :  { %1900 = vmatpush.bf16.msra.mxu3 %v2938_v26 }
  0x8a   :  { %1862 = vmatpush.bf16.msra.mxu0 %v2913_v27  ;;  %v2950_v27 = vld [vmem:[%s3656_s1 + $0x550] sm:$0xff] }
  0x8b   :  { %1888 = vmatpush.bf16.msra.mxu2 %v2929_v28  ;;  %v2966_v28 = vld [vmem:[%s3656_s1 + $0x5d0] sm:$0xff] }
  0x8c   :  { %1875 = vmatpush.bf16.msra.mxu1 %v2921_v29 }
  0x8d   :  { %1901 = vmatpush.bf16.msra.mxu3 %v2937_v30 }
  0x8e   :  { %1863 = vmatpush.bf16.msra.mxu0 %v2912_v31  ;;  %v2941_v31 = vld [vmem:[%s3656_s1 + $0x508] sm:$0xff] }
  0x8f   :  { %1889 = vmatpush.bf16.msra.mxu2 %v2928_v32  ;;  %v2957_v32 = vld [vmem:[%s3656_s1 + $0x588] sm:$0xff] }
  0x90   :  { %1876 = vmatpush.bf16.msra.mxu1 %v2920_v33  ;;  %v2949_v33 = vld [vmem:[%s3656_s1 + $0x548] sm:$0xff] }
  0x91   :  { %1902 = vmatpush.bf16.msra.mxu3 %v2936_v34  ;;  %v2965_v34 = vld [vmem:[%s3656_s1 + $0x5c8] sm:$0xff] }
  0x92   :  { %1864 = vmatpush.bf16.msra.mxu0 %v2911_v35 }
  0x93   :  { %1890 = vmatpush.bf16.msra.mxu2 %v2927_v36  ;;  %v2940_v36 = vld [vmem:[%s3656_s1 + $0x500] sm:$0xff] }
  0x94   :  { %1877 = vmatpush.bf16.msra.mxu1 %v2919_v37  ;;  %v2956_v37 = vld [vmem:[%s3656_s1 + $0x580] sm:$0xff] }
  0x95   :  { %1903 = vmatpush.bf16.msra.mxu3 %v2935_v38  ;;  %v2975_v38 = vld [vmem:[%s3656_s1 + $0x618] sm:$0xff] }
  0x96   :  { %1865 = vmatpush.bf16.msra.mxu0 %v2910_v39 }
  0x97   :  { %1891 = vmatpush.bf16.msra.mxu2 %v2926_v40  ;;  %v2948_v40 = vld [vmem:[%s3656_s1 + $0x540] sm:$0xff] }
  0x98   :  { %1878 = vmatpush.bf16.msra.mxu1 %v2918_v41  ;;  %v2964_v41 = vld [vmem:[%s3656_s1 + $0x5c0] sm:$0xff] }
  0x99   :  { %1904 = vmatpush.bf16.msra.mxu3 %v2934_v42  ;;  %v2974_v42 = vld [vmem:[%s3656_s1 + $0x610] sm:$0xff] }
  0x9a   :  { %1866 = vmatpush.bf16.msra.mxu0 %v2909_v43  ;;  %v2973_v43 = vld [vmem:[%s3656_s1 + $0x608] sm:$0xff] }
  0x9b   :  { %1892 = vmatpush.bf16.msra.mxu2 %v2925_v44  ;;  %v2972_v44 = vld [vmem:[%s3656_s1 + $0x600] sm:$0xff]  ;;  %s3004_s1 = smov [#allocation2]  }
  0x9c   :  { %1879 = vmatpush.bf16.msra.mxu1 %v2917_v45  ;;  %s1984_s5 = sshll.u32 %s3004_s1, 4  ;;  %s1985_s5 = int_to_ptr.vmem [resolvable:$true] %s1984_s5 }
  0x9d   :  { %1905 = vmatpush.bf16.msra.mxu3 %v2933_v46 }
  0x9e   :  { %1867 = vmatpush.bf16.msra.mxu0 %v2908_v47  ;;  %v1661_v11 = vpop.f32.mrf.mxu0 }
  0x9f   :  { %1893 = vmatpush.bf16.msra.mxu2 %v2924_v48  ;;  %v1662_v14 = vadd.f32 %v2977_v3, %v1661_v11 }
  0xa0   :  { %1880 = vmatpush.bf16.msra.mxu1 %v2916_v51  ;;  %v1674_v15 = vpop.f32.mrf.mxu1 }
  0xa1   :  { %1906 = vmatpush.bf16.msra.mxu3 %v2932_v52  ;;  %1868 = vmatmul.bf16.vlgmr.msra.gmra.mxu0 %v438_v54  ;;  %v1675_v18 = vadd.f32 %v1674_v15, %v1662_v14 }
  0xa2   :  { %1912 = vmatpush.bf16.msrb.mxu0 %v2947_v49  ;;  %1894 = vmatmul.bf16.vlgmr.msra.gmra.mxu2 %v440_v55  ;;  %v448_v49 = vld [vmem:[#allocation1] sm:$0xff] }
  0xa3   :  { %1938 = vmatpush.bf16.msrb.mxu2 %v2963_v50  ;;  %1881 = vmatmul.bf16.vlgmr.msra.gmra.mxu1 %v439_v57 }
  0xa4   :  { %1925 = vmatpush.bf16.msrb.mxu1 %v2955_v53  ;;  %1907 = vmatmul.bf16.vlgmr.msra.gmra.mxu3 %v441_v58 }
  0xa5   :  { %1951 = vmatpush.bf16.msrb.mxu3 %v2971_v56  ;;  %v1687_v21 = vpop.f32.mrf.mxu2 }
  0xa6   :  { %1913 = vmatpush.bf16.msrb.mxu0 %v2946_v59  ;;  %v1688_v24 = vadd.f32 %v1687_v21, %v1675_v18  ;;  %v1663_v26 = vpop.f32.mrf.mxu0 }
  0xa7   :  { %1939 = vmatpush.bf16.msrb.mxu2 %v2962_v60  ;;  %v1700_v25 = vpop.f32.mrf.mxu3 }
  0xa8   :  { %1926 = vmatpush.bf16.msrb.mxu1 %v2954_v61  ;;  %v1701_v29 = vadd.f32 %v1700_v25, %v1688_v24  ;;  %v1676_v30 = vpop.f32.mrf.mxu1 }
  0xa9   :  { %1952 = vmatpush.bf16.msrb.mxu3 %v2970_v62 }
  0xaa   :  { %1914 = vmatpush.bf16.msrb.mxu0 %v2945_v63 }
  0xab   :  { %1940 = vmatpush.bf16.msrb.mxu2 %v2961_v0 }
  0xac   :  { %1927 = vmatpush.bf16.msrb.mxu1 %v2953_v1 }
  0xad   :  { %1953 = vmatpush.bf16.msrb.mxu3 %v2969_v2  ;;  %v1689_v35 = vpop.f32.mrf.mxu2 }
  0xae   :  { %1915 = vmatpush.bf16.msrb.mxu0 %v2944_v9 }
  0xaf   :  { %1941 = vmatpush.bf16.msrb.mxu2 %v2960_v10  ;;  %v1702_v39 = vpop.f32.mrf.mxu3 }
  0xb0   :  { %1928 = vmatpush.bf16.msrb.mxu1 %v2952_v12 }
  0xb1   :  { %1954 = vmatpush.bf16.msrb.mxu3 %v2968_v13 }
  0xb2   :  { %1916 = vmatpush.bf16.msrb.mxu0 %v2943_v16 }
  0xb3   :  { %1942 = vmatpush.bf16.msrb.mxu2 %v2959_v17 }
  0xb4   :  { %1929 = vmatpush.bf16.msrb.mxu1 %v2951_v19 }
  0xb5   :  { %1955 = vmatpush.bf16.msrb.mxu3 %v2967_v20 }
  0xb6   :  { %1917 = vmatpush.bf16.msrb.mxu0 %v2942_v22 }
  0xb7   :  { %1943 = vmatpush.bf16.msrb.mxu2 %v2958_v23 }
  0xb8   :  { %1930 = vmatpush.bf16.msrb.mxu1 %v2950_v27 }
  0xb9   :  { %1956 = vmatpush.bf16.msrb.mxu3 %v2966_v28 }
  0xba   :  { %1918 = vmatpush.bf16.msrb.mxu0 %v2941_v31 }
  0xbb   :  { %1944 = vmatpush.bf16.msrb.mxu2 %v2957_v32 }
  0xbc   :  { %1931 = vmatpush.bf16.msrb.mxu1 %v2949_v33 }
  0xbd   :  { %1957 = vmatpush.bf16.msrb.mxu3 %v2965_v34 }
  0xbe   :  { %1919 = vmatpush.bf16.msrb.mxu0 %v2940_v36  ;;  %v1713_v45 = vpop.f32.mrf.mxu0 }
  0xbf   :  { %1945 = vmatpush.bf16.msrb.mxu2 %v2956_v37  ;;  %v1714_v46 = vadd.f32 %v1713_v45, %v1701_v29 }
  0xc0   :  { %1932 = vmatpush.bf16.msrb.mxu1 %v2948_v40  ;;  %v1726_v47 = vpop.f32.mrf.mxu1 }
  0xc1   :  { %1958 = vmatpush.bf16.msrb.mxu3 %v2964_v41  ;;  %1920 = vmatmul.bf16.vlgmr.msrb.gmra.mxu0 %v3565_v4  ;;  %v1727_v48 = vadd.f32 %v1726_v47, %v1714_v46 }
  0xc2   :  { %1968 = vmatpush.bf16.msra.mxu0 %v2975_v38  ;;  %1946 = vmatmul.bf16.vlgmr.msrb.gmra.mxu2 %v3567_v5 }
  0xc3   :  { %1933 = vmatmul.bf16.vlgmr.msrb.gmra.mxu1 %v3569_v6 }
  0xc4   :  { %1959 = vmatmul.bf16.vlgmr.msrb.gmra.mxu3 %v3571_v7 }
  0xc5   :  { %v1739_v50 = vpop.f32.mrf.mxu2 }
  0xc6   :  { %1969 = vmatpush.bf16.msra.mxu0 %v2974_v42  ;;  %v1740_v51 = vadd.f32 %v1739_v50, %v1727_v48  ;;  %v1715_v53 = vpop.f32.mrf.mxu0 }
  0xc7   :  { %v1752_v52 = vpop.f32.mrf.mxu3 }
  0xc8   :  { %v1753_v54 = vadd.f32 %v1752_v52, %v1740_v51  ;;  %v1728_v55 = vpop.f32.mrf.mxu1 }
  0xca   :  { %1970 = vmatpush.bf16.msra.mxu0 %v2973_v43 }
  0xcd   :  { %v1741_v56 = vpop.f32.mrf.mxu2 }
  0xce   :  { %1971 = vmatpush.bf16.msra.mxu0 %v2972_v44 }
  0xcf   :  { %v1754_v57 = vpop.f32.mrf.mxu3 }
  0xd1   :  { %2779 = vmatmul.msk.bf16.vlgmr.msra.gmra.mxu0 %vm1649_vm0, %v448_v49 }
  0xde   :  { %v1765_v58 = vpop.f32.mrf.mxu0 }
  0xdf   :  { %v1766_v59 = vadd.f32 %v1765_v58, %v1753_v54 }
  0xe0   :  { %v1778_v60 = vpop.f32.mrf.mxu1 }
  0xe1   :  { %v1779_v61 = vadd.f32 %v1778_v60, %v1766_v59 }
  0xe5   :  { %v1791_v62 = vpop.f32.mrf.mxu2 }
  0xe6   :  { %v1792_v63 = vadd.f32 %v1791_v62, %v1779_v61  ;;  %v1767_v1 = vpop.f32.mrf.mxu0 }
  0xe7   :  { %v1804_v0 = vpop.f32.mrf.mxu3 }
  0xe8   :  { %v1805_v2 = vadd.f32 %v1804_v0, %v1792_v63  ;;  %v1780_v3 = vpop.f32.mrf.mxu1 }
  0xed   :  { %v1793_v4 = vpop.f32.mrf.mxu2 }
  0xef   :  { %v1806_v5 = vpop.f32.mrf.mxu3 }
  0xfe   :  { %v1817_v6 = vpop.f32.mrf.mxu0 }
  0xff   :  { %v1818_v20 = vadd.f32 %v1817_v6, %v1805_v2 }
 0x100   :  { %v1830_v7 = vpop.f32.mrf.mxu1 }
 0x101   :  { %v1831_v22 = vadd.f32 %v1830_v7, %v1818_v20 }
 0x105   :  { %v1843_v8 = vpop.f32.mrf.mxu2 }
 0x106   :  { %v1819_v10 = vpop.f32.mrf.mxu0  ;;  %v1844_v24 = vadd.f32 %v1843_v8, %v1831_v22 }
 0x107   :  { %v1856_v9 = vpop.f32.mrf.mxu3 }
 0x108   :  { %v1832_v11 = vpop.f32.mrf.mxu1  ;;  %v1857_v25 = vadd.f32 %v1856_v9, %v1844_v24 }
 0x10d   :  { %v1845_v12 = vpop.f32.mrf.mxu2 }
 0x10f   :  { %v1858_v13 = vpop.f32.mrf.mxu3 }
 0x11e   :  { %v1869_v14 = vpop.f32.mrf.mxu0 }
 0x11f   :  { %v1870_v26 = vadd.f32 %v1869_v14, %v1857_v25 }
 0x120   :  { %v1882_v15 = vpop.f32.mrf.mxu1 }
 0x121   :  { %v1883_v27 = vadd.f32 %v1882_v15, %v1870_v26 }
 0x125   :  { %v1895_v16 = vpop.f32.mrf.mxu2 }
 0x126   :  { %v1871_v18 = vpop.f32.mrf.mxu0  ;;  %v1896_v28 = vadd.f32 %v1895_v16, %v1883_v27 }
 0x127   :  { %v1908_v17 = vpop.f32.mrf.mxu3 }
 0x128   :  { %v1884_v19 = vpop.f32.mrf.mxu1  ;;  %v1909_v31 = vadd.f32 %v1908_v17, %v1896_v28 }
 0x12d   :  { %v1897_v21 = vpop.f32.mrf.mxu2 }
 0x12f   :  { %v1910_v23 = vpop.f32.mrf.mxu3 }
 0x13e   :  { %v1921_v29 = vpop.f32.mrf.mxu0 }
 0x13f   :  { %v1922_v32 = vadd.f32 %v1921_v29, %v1909_v31 }
 0x140   :  { %v1934_v30 = vpop.f32.mrf.mxu1 }
 0x141   :  { %v1935_v36 = vadd.f32 %v1934_v30, %v1922_v32 }
 0x145   :  { %v1947_v33 = vpop.f32.mrf.mxu2 }
 0x146   :  { %v1923_v34 = vpop.f32.mrf.mxu0  ;;  %v1948_v38 = vadd.f32 %v1947_v33, %v1935_v36 }
 0x147   :  { %v1960_v35 = vpop.f32.mrf.mxu3 }
 0x148   :  { %v1936_v37 = vpop.f32.mrf.mxu1  ;;  %v1961_v40 = vadd.f32 %v1960_v35, %v1948_v38 }
 0x14d   :  { %v1949_v39 = vpop.f32.mrf.mxu2 }
 0x14e   :  { %v1973_v42 = vpop.f32.mrf.mxu0 }
 0x14f   :  { %v1962_v41 = vpop.f32.mrf.mxu3  ;;  %v1974_v43 = vadd.f32 %v1973_v42, %v1961_v40 }
 0x151   :  { %1978 = vst.msk [vmem:[#allocation2] sm:$0x3] %vm1977_vm1, %v1974_v43 }
 0x152   :  { %1989 = dma.vmem_to_hbm [thread:$0]  %s1985_s5, 32, %s1987_s8, [#allocation3]  }
 0x156   :  { %v1975_v44 = vpop.f32.mrf.mxu0 }
 0x157   :  { %3002 = dma.done.wait [#allocation3], 32  }
 0x158   :  { %3003 = vsyncadd [#allocation3], 4294967264 }
 0x159   :  { %1994 = vsyncpa [#allocation3], 1 }

</bundles_post_ra>
